<compile_context>
chip_gen: v5e
topology: v5e:2x2
jax: 0.10.0
libtpu: 0.0.40
codegen_flags: <defaults>
</compile_context>

<pallas_src>
import functools

import jax
import jax.numpy as jnp
from jax import lax
from jax.experimental import pallas as pl
from jax.experimental.pallas import tpu as pltpu


# --------------------------------------------------------------------------
# small host-side constant builders (tiny, computed once per call)
# --------------------------------------------------------------------------

def _group_select_matrix(C, group, dtype=jnp.float32):
    """S[c, g] = 1 if lane c belongs to group g (groups of `group` consecutive lanes)."""
    lane = jnp.arange(C, dtype=jnp.int32)[:, None] // group
    gid = jnp.arange(C // group, dtype=jnp.int32)[None, :]
    return (lane == gid).astype(dtype)


def _head_select_matrix(E, num_heads, dtype=jnp.float32):
    """G[e, h] = 1 if embedding lane e belongs to head h."""
    hd = E // num_heads
    e = jnp.arange(E, dtype=jnp.int32)[:, None] // hd
    h = jnp.arange(num_heads, dtype=jnp.int32)[None, :]
    return (e == h).astype(dtype)


# --------------------------------------------------------------------------
# in-kernel grouped LayerNorm on a lane-dense 2D block (centered variance)
# --------------------------------------------------------------------------

def _grouped_layernorm(x, sel, gamma, beta, group, eps):
    """LayerNorm over aligned groups of `group` consecutive lanes of x (R, C).

    Group mean / variance are computed with tiny MXU matmuls against the one-hot
    group-membership matrix `sel` (C, C//group) and broadcast back with its transpose
    (trans_b dot), so the block stays lane-dense (no in-register reshapes).
    """
    inv_n = 1.0 / float(group)
    gsum = lax.dot_general(x, sel, (((1,), (0,)), ((), ())),
                           preferred_element_type=jnp.float32)            # (R, C//g)
    mean = lax.dot_general(gsum, sel, (((1,), (1,)), ((), ())),
                           preferred_element_type=jnp.float32) * inv_n     # (R, C)
    d = x - mean
    gvar = lax.dot_general(d * d, sel, (((1,), (0,)), ((), ())),
                           preferred_element_type=jnp.float32)
    var = lax.dot_general(gvar, sel, (((1,), (1,)), ((), ())),
                          preferred_element_type=jnp.float32) * inv_n
    return d * lax.rsqrt(var + eps) * gamma + beta


# --------------------------------------------------------------------------
# Kernel A: LN1 + packed QKV in-projection (K-tiled over E, batch folded)
#           + multi-head attention + out-projection + residual + LN2
# --------------------------------------------------------------------------

def _attn_block_kernel(x_ref, xr_ref, ln1g_ref, ln1b_ref, ln2g_ref, ln2b_ref,
                       sel_ref, w_in_ref, b_in_ref, w_out_ref, b_out_ref, hsel_ref,
                       y_ref, yn2_ref, acc_ref, *, E, HH, group, eps, scale):
    k = pl.program_id(0)
    nB = x_ref.shape[0]

    @pl.when(k == 0)
    def _init():
        acc_ref[...] = jnp.zeros_like(acc_ref)

    # ---- LN1 on the streamed (B, tE, HH) block, batches stacked along lanes ----
    xs = jnp.concatenate([x_ref[b].astype(jnp.float32) for b in range(nB)], axis=1)
    xn = _grouped_layernorm(xs, sel_ref[...], ln1g_ref[...], ln1b_ref[...], group, eps)

    # ---- packed QKV projection, K-tiled over E, standard (M,K)x(K,N) form ----
    # acc(3E, B*HH) += W_in_tile(3E, tE) @ xn(tE, B*HH)
    acc_ref[...] += lax.dot_general(
        w_in_ref[...].astype(jnp.float32), xn,
        dimension_numbers=(((1,), (0,)), ((), ())),
        preferred_element_type=jnp.float32)

    # ---- epilogue: attention + out-proj + residual + LN2, all resident in VMEM ----
    @pl.when(k == pl.num_programs(0) - 1)
    def _epilogue():
        qkv = acc_ref[...] + b_in_ref[...]                        # (3E, N)
        G = hsel_ref[...]                                          # (E, heads)

        # PyTorch quirk (batch_first=False): the ORIGINAL batch axis is the sequence
        # axis (L = B); the HH spatial positions are the attention "batch".
        q = jnp.transpose(qkv[0:E, :]) * scale                     # (N, E)
        kk = jnp.transpose(qkv[E:2 * E, :])                        # (N, E)
        v = jnp.transpose(qkv[2 * E:3 * E, :])                     # (N, E)

        # scores for all (l, m) sequence pairs, all heads, in ONE MXU dot
        prods = jnp.concatenate(
            [q[l * HH:(l + 1) * HH, :] * kk[m * HH:(m + 1) * HH, :]
             for l in range(nB) for m in range(nB)], axis=0)       # (B*B*HH, E)
        s_all = lax.dot_general(prods, G, (((1,), (0,)), ((), ())),
                                preferred_element_type=jnp.float32)  # (B*B*HH, heads)

        def pair(l, m):
            return s_all[(l * nB + m) * HH:(l * nB + m + 1) * HH, :]

        # softmax over the m (sequence) axis, per position & head
        p_list = []
        for l in range(nB):
            mx = pair(l, 0)
            for m in range(1, nB):
                mx = jnp.maximum(mx, pair(l, m))
            ps = [jnp.exp(pair(l, m) - mx) for m in range(nB)]
            denom = ps[0]
            for m in range(1, nB):
                denom = denom + ps[m]
            inv = pl.reciprocal(denom)                              # exact reciprocal
            p_list.extend([p * inv for p in ps])
        p_all = jnp.concatenate(p_list, axis=0)                     # (B*B*HH, heads)

        # broadcast per-head probabilities back to E lanes with one trans_b dot
        pb_all = lax.dot_general(p_all, G, (((1,), (1,)), ((), ())),
                                 preferred_element_type=jnp.float32)  # (B*B*HH, E)

        outs = []
        for l in range(nB):
            o_l = pb_all[(l * nB) * HH:(l * nB + 1) * HH, :] * v[0:HH, :]
            for m in range(1, nB):
                o_l = o_l + (pb_all[(l * nB + m) * HH:(l * nB + m + 1) * HH, :]
                             * v[m * HH:(m + 1) * HH, :])
            outs.append(o_l)
        attn = jnp.concatenate(outs, axis=0)                        # (N, E)

        # out-projection with both batches stacked along N (full 128 lanes)
        y = lax.dot_general(w_out_ref[...].astype(jnp.float32), attn,
                            (((1,), (1,)), ((), ())),
                            preferred_element_type=jnp.float32)     # (E, N)
        xr = jnp.concatenate([xr_ref[b].astype(jnp.float32) for b in range(nB)],
                             axis=1)                                # (E, N)
        y = y + b_out_ref[...] + xr

        # LN2 fused here so the MLP kernel streams pure matmul tiles
        yn2 = _grouped_layernorm(y, sel_ref[...], ln2g_ref[...], ln2b_ref[...],
                                 group, eps)
        for b in range(nB):
            y_ref[b] = y[:, b * HH:(b + 1) * HH].astype(y_ref.dtype)
            yn2_ref[b] = yn2[:, b * HH:(b + 1) * HH].astype(yn2_ref.dtype)


def attention_block(x3, ln1_g, ln1_b, ln2_g, ln2_b, w_in, b_in, w_out, b_out,
                    *, num_heads, group, eps=1e-5, e_tile=256):
    B, E, HH = x3.shape
    threeE = w_in.shape[0]
    N = B * HH
    tE = min(e_tile, E)
    assert E % tE == 0 and E % num_heads == 0 and HH % group == 0
    hd = E // num_heads
    scale = float(hd) ** -0.5

    reps = N // group
    g1 = jnp.tile(ln1_g.astype(jnp.float32), reps).reshape(1, N)
    b1 = jnp.tile(ln1_b.astype(jnp.float32), reps).reshape(1, N)
    g2 = jnp.tile(ln2_g.astype(jnp.float32), reps).reshape(1, N)
    b2 = jnp.tile(ln2_b.astype(jnp.float32), reps).reshape(1, N)
    sel = _group_select_matrix(N, group)
    G = _head_select_matrix(E, num_heads)

    kernel = functools.partial(_attn_block_kernel, E=E, HH=HH, group=group,
                               eps=eps, scale=scale)
    y, yn2 = pl.pallas_call(
        kernel,
        out_shape=(jax.ShapeDtypeStruct((B, E, HH), jnp.float32),
                   jax.ShapeDtypeStruct((B, E, HH), jnp.float32)),
        grid=(E // tE,),
        in_specs=[
            pl.BlockSpec((B, tE, HH), lambda k: (0, k, 0)),     # x, tiled for LN1+proj
            pl.BlockSpec((B, E, HH), lambda k: (0, 0, 0)),      # x, resident (residual)
            pl.BlockSpec((1, N), lambda k: (0, 0)),             # ln1 gamma (tiled)
            pl.BlockSpec((1, N), lambda k: (0, 0)),             # ln1 beta
            pl.BlockSpec((1, N), lambda k: (0, 0)),             # ln2 gamma
            pl.BlockSpec((1, N), lambda k: (0, 0)),             # ln2 beta
            pl.BlockSpec((N, N // group), lambda k: (0, 0)),    # group selector
            pl.BlockSpec((threeE, tE), lambda k: (0, k)),       # in_proj weight tile
            pl.BlockSpec((threeE, 1), lambda k: (0, 0)),        # in_proj bias
            pl.BlockSpec((E, E), lambda k: (0, 0)),             # out_proj weight
            pl.BlockSpec((E, 1), lambda k: (0, 0)),             # out_proj bias
            pl.BlockSpec((E, num_heads), lambda k: (0, 0)),     # head selector
        ],
        out_specs=(pl.BlockSpec((B, E, HH), lambda k: (0, 0, 0)),
                   pl.BlockSpec((B, E, HH), lambda k: (0, 0, 0))),
        scratch_shapes=[pltpu.VMEM((threeE, N), jnp.float32)],
        compiler_params=pltpu.CompilerParams(dimension_semantics=("arbitrary",)),
    )(x3, x3, g1, b1, g2, b2, sel, w_in, b_in.reshape(threeE, 1),
      w_out, b_out.reshape(E, 1), G)
    return y, yn2


# --------------------------------------------------------------------------
# Kernel B: fc1 (K-tiled, streamed bf16 weight, f32 accumulator) + ReLU
#           + fc2 + ReLU   (LN2 already applied by Kernel A)
# --------------------------------------------------------------------------

def _mlp_head_kernel(yn_ref, w1_ref, b1_ref, w2_ref, b2_ref, h2_ref, acc_ref):
    k = pl.program_id(0)

    @pl.when(k == 0)
    def _init():
        acc_ref[...] = jnp.zeros_like(acc_ref)

    # acc(B, hidden) += yn_tile(B, tK) @ fc1_w_tile(hidden, tK)^T
    acc_ref[...] += lax.dot_general(
        yn_ref[...].astype(jnp.float32), w1_ref[...].astype(jnp.float32),
        dimension_numbers=(((1,), (1,)), ((), ())),
        preferred_element_type=jnp.float32)

    @pl.when(k == pl.num_programs(0) - 1)
    def _done():
        h1 = jnp.maximum(acc_ref[...] + b1_ref[...], 0.0)
        h2 = lax.dot_general(h1, w2_ref[...].astype(jnp.float32),
                             dimension_numbers=(((1,), (1,)), ((), ())),
                             preferred_element_type=jnp.float32) + b2_ref[...]
        h2_ref[...] = jnp.maximum(h2, 0.0).astype(h2_ref.dtype)


def mlp_head(yn2_flat, w1, b1, w2, b2, *, k_tile=4096):
    # TODO(synk): on v7x split this reduction across the two TensorCores.
    B, K = yn2_flat.shape
    hidden = w1.shape[0]
    tK = min(k_tile, K)
    assert K % tK == 0 and (tK % 128 == 0 or tK == K)
    return pl.pallas_call(
        _mlp_head_kernel,
        out_shape=jax.ShapeDtypeStruct((B, hidden), jnp.float32),
        grid=(K // tK,),
        in_specs=[
            pl.BlockSpec((B, tK), lambda k: (0, k)),
            pl.BlockSpec((hidden, tK), lambda k: (0, k)),
            pl.BlockSpec((1, hidden), lambda k: (0, 0)),
            pl.BlockSpec((hidden, hidden), lambda k: (0, 0)),
            pl.BlockSpec((1, hidden), lambda k: (0, 0)),
        ],
        out_specs=pl.BlockSpec((B, hidden), lambda k: (0, 0)),
        scratch_shapes=[pltpu.VMEM((B, hidden), jnp.float32)],
        compiler_params=pltpu.CompilerParams(dimension_semantics=("arbitrary",)),
    )(yn2_flat, w1, b1.reshape(1, hidden), w2, b2.reshape(1, hidden))


# --------------------------------------------------------------------------
# Kernel C: fc3 (N-tiled, lane-dense) + final residual
# --------------------------------------------------------------------------

def _fc3_residual_kernel(h2_ref, w3_ref, b3_ref, y_ref, o_ref):
    o = lax.dot_general(h2_ref[...].astype(jnp.float32),
                        w3_ref[...].astype(jnp.float32),
                        dimension_numbers=(((1,), (1,)), ((), ())),
                        preferred_element_type=jnp.float32)       # (B, tN)
    o_ref[...] = (o + b3_ref[...] + y_ref[...].astype(jnp.float32)).astype(o_ref.dtype)


def fc3_residual(h2, w3, b3, y2, *, n_tile=4096):
    B, hidden = h2.shape
    N = w3.shape[0]
    tN = min(n_tile, N)
    assert N % tN == 0 and (tN % 128 == 0 or tN == N)
    return pl.pallas_call(
        _fc3_residual_kernel,
        out_shape=jax.ShapeDtypeStruct((B, N), jnp.float32),
        grid=(N // tN,),
        in_specs=[
            pl.BlockSpec((B, hidden), lambda j: (0, 0)),
            pl.BlockSpec((tN, hidden), lambda j: (j, 0)),
            pl.BlockSpec((1, tN), lambda j: (0, j)),
            pl.BlockSpec((B, tN), lambda j: (0, j)),
        ],
        out_specs=pl.BlockSpec((B, tN), lambda j: (0, j)),
        compiler_params=pltpu.CompilerParams(dimension_semantics=("parallel",)),
    )(h2, w3, b3.reshape(1, N), y2)


# --------------------------------------------------------------------------
# parameters (PyTorch-equivalent shapes; MLP scaled to E*H*H -> 128 -> E*H*H)
# --------------------------------------------------------------------------

def init_params(key, E, H):
    mlp_in = E * H * H
    mlp_hidden = 128
    ks = jax.random.split(key, 10)

    def u(k, shape, fan_in):
        bound = 1.0 / jnp.sqrt(float(fan_in))
        return jax.random.uniform(k, shape, jnp.float32, -bound, bound)

    return dict(
        ln1_g=jnp.ones((H,), jnp.float32), ln1_b=jnp.zeros((H,), jnp.float32),
        ln2_g=jnp.ones((H,), jnp.float32), ln2_b=jnp.zeros((H,), jnp.float32),
        in_proj_w=u(ks[0], (3 * E, E), E), in_proj_b=u(ks[1], (3 * E,), E),
        out_proj_w=u(ks[2], (E, E), E), out_proj_b=u(ks[3], (E,), E),
        fc1_w=u(ks[4], (mlp_hidden, mlp_in), mlp_in), fc1_b=u(ks[5], (mlp_hidden,), mlp_in),
        fc2_w=u(ks[6], (mlp_hidden, mlp_hidden), mlp_hidden), fc2_b=u(ks[7], (mlp_hidden,), mlp_hidden),
        fc3_w=u(ks[8], (mlp_in, mlp_hidden), mlp_hidden), fc3_b=u(ks[9], (mlp_in,), mlp_hidden),
    )


def quantize_params(params, dtype=jnp.bfloat16):
    """Store the large streamed weights in bf16 (halves HBM weight traffic on the
    HBM-bound weight streams); every matmul still accumulates in f32 in-kernel."""
    q = dict(params)
    for name in ("in_proj_w", "out_proj_w", "fc1_w", "fc3_w"):
        q[name] = params[name].astype(dtype)
    return q


# --------------------------------------------------------------------------
# forward pass (only free contiguous reshapes between kernels; no XLA transposes)
# --------------------------------------------------------------------------

def transformer_forward(x, params, num_heads):
    B, E, H, _ = x.shape
    HH = H * H

    x3 = x.reshape(B, E, HH)                                   # contiguous view, free
    y, yn2 = attention_block(
        x3, params["ln1_g"], params["ln1_b"], params["ln2_g"], params["ln2_b"],
        params["in_proj_w"], params["in_proj_b"],
        params["out_proj_w"], params["out_proj_b"],
        num_heads=num_heads, group=H)
    y2 = y.reshape(B, E * HH)                                  # contiguous view, free
    yn2_flat = yn2.reshape(B, E * HH)
    h2 = mlp_head(yn2_flat, params["fc1_w"], params["fc1_b"],
                  params["fc2_w"], params["fc2_b"])
    out = fc3_residual(h2, params["fc3_w"], params["fc3_b"], y2)
    return out.reshape(B, E, H, H)


# --------------------------------------------------------------------------
# pure-JAX reference (PyTorch semantics; upcasts the bf16-stored weights to f32)
# --------------------------------------------------------------------------

def reference_forward(x, params, num_heads):
    B, E, H, _ = x.shape
    HH = H * H
    hd = E // num_heads
    f32 = lambda a: a.astype(jnp.float32)

    def ln(t, g, b):
        m = t.mean(-1, keepdims=True)
        v = ((t - m) ** 2).mean(-1, keepdims=True)
        return (t - m) / jnp.sqrt(v + 1e-5) * g + b

    x1 = ln(x, params["ln1_g"], params["ln1_b"]).reshape(B, E, HH).transpose(0, 2, 1)
    L, Nb, _ = x1.shape                       # L = B (sequence axis), Nb = HH ("batch")
    qkv = x1 @ f32(params["in_proj_w"]).T + params["in_proj_b"]
    q, k, v = jnp.split(qkv, 3, axis=-1)

    def th(t):
        return t.reshape(L, Nb * num_heads, hd).transpose(1, 0, 2)

    q, k, v = th(q), th(k), th(v)
    s = jnp.einsum("bld,bmd->blm", q, k) / jnp.sqrt(float(hd))
    p = jax.nn.softmax(s, axis=-1)
    o = jnp.einsum("blm,bmd->bld", p, v).transpose(1, 0, 2).reshape(L, Nb, E)
    o = o @ f32(params["out_proj_w"]).T + params["out_proj_b"]
    o = o.transpose(0, 2, 1).reshape(B, E, H, H)
    x = x + o
    x2 = ln(x, params["ln2_g"], params["ln2_b"]).reshape(B, -1)
    h1 = jnp.maximum(x2 @ f32(params["fc1_w"]).T + params["fc1_b"], 0.0)
    h2 = jnp.maximum(h1 @ f32(params["fc2_w"]).T + params["fc2_b"], 0.0)
    h3 = h2 @ f32(params["fc3_w"]).T + params["fc3_b"]
    return h3.reshape(B, E, H, H) + x


# --------------------------------------------------------------------------
# main
# --------------------------------------------------------------------------

if __name__ == "__main__":
    B, E, H, num_heads = 2, 32, 8, 4    # embedding_size=32, hidden_size(spatial)=8
    key = jax.random.PRNGKey(0)
    kx, kp = jax.random.split(key)
    x = jax.random.normal(kx, (B, E, H, H), jnp.float32)
    params = quantize_params(init_params(kp, E, H))

    fwd = jax.jit(functools.partial(transformer_forward, num_heads=num_heads))
    out = jax.block_until_ready(fwd(x, params))

    ref = reference_forward(x, params, num_heads)
    assert out.shape == (B, E, H, H)
    err = float(jnp.max(jnp.abs(out - ref)))
    assert jnp.allclose(out, ref, atol=2e-3, rtol=2e-3), err
    print("KERNEL_OK")
</pallas_src>

<mosaic_0001>
module attributes {stable_mosaic.version = 11 : i64} {
  func.func @_mlp_head_kernel(%arg0: i32, %arg1: memref<2x2048xf32, #tpu.memory_space<vmem>>, %arg2: memref<128x2048xbf16, #tpu.memory_space<vmem>>, %arg3: memref<1x128xf32, #tpu.memory_space<vmem>>, %arg4: memref<128x128xf32, #tpu.memory_space<vmem>>, %arg5: memref<1x128xf32, #tpu.memory_space<vmem>>, %arg6: memref<2x128xf32, #tpu.memory_space<vmem>>, %arg7: memref<2x128xf32, #tpu.memory_space<vmem>>) attributes {dimension_semantics = [#tpu.dimension_semantics<arbitrary>], iteration_bounds = array<i64: 1>, scalar_prefetch = 0 : i64, scratch_operands = 1 : i64, tpu.core_type = #tpu.core_type<tc>, window_params = [{transform_indices = @transform_0, window_bounds = array<i64: 2, 2048>}, {transform_indices = @transform_1, window_bounds = array<i64: 128, 2048>}, {pipeline_mode = #tpu.pipeline_mode<synchronous>, transform_indices = @transform_2, window_bounds = array<i64: 1, 128>}, {pipeline_mode = #tpu.pipeline_mode<synchronous>, transform_indices = @transform_3, window_bounds = array<i64: 128, 128>}, {pipeline_mode = #tpu.pipeline_mode<synchronous>, transform_indices = @transform_4, window_bounds = array<i64: 1, 128>}, {pipeline_mode = #tpu.pipeline_mode<synchronous>, transform_indices = @transform_5, window_bounds = array<i64: 2, 128>}]} {
    %c0_i32 = arith.constant 0 : i32
    %0 = arith.cmpi eq, %arg0, %c0_i32 : i32
    %1 = arith.extui %0 : i1 to i32
    %c0_i32_0 = arith.constant 0 : i32
    %2 = arith.cmpi ne, %1, %c0_i32_0 : i32
    scf.if %2 {
      %cst_10 = arith.constant 0.000000e+00 : f32
      %13 = vector.broadcast %cst_10 : f32 to vector<2x128xf32>
      %c0_11 = arith.constant 0 : index
      %c0_12 = arith.constant 0 : index
      %14 = vector.load %arg7[%c0_11, %c0_12] : memref<2x128xf32, #tpu.memory_space<vmem>>, vector<2x128xf32>
      tpu.vector_store %arg7[%c0_11, %c0_12], %13 {strides = array<i32>} : memref<2x128xf32, #tpu.memory_space<vmem>>, vector<2x128xf32>,
    } else {
    }
    %c0 = arith.constant 0 : index
    %c0_1 = arith.constant 0 : index
    %3 = vector.load %arg7[%c0, %c0_1] : memref<2x128xf32, #tpu.memory_space<vmem>>, vector<2x128xf32>
    %c0_2 = arith.constant 0 : index
    %c0_3 = arith.constant 0 : index
    %4 = vector.load %arg1[%c0_2, %c0_3] : memref<2x2048xf32, #tpu.memory_space<vmem>>, vector<2x2048xf32>
    %c0_4 = arith.constant 0 : index
    %c0_5 = arith.constant 0 : index
    %5 = vector.load %arg2[%c0_4, %c0_5] : memref<128x2048xbf16, #tpu.memory_space<vmem>>, vector<128x2048xbf16>
    %6 = arith.extf %5 : vector<128x2048xbf16> to vector<128x2048xf32>
    %cst = arith.constant dense<0.000000e+00> : vector<2x128xf32>
    %7 = tpu.matmul %4, %6, %cst {dimension_numbers = #tpu.dot_dimension_numbers<[1], [1], [0], [0], [0, 0, 1, 0], [], []>} : vector<2x2048xf32>, vector<128x2048xf32>, vector<2x128xf32> -> vector<2x128xf32>
    %8 = arith.addf %3, %7 : vector<2x128xf32>
    %c0_6 = arith.constant 0 : index
    %c0_7 = arith.constant 0 : index
    %9 = vector.load %arg7[%c0_6, %c0_7] : memref<2x128xf32, #tpu.memory_space<vmem>>, vector<2x128xf32>
    tpu.vector_store %arg7[%c0_6, %c0_7], %8 {strides = array<i32>} : memref<2x128xf32, #tpu.memory_space<vmem>>, vector<2x128xf32>,
    %c0_i32_8 = arith.constant 0 : i32
    %10 = arith.cmpi eq, %arg0, %c0_i32_8 : i32
    %11 = arith.extui %10 : i1 to i32
    %c0_i32_9 = arith.constant 0 : i32
    %12 = arith.cmpi ne, %11, %c0_i32_9 : i32
    scf.if %12 {
      %c0_10 = arith.constant 0 : index
      %c0_11 = arith.constant 0 : index
      %13 = vector.load %arg7[%c0_10, %c0_11] : memref<2x128xf32, #tpu.memory_space<vmem>>, vector<2x128xf32>
      %c0_12 = arith.constant 0 : index
      %c0_13 = arith.constant 0 : index
      %14 = vector.load %arg3[%c0_12, %c0_13] : memref<1x128xf32, #tpu.memory_space<vmem>>, vector<1x128xf32>
      %15 = vector.broadcast %14 : vector<1x128xf32> to vector<2x128xf32>
      %16 = arith.addf %13, %15 : vector<2x128xf32>
      %cst_14 = arith.constant 0.000000e+00 : f32
      %17 = vector.broadcast %cst_14 : f32 to vector<2x128xf32>
      %18 = arith.maximumf %16, %17 : vector<2x128xf32>
      %c0_15 = arith.constant 0 : index
      %c0_16 = arith.constant 0 : index
      %19 = vector.load %arg4[%c0_15, %c0_16] : memref<128x128xf32, #tpu.memory_space<vmem>>, vector<128x128xf32>
      %cst_17 = arith.constant dense<0.000000e+00> : vector<2x128xf32>
      %20 = tpu.matmul %18, %19, %cst_17 {dimension_numbers = #tpu.dot_dimension_numbers<[1], [1], [0], [0], [0, 0, 1, 0], [], []>} : vector<2x128xf32>, vector<128x128xf32>, vector<2x128xf32> -> vector<2x128xf32>
      %c0_18 = arith.constant 0 : index
      %c0_19 = arith.constant 0 : index
      %21 = vector.load %arg5[%c0_18, %c0_19] : memref<1x128xf32, #tpu.memory_space<vmem>>, vector<1x128xf32>
      %22 = vector.broadcast %21 : vector<1x128xf32> to vector<2x128xf32>
      %23 = arith.addf %20, %22 : vector<2x128xf32>
      %cst_20 = arith.constant 0.000000e+00 : f32
      %24 = vector.broadcast %cst_20 : f32 to vector<2x128xf32>
      %25 = arith.maximumf %23, %24 : vector<2x128xf32>
      %c0_21 = arith.constant 0 : index
      %c0_22 = arith.constant 0 : index
      %26 = vector.load %arg6[%c0_21, %c0_22] : memref<2x128xf32, #tpu.memory_space<vmem>>, vector<2x128xf32>
      tpu.vector_store %arg6[%c0_21, %c0_22], %25 {strides = array<i32>} : memref<2x128xf32, #tpu.memory_space<vmem>>, vector<2x128xf32>,
    } else {
    }
    return
  }
  func.func @transform_0(%arg0: i32) -> (i32, i32) {
    %c0_i32 = arith.constant 0 : i32
    %c0_i32_0 = arith.constant 0 : i32
    return %c0_i32, %arg0 : i32, i32
  }
  func.func @transform_1(%arg0: i32) -> (i32, i32) {
    %c0_i32 = arith.constant 0 : i32
    %c0_i32_0 = arith.constant 0 : i32
    return %c0_i32, %arg0 : i32, i32
  }
  func.func @transform_2(%arg0: i32) -> (i32, i32) {
    %c0_i32 = arith.constant 0 : i32
    %c0_i32_0 = arith.constant 0 : i32
    %c0_i32_1 = arith.constant 0 : i32
    return %c0_i32, %c0_i32_0 : i32, i32
  }
  func.func @transform_3(%arg0: i32) -> (i32, i32) {
    %c0_i32 = arith.constant 0 : i32
    %c0_i32_0 = arith.constant 0 : i32
    %c0_i32_1 = arith.constant 0 : i32
    return %c0_i32, %c0_i32_0 : i32, i32
  }
  func.func @transform_4(%arg0: i32) -> (i32, i32) {
    %c0_i32 = arith.constant 0 : i32
    %c0_i32_0 = arith.constant 0 : i32
    %c0_i32_1 = arith.constant 0 : i32
    return %c0_i32, %c0_i32_0 : i32, i32
  }
  func.func @transform_5(%arg0: i32) -> (i32, i32) {
    %c0_i32 = arith.constant 0 : i32
    %c0_i32_0 = arith.constant 0 : i32
    %c0_i32_1 = arith.constant 0 : i32
    return %c0_i32, %c0_i32_0 : i32, i32
  }
}

module attributes {stable_mosaic.version = 11 : i64} {
  func.func @_fc3_residual_kernel(%arg0: i32, %arg1: memref<2x128xf32, #tpu.memory_space<vmem>>, %arg2: memref<2048x128xbf16, #tpu.memory_space<vmem>>, %arg3: memref<1x2048xf32, #tpu.memory_space<vmem>>, %arg4: memref<2x2048xf32, #tpu.memory_space<vmem>>, %arg5: memref<2x2048xf32, #tpu.memory_space<vmem>>) attributes {dimension_semantics = [#tpu.dimension_semantics<parallel>], iteration_bounds = array<i64: 1>, scalar_prefetch = 0 : i64, scratch_operands = 0 : i64, tpu.core_type = #tpu.core_type<tc>, window_params = [{pipeline_mode = #tpu.pipeline_mode<synchronous>, transform_indices = @transform_0, window_bounds = array<i64: 2, 128>}, {transform_indices = @transform_1, window_bounds = array<i64: 2048, 128>}, {transform_indices = @transform_2, window_bounds = array<i64: 1, 2048>}, {transform_indices = @transform_3, window_bounds = array<i64: 2, 2048>}, {transform_indices = @transform_4, window_bounds = array<i64: 2, 2048>}]} {
    %c0 = arith.constant 0 : index
    %c0_0 = arith.constant 0 : index
    %0 = vector.load %arg1[%c0, %c0_0] : memref<2x128xf32, #tpu.memory_space<vmem>>, vector<2x128xf32>
    %c0_1 = arith.constant 0 : index
    %c0_2 = arith.constant 0 : index
    %1 = vector.load %arg2[%c0_1, %c0_2] : memref<2048x128xbf16, #tpu.memory_space<vmem>>, vector<2048x128xbf16>
    %2 = arith.extf %1 : vector<2048x128xbf16> to vector<2048x128xf32>
    %cst = arith.constant dense<0.000000e+00> : vector<2x2048xf32>
    %3 = tpu.matmul %0, %2, %cst {dimension_numbers = #tpu.dot_dimension_numbers<[1], [1], [0], [0], [0, 0, 1, 0], [], []>} : vector<2x128xf32>, vector<2048x128xf32>, vector<2x2048xf32> -> vector<2x2048xf32>
    %c0_3 = arith.constant 0 : index
    %c0_4 = arith.constant 0 : index
    %4 = vector.load %arg3[%c0_3, %c0_4] : memref<1x2048xf32, #tpu.memory_space<vmem>>, vector<1x2048xf32>
    %5 = vector.broadcast %4 : vector<1x2048xf32> to vector<2x2048xf32>
    %6 = arith.addf %3, %5 : vector<2x2048xf32>
    %c0_5 = arith.constant 0 : index
    %c0_6 = arith.constant 0 : index
    %7 = vector.load %arg4[%c0_5, %c0_6] : memref<2x2048xf32, #tpu.memory_space<vmem>>, vector<2x2048xf32>
    %8 = arith.addf %6, %7 : vector<2x2048xf32>
    %c0_7 = arith.constant 0 : index
    %c0_8 = arith.constant 0 : index
    %9 = vector.load %arg5[%c0_7, %c0_8] : memref<2x2048xf32, #tpu.memory_space<vmem>>, vector<2x2048xf32>
    tpu.vector_store %arg5[%c0_7, %c0_8], %8 {strides = array<i32>} : memref<2x2048xf32, #tpu.memory_space<vmem>>, vector<2x2048xf32>,
    return
  }
  func.func @transform_0(%arg0: i32) -> (i32, i32) {
    %c0_i32 = arith.constant 0 : i32
    %c0_i32_0 = arith.constant 0 : i32
    %c0_i32_1 = arith.constant 0 : i32
    return %c0_i32, %c0_i32_0 : i32, i32
  }
  func.func @transform_1(%arg0: i32) -> (i32, i32) {
    %c0_i32 = arith.constant 0 : i32
    %c0_i32_0 = arith.constant 0 : i32
    return %arg0, %c0_i32 : i32, i32
  }
  func.func @transform_2(%arg0: i32) -> (i32, i32) {
    %c0_i32 = arith.constant 0 : i32
    %c0_i32_0 = arith.constant 0 : i32
    return %c0_i32, %arg0 : i32, i32
  }
  func.func @transform_3(%arg0: i32) -> (i32, i32) {
    %c0_i32 = arith.constant 0 : i32
    %c0_i32_0 = arith.constant 0 : i32
    return %c0_i32, %arg0 : i32, i32
  }
  func.func @transform_4(%arg0: i32) -> (i32, i32) {
    %c0_i32 = arith.constant 0 : i32
    %c0_i32_0 = arith.constant 0 : i32
    return %c0_i32, %arg0 : i32, i32
  }
}

module attributes {stable_mosaic.version = 11 : i64} {
  func.func @_attn_block_kernel(%arg0: i32, %arg1: memref<2x32x64xf32, #tpu.memory_space<vmem>>, %arg2: memref<2x32x64xf32, #tpu.memory_space<vmem>>, %arg3: memref<1x128xf32, #tpu.memory_space<vmem>>, %arg4: memref<1x128xf32, #tpu.memory_space<vmem>>, %arg5: memref<1x128xf32, #tpu.memory_space<vmem>>, %arg6: memref<1x128xf32, #tpu.memory_space<vmem>>, %arg7: memref<128x16xf32, #tpu.memory_space<vmem>>, %arg8: memref<96x32xbf16, #tpu.memory_space<vmem>>, %arg9: memref<96x1xf32, #tpu.memory_space<vmem>>, %arg10: memref<32x32xbf16, #tpu.memory_space<vmem>>, %arg11: memref<32x1xf32, #tpu.memory_space<vmem>>, %arg12: memref<32x4xf32, #tpu.memory_space<vmem>>, %arg13: memref<2x32x64xf32, #tpu.memory_space<vmem>>, %arg14: memref<2x32x64xf32, #tpu.memory_space<vmem>>, %arg15: memref<96x128xf32, #tpu.memory_space<vmem>>) attributes {dimension_semantics = [#tpu.dimension_semantics<arbitrary>], iteration_bounds = array<i64: 1>, scalar_prefetch = 0 : i64, scratch_operands = 1 : i64, tpu.core_type = #tpu.core_type<tc>, window_params = [{transform_indices = @transform_0, window_bounds = array<i64: 2, 32, 64>}, {pipeline_mode = #tpu.pipeline_mode<synchronous>, transform_indices = @transform_1, window_bounds = array<i64: 2, 32, 64>}, {pipeline_mode = #tpu.pipeline_mode<synchronous>, transform_indices = @transform_2, window_bounds = array<i64: 1, 128>}, {pipeline_mode = #tpu.pipeline_mode<synchronous>, transform_indices = @transform_3, window_bounds = array<i64: 1, 128>}, {pipeline_mode = #tpu.pipeline_mode<synchronous>, transform_indices = @transform_4, window_bounds = array<i64: 1, 128>}, {pipeline_mode = #tpu.pipeline_mode<synchronous>, transform_indices = @transform_5, window_bounds = array<i64: 1, 128>}, {pipeline_mode = #tpu.pipeline_mode<synchronous>, transform_indices = @transform_6, window_bounds = array<i64: 128, 16>}, {transform_indices = @transform_7, window_bounds = array<i64: 96, 32>}, {pipeline_mode = #tpu.pipeline_mode<synchronous>, transform_indices = @transform_8, window_bounds = array<i64: 96, 1>}, {pipeline_mode = #tpu.pipeline_mode<synchronous>, transform_indices = @transform_9, window_bounds = array<i64: 32, 32>}, {pipeline_mode = #tpu.pipeline_mode<synchronous>, transform_indices = @transform_10, window_bounds = array<i64: 32, 1>}, {pipeline_mode = #tpu.pipeline_mode<synchronous>, transform_indices = @transform_11, window_bounds = array<i64: 32, 4>}, {pipeline_mode = #tpu.pipeline_mode<synchronous>, transform_indices = @transform_12, window_bounds = array<i64: 2, 32, 64>}, {pipeline_mode = #tpu.pipeline_mode<synchronous>, transform_indices = @transform_13, window_bounds = array<i64: 2, 32, 64>}]} {
    %c0_i32 = arith.constant 0 : i32
    %0 = arith.cmpi eq, %arg0, %c0_i32 : i32
    %1 = arith.extui %0 : i1 to i32
    %c0_i32_0 = arith.constant 0 : i32
    %2 = arith.cmpi ne, %1, %c0_i32_0 : i32
    scf.if %2 {
      %cst_26 = arith.constant 0.000000e+00 : f32
      %38 = vector.broadcast %cst_26 : f32 to vector<96x128xf32>
      %c0_27 = arith.constant 0 : index
      %c0_28 = arith.constant 0 : index
      %39 = vector.load %arg15[%c0_27, %c0_28] : memref<96x128xf32, #tpu.memory_space<vmem>>, vector<96x128xf32>
      tpu.vector_store %arg15[%c0_27, %c0_28], %38 {strides = array<i32>} : memref<96x128xf32, #tpu.memory_space<vmem>>, vector<96x128xf32>,
    } else {
    }
    %c0 = arith.constant 0 : index
    %c0_1 = arith.constant 0 : index
    %c0_2 = arith.constant 0 : index
    %3 = vector.load %arg1[%c0, %c0_1, %c0_2] : memref<2x32x64xf32, #tpu.memory_space<vmem>>, vector<1x32x64xf32>
    %4 = vector.shape_cast %3 : vector<1x32x64xf32> to vector<32x64xf32>
    %c1 = arith.constant 1 : index
    %c0_3 = arith.constant 0 : index
    %c0_4 = arith.constant 0 : index
    %5 = vector.load %arg1[%c1, %c0_3, %c0_4] : memref<2x32x64xf32, #tpu.memory_space<vmem>>, vector<1x32x64xf32>
    %6 = vector.shape_cast %5 : vector<1x32x64xf32> to vector<32x64xf32>
    %7 = tpu.concatenate %4, %6 in 1 : vector<32x64xf32>, vector<32x64xf32> -> vector<32x128xf32>
    %c0_5 = arith.constant 0 : index
    %c0_6 = arith.constant 0 : index
    %8 = vector.load %arg7[%c0_5, %c0_6] : memref<128x16xf32, #tpu.memory_space<vmem>>, vector<128x16xf32>
    %c0_7 = arith.constant 0 : index
    %c0_8 = arith.constant 0 : index
    %9 = vector.load %arg3[%c0_7, %c0_8] : memref<1x128xf32, #tpu.memory_space<vmem>>, vector<1x128xf32>
    %c0_9 = arith.constant 0 : index
    %c0_10 = arith.constant 0 : index
    %10 = vector.load %arg4[%c0_9, %c0_10] : memref<1x128xf32, #tpu.memory_space<vmem>>, vector<1x128xf32>
    %cst = arith.constant dense<0.000000e+00> : vector<32x16xf32>
    %11 = tpu.matmul %7, %8, %cst {dimension_numbers = #tpu.dot_dimension_numbers<[1], [0], [0], [1], [0, 0, 1, 1], [], []>} : vector<32x128xf32>, vector<128x16xf32>, vector<32x16xf32> -> vector<32x16xf32>
    %cst_11 = arith.constant dense<0.000000e+00> : vector<32x128xf32>
    %12 = tpu.matmul %11, %8, %cst_11 {dimension_numbers = #tpu.dot_dimension_numbers<[1], [1], [0], [0], [0, 0, 1, 0], [], []>} : vector<32x16xf32>, vector<128x16xf32>, vector<32x128xf32> -> vector<32x128xf32>
    %cst_12 = arith.constant 1.250000e-01 : f32
    %13 = vector.broadcast %cst_12 : f32 to vector<32x128xf32>
    %14 = arith.mulf %12, %13 : vector<32x128xf32>
    %15 = arith.subf %7, %14 : vector<32x128xf32>
    %16 = arith.mulf %15, %15 : vector<32x128xf32>
    %cst_13 = arith.constant dense<0.000000e+00> : vector<32x16xf32>
    %17 = tpu.matmul %16, %8, %cst_13 {dimension_numbers = #tpu.dot_dimension_numbers<[1], [0], [0], [1], [0, 0, 1, 1], [], []>} : vector<32x128xf32>, vector<128x16xf32>, vector<32x16xf32> -> vector<32x16xf32>
    %cst_14 = arith.constant dense<0.000000e+00> : vector<32x128xf32>
    %18 = tpu.matmul %17, %8, %cst_14 {dimension_numbers = #tpu.dot_dimension_numbers<[1], [1], [0], [0], [0, 0, 1, 0], [], []>} : vector<32x16xf32>, vector<128x16xf32>, vector<32x128xf32> -> vector<32x128xf32>
    %cst_15 = arith.constant 1.250000e-01 : f32
    %19 = vector.broadcast %cst_15 : f32 to vector<32x128xf32>
    %20 = arith.mulf %18, %19 : vector<32x128xf32>
    %cst_16 = arith.constant 9.99999974E-6 : f32
    %21 = vector.broadcast %cst_16 : f32 to vector<32x128xf32>
    %22 = arith.addf %20, %21 : vector<32x128xf32>
    %23 = math.rsqrt %22 : vector<32x128xf32>
    %24 = arith.mulf %15, %23 : vector<32x128xf32>
    %25 = vector.broadcast %9 : vector<1x128xf32> to vector<32x128xf32>
    %26 = arith.mulf %24, %25 : vector<32x128xf32>
    %27 = vector.broadcast %10 : vector<1x128xf32> to vector<32x128xf32>
    %28 = arith.addf %26, %27 : vector<32x128xf32>
    %c0_17 = arith.constant 0 : index
    %c0_18 = arith.constant 0 : index
    %29 = vector.load %arg15[%c0_17, %c0_18] : memref<96x128xf32, #tpu.memory_space<vmem>>, vector<96x128xf32>
    %c0_19 = arith.constant 0 : index
    %c0_20 = arith.constant 0 : index
    %30 = vector.load %arg8[%c0_19, %c0_20] : memref<96x32xbf16, #tpu.memory_space<vmem>>, vector<96x32xbf16>
    %31 = arith.extf %30 : vector<96x32xbf16> to vector<96x32xf32>
    %cst_21 = arith.constant dense<0.000000e+00> : vector<96x128xf32>
    %32 = tpu.matmul %31, %28, %cst_21 {dimension_numbers = #tpu.dot_dimension_numbers<[1], [0], [0], [1], [0, 0, 1, 1], [], []>} : vector<96x32xf32>, vector<32x128xf32>, vector<96x128xf32> -> vector<96x128xf32>
    %33 = arith.addf %29, %32 : vector<96x128xf32>
    %c0_22 = arith.constant 0 : index
    %c0_23 = arith.constant 0 : index
    %34 = vector.load %arg15[%c0_22, %c0_23] : memref<96x128xf32, #tpu.memory_space<vmem>>, vector<96x128xf32>
    tpu.vector_store %arg15[%c0_22, %c0_23], %33 {strides = array<i32>} : memref<96x128xf32, #tpu.memory_space<vmem>>, vector<96x128xf32>,
    %c0_i32_24 = arith.constant 0 : i32
    %35 = arith.cmpi eq, %arg0, %c0_i32_24 : i32
    %36 = arith.extui %35 : i1 to i32
    %c0_i32_25 = arith.constant 0 : i32
    %37 = arith.cmpi ne, %36, %c0_i32_25 : i32
    scf.if %37 {
      %c0_26 = arith.constant 0 : index
      %c0_27 = arith.constant 0 : index
      %38 = vector.load %arg15[%c0_26, %c0_27] : memref<96x128xf32, #tpu.memory_space<vmem>>, vector<96x128xf32>
      %c0_28 = arith.constant 0 : index
      %c0_29 = arith.constant 0 : index
      %39 = vector.load %arg9[%c0_28, %c0_29] : memref<96x1xf32, #tpu.memory_space<vmem>>, vector<96x1xf32>
      %40 = vector.broadcast %39 : vector<96x1xf32> to vector<96x128xf32>
      %41 = arith.addf %38, %40 : vector<96x128xf32>
      %c0_30 = arith.constant 0 : index
      %c0_31 = arith.constant 0 : index
      %42 = vector.load %arg12[%c0_30, %c0_31] : memref<32x4xf32, #tpu.memory_space<vmem>>, vector<32x4xf32>
      %43 = vector.extract_strided_slice %41 {offsets = [0, 0], sizes = [32, 128], strides = [1, 1]} : vector<96x128xf32> to vector<32x128xf32>
      %44 = tpu.transpose %43, [1, 0] : vector<32x128xf32> -> vector<128x32xf32>
      %cst_32 = arith.constant 0.353553385 : f32
      %45 = vector.broadcast %cst_32 : f32 to vector<128x32xf32>
      %46 = arith.mulf %44, %45 : vector<128x32xf32>
      %47 = vector.extract_strided_slice %41 {offsets = [32, 0], sizes = [32, 128], strides = [1, 1]} : vector<96x128xf32> to vector<32x128xf32>
      %48 = tpu.transpose %47, [1, 0] : vector<32x128xf32> -> vector<128x32xf32>
      %49 = vector.extract_strided_slice %41 {offsets = [64, 0], sizes = [32, 128], strides = [1, 1]} : vector<96x128xf32> to vector<32x128xf32>
      %50 = tpu.transpose %49, [1, 0] : vector<32x128xf32> -> vector<128x32xf32>
      %51 = vector.extract_strided_slice %46 {offsets = [0, 0], sizes = [64, 32], strides = [1, 1]} : vector<128x32xf32> to vector<64x32xf32>
      %52 = vector.extract_strided_slice %48 {offsets = [0, 0], sizes = [64, 32], strides = [1, 1]} : vector<128x32xf32> to vector<64x32xf32>
      %53 = arith.mulf %51, %52 : vector<64x32xf32>
      %54 = vector.extract_strided_slice %46 {offsets = [0, 0], sizes = [64, 32], strides = [1, 1]} : vector<128x32xf32> to vector<64x32xf32>
      %55 = vector.extract_strided_slice %48 {offsets = [64, 0], sizes = [64, 32], strides = [1, 1]} : vector<128x32xf32> to vector<64x32xf32>
      %56 = arith.mulf %54, %55 : vector<64x32xf32>
      %57 = vector.extract_strided_slice %46 {offsets = [64, 0], sizes = [64, 32], strides = [1, 1]} : vector<128x32xf32> to vector<64x32xf32>
      %58 = vector.extract_strided_slice %48 {offsets = [0, 0], sizes = [64, 32], strides = [1, 1]} : vector<128x32xf32> to vector<64x32xf32>
      %59 = arith.mulf %57, %58 : vector<64x32xf32>
      %60 = vector.extract_strided_slice %46 {offsets = [64, 0], sizes = [64, 32], strides = [1, 1]} : vector<128x32xf32> to vector<64x32xf32>
      %61 = vector.extract_strided_slice %48 {offsets = [64, 0], sizes = [64, 32], strides = [1, 1]} : vector<128x32xf32> to vector<64x32xf32>
      %62 = arith.mulf %60, %61 : vector<64x32xf32>
      %63 = tpu.concatenate %53, %56, %59, %62 in 0 : vector<64x32xf32>, vector<64x32xf32>, vector<64x32xf32>, vector<64x32xf32> -> vector<256x32xf32>
      %cst_33 = arith.constant dense<0.000000e+00> : vector<256x4xf32>
      %64 = tpu.matmul %63, %42, %cst_33 {dimension_numbers = #tpu.dot_dimension_numbers<[1], [0], [0], [1], [0, 0, 1, 1], [], []>} : vector<256x32xf32>, vector<32x4xf32>, vector<256x4xf32> -> vector<256x4xf32>
      %65 = vector.extract_strided_slice %64 {offsets = [0, 0], sizes = [64, 4], strides = [1, 1]} : vector<256x4xf32> to vector<64x4xf32>
      %66 = vector.extract_strided_slice %64 {offsets = [64, 0], sizes = [64, 4], strides = [1, 1]} : vector<256x4xf32> to vector<64x4xf32>
      %67 = arith.maximumf %65, %66 : vector<64x4xf32>
      %68 = vector.extract_strided_slice %64 {offsets = [0, 0], sizes = [64, 4], strides = [1, 1]} : vector<256x4xf32> to vector<64x4xf32>
      %69 = arith.subf %68, %67 : vector<64x4xf32>
      %70 = math.exp %69 : vector<64x4xf32>
      %71 = vector.extract_strided_slice %64 {offsets = [64, 0], sizes = [64, 4], strides = [1, 1]} : vector<256x4xf32> to vector<64x4xf32>
      %72 = arith.subf %71, %67 : vector<64x4xf32>
      %73 = math.exp %72 : vector<64x4xf32>
      %74 = arith.addf %70, %73 : vector<64x4xf32>
      %75 = tpu.reciprocal %74 : vector<64x4xf32> -> vector<64x4xf32>
      %76 = arith.mulf %70, %75 : vector<64x4xf32>
      %77 = arith.mulf %73, %75 : vector<64x4xf32>
      %78 = vector.extract_strided_slice %64 {offsets = [128, 0], sizes = [64, 4], strides = [1, 1]} : vector<256x4xf32> to vector<64x4xf32>
      %79 = vector.extract_strided_slice %64 {offsets = [192, 0], sizes = [64, 4], strides = [1, 1]} : vector<256x4xf32> to vector<64x4xf32>
      %80 = arith.maximumf %78, %79 : vector<64x4xf32>
      %81 = vector.extract_strided_slice %64 {offsets = [128, 0], sizes = [64, 4], strides = [1, 1]} : vector<256x4xf32> to vector<64x4xf32>
      %82 = arith.subf %81, %80 : vector<64x4xf32>
      %83 = math.exp %82 : vector<64x4xf32>
      %84 = vector.extract_strided_slice %64 {offsets = [192, 0], sizes = [64, 4], strides = [1, 1]} : vector<256x4xf32> to vector<64x4xf32>
      %85 = arith.subf %84, %80 : vector<64x4xf32>
      %86 = math.exp %85 : vector<64x4xf32>
      %87 = arith.addf %83, %86 : vector<64x4xf32>
      %88 = tpu.reciprocal %87 : vector<64x4xf32> -> vector<64x4xf32>
      %89 = arith.mulf %83, %88 : vector<64x4xf32>
      %90 = arith.mulf %86, %88 : vector<64x4xf32>
      %91 = tpu.concatenate %76, %77, %89, %90 in 0 : vector<64x4xf32>, vector<64x4xf32>, vector<64x4xf32>, vector<64x4xf32> -> vector<256x4xf32>
      %cst_34 = arith.constant dense<0.000000e+00> : vector<256x32xf32>
      %92 = tpu.matmul %91, %42, %cst_34 {dimension_numbers = #tpu.dot_dimension_numbers<[1], [1], [0], [0], [0, 0, 1, 0], [], []>} : vector<256x4xf32>, vector<32x4xf32>, vector<256x32xf32> -> vector<256x32xf32>
      %93 = vector.extract_strided_slice %92 {offsets = [0, 0], sizes = [64, 32], strides = [1, 1]} : vector<256x32xf32> to vector<64x32xf32>
      %94 = vector.extract_strided_slice %50 {offsets = [0, 0], sizes = [64, 32], strides = [1, 1]} : vector<128x32xf32> to vector<64x32xf32>
      %95 = arith.mulf %93, %94 : vector<64x32xf32>
      %96 = vector.extract_strided_slice %92 {offsets = [64, 0], sizes = [64, 32], strides = [1, 1]} : vector<256x32xf32> to vector<64x32xf32>
      %97 = vector.extract_strided_slice %50 {offsets = [64, 0], sizes = [64, 32], strides = [1, 1]} : vector<128x32xf32> to vector<64x32xf32>
      %98 = arith.mulf %96, %97 : vector<64x32xf32>
      %99 = arith.addf %95, %98 : vector<64x32xf32>
      %100 = vector.extract_strided_slice %92 {offsets = [128, 0], sizes = [64, 32], strides = [1, 1]} : vector<256x32xf32> to vector<64x32xf32>
      %101 = vector.extract_strided_slice %50 {offsets = [0, 0], sizes = [64, 32], strides = [1, 1]} : vector<128x32xf32> to vector<64x32xf32>
      %102 = arith.mulf %100, %101 : vector<64x32xf32>
      %103 = vector.extract_strided_slice %92 {offsets = [192, 0], sizes = [64, 32], strides = [1, 1]} : vector<256x32xf32> to vector<64x32xf32>
      %104 = vector.extract_strided_slice %50 {offsets = [64, 0], sizes = [64, 32], strides = [1, 1]} : vector<128x32xf32> to vector<64x32xf32>
      %105 = arith.mulf %103, %104 : vector<64x32xf32>
      %106 = arith.addf %102, %105 : vector<64x32xf32>
      %107 = tpu.concatenate %99, %106 in 0 : vector<64x32xf32>, vector<64x32xf32> -> vector<128x32xf32>
      %c0_35 = arith.constant 0 : index
      %c0_36 = arith.constant 0 : index
      %108 = vector.load %arg10[%c0_35, %c0_36] : memref<32x32xbf16, #tpu.memory_space<vmem>>, vector<32x32xbf16>
      %109 = arith.extf %108 : vector<32x32xbf16> to vector<32x32xf32>
      %cst_37 = arith.constant dense<0.000000e+00> : vector<32x128xf32>
      %110 = tpu.matmul %109, %107, %cst_37 {dimension_numbers = #tpu.dot_dimension_numbers<[1], [1], [0], [0], [0, 0, 1, 0], [], []>} : vector<32x32xf32>, vector<128x32xf32>, vector<32x128xf32> -> vector<32x128xf32>
      %c0_38 = arith.constant 0 : index
      %c0_39 = arith.constant 0 : index
      %c0_40 = arith.constant 0 : index
      %111 = vector.load %arg2[%c0_38, %c0_39, %c0_40] : memref<2x32x64xf32, #tpu.memory_space<vmem>>, vector<1x32x64xf32>
      %112 = vector.shape_cast %111 : vector<1x32x64xf32> to vector<32x64xf32>
      %c1_41 = arith.constant 1 : index
      %c0_42 = arith.constant 0 : index
      %c0_43 = arith.constant 0 : index
      %113 = vector.load %arg2[%c1_41, %c0_42, %c0_43] : memref<2x32x64xf32, #tpu.memory_space<vmem>>, vector<1x32x64xf32>
      %114 = vector.shape_cast %113 : vector<1x32x64xf32> to vector<32x64xf32>
      %115 = tpu.concatenate %112, %114 in 1 : vector<32x64xf32>, vector<32x64xf32> -> vector<32x128xf32>
      %c0_44 = arith.constant 0 : index
      %c0_45 = arith.constant 0 : index
      %116 = vector.load %arg11[%c0_44, %c0_45] : memref<32x1xf32, #tpu.memory_space<vmem>>, vector<32x1xf32>
      %117 = vector.broadcast %116 : vector<32x1xf32> to vector<32x128xf32>
      %118 = arith.addf %110, %117 : vector<32x128xf32>
      %119 = arith.addf %118, %115 : vector<32x128xf32>
      %c0_46 = arith.constant 0 : index
      %c0_47 = arith.constant 0 : index
      %120 = vector.load %arg7[%c0_46, %c0_47] : memref<128x16xf32, #tpu.memory_space<vmem>>, vector<128x16xf32>
      %c0_48 = arith.constant 0 : index
      %c0_49 = arith.constant 0 : index
      %121 = vector.load %arg5[%c0_48, %c0_49] : memref<1x128xf32, #tpu.memory_space<vmem>>, vector<1x128xf32>
      %c0_50 = arith.constant 0 : index
      %c0_51 = arith.constant 0 : index
      %122 = vector.load %arg6[%c0_50, %c0_51] : memref<1x128xf32, #tpu.memory_space<vmem>>, vector<1x128xf32>
      %cst_52 = arith.constant dense<0.000000e+00> : vector<32x16xf32>
      %123 = tpu.matmul %119, %120, %cst_52 {dimension_numbers = #tpu.dot_dimension_numbers<[1], [0], [0], [1], [0, 0, 1, 1], [], []>} : vector<32x128xf32>, vector<128x16xf32>, vector<32x16xf32> -> vector<32x16xf32>
      %cst_53 = arith.constant dense<0.000000e+00> : vector<32x128xf32>
      %124 = tpu.matmul %123, %120, %cst_53 {dimension_numbers = #tpu.dot_dimension_numbers<[1], [1], [0], [0], [0, 0, 1, 0], [], []>} : vector<32x16xf32>, vector<128x16xf32>, vector<32x128xf32> -> vector<32x128xf32>
      %cst_54 = arith.constant 1.250000e-01 : f32
      %125 = vector.broadcast %cst_54 : f32 to vector<32x128xf32>
      %126 = arith.mulf %124, %125 : vector<32x128xf32>
      %127 = arith.subf %119, %126 : vector<32x128xf32>
      %128 = arith.mulf %127, %127 : vector<32x128xf32>
      %cst_55 = arith.constant dense<0.000000e+00> : vector<32x16xf32>
      %129 = tpu.matmul %128, %120, %cst_55 {dimension_numbers = #tpu.dot_dimension_numbers<[1], [0], [0], [1], [0, 0, 1, 1], [], []>} : vector<32x128xf32>, vector<128x16xf32>, vector<32x16xf32> -> vector<32x16xf32>
      %cst_56 = arith.constant dense<0.000000e+00> : vector<32x128xf32>
      %130 = tpu.matmul %129, %120, %cst_56 {dimension_numbers = #tpu.dot_dimension_numbers<[1], [1], [0], [0], [0, 0, 1, 0], [], []>} : vector<32x16xf32>, vector<128x16xf32>, vector<32x128xf32> -> vector<32x128xf32>
      %cst_57 = arith.constant 1.250000e-01 : f32
      %131 = vector.broadcast %cst_57 : f32 to vector<32x128xf32>
      %132 = arith.mulf %130, %131 : vector<32x128xf32>
      %cst_58 = arith.constant 9.99999974E-6 : f32
      %133 = vector.broadcast %cst_58 : f32 to vector<32x128xf32>
      %134 = arith.addf %132, %133 : vector<32x128xf32>
      %135 = math.rsqrt %134 : vector<32x128xf32>
      %136 = arith.mulf %127, %135 : vector<32x128xf32>
      %137 = vector.broadcast %121 : vector<1x128xf32> to vector<32x128xf32>
      %138 = arith.mulf %136, %137 : vector<32x128xf32>
      %139 = vector.broadcast %122 : vector<1x128xf32> to vector<32x128xf32>
      %140 = arith.addf %138, %139 : vector<32x128xf32>
      %141 = vector.extract_strided_slice %119 {offsets = [0, 0], sizes = [32, 64], strides = [1, 1]} : vector<32x128xf32> to vector<32x64xf32>
      %c0_59 = arith.constant 0 : index
      %c0_60 = arith.constant 0 : index
      %c0_61 = arith.constant 0 : index
      %142 = vector.load %arg13[%c0_59, %c0_60, %c0_61] : memref<2x32x64xf32, #tpu.memory_space<vmem>>, vector<1x32x64xf32>
      %143 = vector.shape_cast %142 : vector<1x32x64xf32> to vector<32x64xf32>
      %144 = vector.shape_cast %141 : vector<32x64xf32> to vector<1x32x64xf32>
      tpu.vector_store %arg13[%c0_59, %c0_60, %c0_61], %144 {strides = array<i32>} : memref<2x32x64xf32, #tpu.memory_space<vmem>>, vector<1x32x64xf32>,
      %145 = vector.extract_strided_slice %140 {offsets = [0, 0], sizes = [32, 64], strides = [1, 1]} : vector<32x128xf32> to vector<32x64xf32>
      %c0_62 = arith.constant 0 : index
      %c0_63 = arith.constant 0 : index
      %c0_64 = arith.constant 0 : index
      %146 = vector.load %arg14[%c0_62, %c0_63, %c0_64] : memref<2x32x64xf32, #tpu.memory_space<vmem>>, vector<1x32x64xf32>
      %147 = vector.shape_cast %146 : vector<1x32x64xf32> to vector<32x64xf32>
      %148 = vector.shape_cast %145 : vector<32x64xf32> to vector<1x32x64xf32>
      tpu.vector_store %arg14[%c0_62, %c0_63, %c0_64], %148 {strides = array<i32>} : memref<2x32x64xf32, #tpu.memory_space<vmem>>, vector<1x32x64xf32>,
      %149 = vector.extract_strided_slice %119 {offsets = [0, 64], sizes = [32, 64], strides = [1, 1]} : vector<32x128xf32> to vector<32x64xf32>
      %c1_65 = arith.constant 1 : index
      %c0_66 = arith.constant 0 : index
      %c0_67 = arith.constant 0 : index
      %150 = vector.load %arg13[%c1_65, %c0_66, %c0_67] : memref<2x32x64xf32, #tpu.memory_space<vmem>>, vector<1x32x64xf32>
      %151 = vector.shape_cast %150 : vector<1x32x64xf32> to vector<32x64xf32>
      %152 = vector.shape_cast %149 : vector<32x64xf32> to vector<1x32x64xf32>
      tpu.vector_store %arg13[%c1_65, %c0_66, %c0_67], %152 {strides = array<i32>} : memref<2x32x64xf32, #tpu.memory_space<vmem>>, vector<1x32x64xf32>,
      %153 = vector.extract_strided_slice %140 {offsets = [0, 64], sizes = [32, 64], strides = [1, 1]} : vector<32x128xf32> to vector<32x64xf32>
      %c1_68 = arith.constant 1 : index
      %c0_69 = arith.constant 0 : index
      %c0_70 = arith.constant 0 : index
      %154 = vector.load %arg14[%c1_68, %c0_69, %c0_70] : memref<2x32x64xf32, #tpu.memory_space<vmem>>, vector<1x32x64xf32>
      %155 = vector.shape_cast %154 : vector<1x32x64xf32> to vector<32x64xf32>
      %156 = vector.shape_cast %153 : vector<32x64xf32> to vector<1x32x64xf32>
      tpu.vector_store %arg14[%c1_68, %c0_69, %c0_70], %156 {strides = array<i32>} : memref<2x32x64xf32, #tpu.memory_space<vmem>>, vector<1x32x64xf32>,
    } else {
    }
    return
  }
  func.func @transform_0(%arg0: i32) -> (i32, i32, i32) {
    %c0_i32 = arith.constant 0 : i32
    %c0_i32_0 = arith.constant 0 : i32
    %c0_i32_1 = arith.constant 0 : i32
    return %c0_i32, %arg0, %c0_i32_0 : i32, i32, i32
  }
  func.func @transform_1(%arg0: i32) -> (i32, i32, i32) {
    %c0_i32 = arith.constant 0 : i32
    %c0_i32_0 = arith.constant 0 : i32
    %c0_i32_1 = arith.constant 0 : i32
    %c0_i32_2 = arith.constant 0 : i32
    return %c0_i32, %c0_i32_0, %c0_i32_1 : i32, i32, i32
  }
  func.func @transform_2(%arg0: i32) -> (i32, i32) {
    %c0_i32 = arith.constant 0 : i32
    %c0_i32_0 = arith.constant 0 : i32
    %c0_i32_1 = arith.constant 0 : i32
    return %c0_i32, %c0_i32_0 : i32, i32
  }
  func.func @transform_3(%arg0: i32) -> (i32, i32) {
    %c0_i32 = arith.constant 0 : i32
    %c0_i32_0 = arith.constant 0 : i32
    %c0_i32_1 = arith.constant 0 : i32
    return %c0_i32, %c0_i32_0 : i32, i32
  }
  func.func @transform_4(%arg0: i32) -> (i32, i32) {
    %c0_i32 = arith.constant 0 : i32
    %c0_i32_0 = arith.constant 0 : i32
    %c0_i32_1 = arith.constant 0 : i32
    return %c0_i32, %c0_i32_0 : i32, i32
  }
  func.func @transform_5(%arg0: i32) -> (i32, i32) {
    %c0_i32 = arith.constant 0 : i32
    %c0_i32_0 = arith.constant 0 : i32
    %c0_i32_1 = arith.constant 0 : i32
    return %c0_i32, %c0_i32_0 : i32, i32
  }
  func.func @transform_6(%arg0: i32) -> (i32, i32) {
    %c0_i32 = arith.constant 0 : i32
    %c0_i32_0 = arith.constant 0 : i32
    %c0_i32_1 = arith.constant 0 : i32
    return %c0_i32, %c0_i32_0 : i32, i32
  }
  func.func @transform_7(%arg0: i32) -> (i32, i32) {
    %c0_i32 = arith.constant 0 : i32
    %c0_i32_0 = arith.constant 0 : i32
    return %c0_i32, %arg0 : i32, i32
  }
  func.func @transform_8(%arg0: i32) -> (i32, i32) {
    %c0_i32 = arith.constant 0 : i32
    %c0_i32_0 = arith.constant 0 : i32
    %c0_i32_1 = arith.constant 0 : i32
    return %c0_i32, %c0_i32_0 : i32, i32
  }
  func.func @transform_9(%arg0: i32) -> (i32, i32) {
    %c0_i32 = arith.constant 0 : i32
    %c0_i32_0 = arith.constant 0 : i32
    %c0_i32_1 = arith.constant 0 : i32
    return %c0_i32, %c0_i32_0 : i32, i32
  }
  func.func @transform_10(%arg0: i32) -> (i32, i32) {
    %c0_i32 = arith.constant 0 : i32
    %c0_i32_0 = arith.constant 0 : i32
    %c0_i32_1 = arith.constant 0 : i32
    return %c0_i32, %c0_i32_0 : i32, i32
  }
  func.func @transform_11(%arg0: i32) -> (i32, i32) {
    %c0_i32 = arith.constant 0 : i32
    %c0_i32_0 = arith.constant 0 : i32
    %c0_i32_1 = arith.constant 0 : i32
    return %c0_i32, %c0_i32_0 : i32, i32
  }
  func.func @transform_12(%arg0: i32) -> (i32, i32, i32) {
    %c0_i32 = arith.constant 0 : i32
    %c0_i32_0 = arith.constant 0 : i32
    %c0_i32_1 = arith.constant 0 : i32
    %c0_i32_2 = arith.constant 0 : i32
    return %c0_i32, %c0_i32_0, %c0_i32_1 : i32, i32, i32
  }
  func.func @transform_13(%arg0: i32) -> (i32, i32, i32) {
    %c0_i32 = arith.constant 0 : i32
    %c0_i32_0 = arith.constant 0 : i32
    %c0_i32_1 = arith.constant 0 : i32
    %c0_i32_2 = arith.constant 0 : i32
    return %c0_i32, %c0_i32_0, %c0_i32_1 : i32, i32, i32
  }
}

</mosaic_0001>

<bundles_post_ra>
// kernel: tile.28
= control target key start
LH: loop header
LB: loop body
LE: loop exit
PB: predicated region body
PF: predicated region fallthrough
CT: control target
= control target key end

     0   :  { %s28_s0 = inlined_call_operand.vmem [shape: f32[8], index: 0, kind: input, shape index: {}]   ;;  %s29_s1 = inlined_call_operand.vmem [shape: f32[16,8], index: 1, kind: output, shape index: {}]  }
   0x1   :  { %v4_v0 = vld [vmem:[%s28_s0] ss:$0 sm:$0xff] }
   0x2   :  { %5 = vst [vmem:[%s29_s1] sm:$0xff] %v4_v0 }
   0x3   :  { %8 = vst [vmem:[%s29_s1 + $0x8] sm:$0xff] %v4_v0 }

// kernel: tile.29
= control target key start
LH: loop header
LB: loop body
LE: loop exit
PB: predicated region body
PF: predicated region fallthrough
CT: control target
= control target key end

     0   :  { %s131_s10 = smov 120   ;;  %s132_s11 = smov 104   ;;  %vm3_vm0 = vcmask 64512   ;;  %vm9_vm1 = vcmask 1048512   ;;  %vm15_vm2 = vcmask 982912   ;;  %vm21_vm3 = vcmask 917312   ;;  %s207_s0 = inlined_call_operand.vmem [shape: f32[16,8], index: 0, kind: input, shape index: {}]   ;;  %s208_s1 = inlined_call_operand.vmem [shape: f32[1,128], index: 1, kind: output, shape index: {}]  }
   0x1   :  { %v101_v0 = vld [vmem:[%s207_s0 + $0xf] sm:$0x1]   ;;  %v103_v1 = vld [vmem:[%s207_s0 + $0xd] sm:$0x1]   ;;  %v105_v2 = vld [vmem:[%s207_s0 + $0xb] sm:$0x1]  }
   0x2   :  { %7 = vrot.lane.b32.xlu0 %v101_v0, %s131_s10  ;;  %19 = vrot.lane.b32.xlu1 %v103_v1, %s132_s11  ;;  %s133_s14 = smov 88   ;;  %v102_v3 = vld [vmem:[%s207_s0 + $0xe] sm:$0x1]   ;;  %v104_v4 = vld [vmem:[%s207_s0 + $0xc] sm:$0x1]   ;;  %s134_s19 = smov 112  }
   0x3   :  { %31 = vrot.lane.b32.xlu2 %v105_v2, %s133_s14  ;;  %s135_s20 = smov 96   ;;  %v106_v5 = vld [vmem:[%s207_s0 + $0xa] sm:$0x1]   ;;  %s136_s23 = smov 80   ;;  %v107_v6 = vld [vmem:[%s207_s0 + $0x9] sm:$0x1]  }
   0x4   :  { %v108_v7 = vld [vmem:[%s207_s0 + $0x8] sm:$0x1]   ;;  %s137_s28 = smov 72   ;;  %s138_s29 = smov 64   ;;  %v109_v8 = vld [vmem:[%s207_s0 + $0x7] sm:$0x1]  }
   0x5   :  { %s139_s3 = smov 56   ;;  %v110_v9 = vld [vmem:[%s207_s0 + $0x6] sm:$0x1]   ;;  %v111_v10 = vld [vmem:[%s207_s0 + $0x5] sm:$0x1]   ;;  %s140_s8 = smov 48  }
   0x6   :  { %s141_s9 = smov 40   ;;  %v112_v11 = vld [vmem:[%s207_s0 + $0x4] sm:$0x1]   ;;  %s142_s12 = smov 32   ;;  %v113_v12 = vld [vmem:[%s207_s0 + $0x3] sm:$0x1]  }
   0x7   :  { %v114_v13 = vld [vmem:[%s207_s0 + $0x2] sm:$0x1]   ;;  %s143_s17 = smov 24   ;;  %s144_s18 = smov 16   ;;  %v115_v14 = vld [vmem:[%s207_s0 + $0x1] sm:$0x1]  }
   0x8   :  { %s145_s21 = smov 8   ;;  %v2_v15 = vld [vmem:[%s207_s0] sm:$0x1]   ;;  %vm27_vm4 = vcmask 851712   ;;  %vm33_vm5 = vcmask 786112   ;;  %vm39_vm6 = vcmask 720512  }
   0x9   :  { %4 = vst.msk [vmem:[#allocation0] sm:$0x1] %vm3_vm0, %v2_v15   ;;  %vm45_vm7 = vcmask 654912   ;;  %vm51_vm8 = vcmask 589312   ;;  %vm57_vm9 = vcmask 523712   ;;  %vm63_vm10 = vcmask 458112  }
   0xa   :  { %13 = vrot.lane.b32.xlu0 %v102_v3, %s134_s19  ;;  %25 = vrot.lane.b32.xlu1 %v104_v4, %s135_s20  ;;  %vm69_vm11 = vcmask 392512   ;;  %vm75_vm12 = vcmask 326912   ;;  %vm81_vm13 = vcmask 261312   ;;  %vm87_vm14 = vcmask 195712  }
   0xb   :  { %37 = vrot.lane.b32.xlu2 %v106_v5, %s136_s23  ;;  %vm93_vm15 = vcmask 130112  }
  0x12   :  { %43 = vrot.lane.b32.xlu0 %v107_v6, %s137_s28  ;;  %49 = vrot.lane.b32.xlu1 %v108_v7, %s138_s29 }
  0x13   :  { %55 = vrot.lane.b32.xlu2 %v109_v8, %s139_s3 }
  0x1a   :  { %61 = vrot.lane.b32.xlu0 %v110_v9, %s140_s8  ;;  %67 = vrot.lane.b32.xlu1 %v111_v10, %s141_s9 }
  0x1b   :  { %73 = vrot.lane.b32.xlu2 %v112_v11, %s142_s12 }
  0x22   :  { %79 = vrot.lane.b32.xlu0 %v113_v12, %s143_s17  ;;  %85 = vrot.lane.b32.xlu1 %v114_v13, %s144_s18 }
  0x23   :  { %91 = vrot.lane.b32.xlu2 %v115_v14, %s145_s21 }
  0x5d   :  { %v32_v16 = vpop.permute.xlu2 %31  }
  0x65   :  { %v38_v17 = vpop.permute.xlu2 %37  }
  0x6d   :  { %v56_v18 = vpop.permute.xlu2 %55  }
  0x74   :  { %v8_v19 = vpop.permute.xlu0 %7   ;;  %v20_v20 = vpop.permute.xlu1 %19  }
  0x75   :  { %10 = vst.msk [vmem:[#allocation0] sm:$0x1] %vm9_vm1, %v8_v19   ;;  %v74_v21 = vpop.permute.xlu2 %73  }
  0x7c   :  { %v14_v22 = vpop.permute.xlu0 %13   ;;  %v26_v23 = vpop.permute.xlu1 %25  }
  0x7d   :  { %16 = vst.msk [vmem:[#allocation0] sm:$0x1] %vm15_vm2, %v14_v22   ;;  %v92_v24 = vpop.permute.xlu2 %91  }
  0x7e   :  { %22 = vst.msk [vmem:[#allocation0] sm:$0x1] %vm21_vm3, %v20_v20  }
  0x7f   :  { %28 = vst.msk [vmem:[#allocation0] sm:$0x1] %vm27_vm4, %v26_v23  }
  0x80   :  { %34 = vst.msk [vmem:[#allocation0] sm:$0x1] %vm33_vm5, %v32_v16  }
  0x81   :  { %40 = vst.msk [vmem:[#allocation0] sm:$0x1] %vm39_vm6, %v38_v17  }
  0x84   :  { %v44_v25 = vpop.permute.xlu0 %43   ;;  %v50_v26 = vpop.permute.xlu1 %49  }
  0x85   :  { %46 = vst.msk [vmem:[#allocation0] sm:$0x1] %vm45_vm7, %v44_v25  }
  0x86   :  { %52 = vst.msk [vmem:[#allocation0] sm:$0x1] %vm51_vm8, %v50_v26  }
  0x87   :  { %58 = vst.msk [vmem:[#allocation0] sm:$0x1] %vm57_vm9, %v56_v18  }
  0x8c   :  { %v62_v27 = vpop.permute.xlu0 %61   ;;  %v68_v28 = vpop.permute.xlu1 %67  }
  0x8d   :  { %64 = vst.msk [vmem:[#allocation0] sm:$0x1] %vm63_vm10, %v62_v27  }
  0x8e   :  { %70 = vst.msk [vmem:[#allocation0] sm:$0x1] %vm69_vm11, %v68_v28  }
  0x8f   :  { %76 = vst.msk [vmem:[#allocation0] sm:$0x1] %vm75_vm12, %v74_v21  }
  0x94   :  { %v80_v29 = vpop.permute.xlu0 %79   ;;  %v86_v30 = vpop.permute.xlu1 %85  }
  0x95   :  { %82 = vst.msk [vmem:[#allocation0] sm:$0x1] %vm81_vm13, %v80_v29  }
  0x96   :  { %88 = vst.msk [vmem:[#allocation0] sm:$0x1] %vm87_vm14, %v86_v30  }
  0x97   :  { %94 = vst.msk [vmem:[#allocation0] sm:$0x1] %vm93_vm15, %v92_v24  }
  0x9e   :  { %v97_v31 = vld [vmem:[#allocation0] sm:$0x1] }
  0x9f   :  { %100 = vst [vmem:[%s208_s1] sm:$0x1] %v97_v31 }

// kernel: transformer_forward.4
= control target key start
LH: loop header
LB: loop body
LE: loop exit
PB: predicated region body
PF: predicated region fallthrough
CT: control target
= control target key end

     0   :  { %10 = vsyncpa [#allocation4], 0  ;;  %s882_s21 = smov [#allocation3]   ;;  %s883_s23 = smov 1024   ;;  %s1000_s0 = inlined_call_operand.vmem [shape: f32[2,2048], index: 0, kind: input, shape index: {}]   ;;  %s1001_s1 = inlined_call_operand.hbm [shape: bf16[128,2048], index: 1, kind: input, shape index: {}]   ;;  %s1002_s2 = inlined_call_operand.vmem [shape: f32[1,128], index: 2, kind: input, shape index: {}]   ;;  %s1003_s3 = inlined_call_operand.vmem [shape: f32[128,128], index: 3, kind: input, shape index: {}]   ;;  %s1004_s4 = inlined_call_operand.vmem [shape: f32[1,128], index: 4, kind: input, shape index: {}]   ;;  %s1005_s5 = inlined_call_operand.vmem [shape: f32[2,128], index: 5, kind: output, shape index: {}]  }
   0x1   :  { %s17_s20 = sshll.u32 %s1001_s1, 4  ;;  %s19_s22 = sshll.u32 %s882_s21, 4  ;;  %s18_s20 = int_to_ptr.hbm [resolvable:$true] %s17_s20  ;;  %s20_s22 = int_to_ptr.vmem [resolvable:$true] %s19_s22 }
   0x2   :  { %s884_s24 = smov 64  }
   0x3   :  { %25 = dma.hbm_to_vmem [thread:$0]  %s18_s20, 16384, %s20_s22, [#allocation4], %s883_s23, %s883_s23, %s884_s24  }
   0x4   :  { %880 = dma.done.wait [#allocation4], 16384  }
   0x5   :  { %881 = vsyncadd [#allocation4], 4294950912  ;;  %v166_v0 = vld [vmem:[#allocation3 + $0x3c0] sm:$0xff]  ;;  %v167_v1 = vld [vmem:[#allocation3 + $0x3c8] sm:$0xff] }
   0x6   :  { %v158_v2 = vld [vmem:[#allocation3 + $0x380] sm:$0xff]  ;;  %v414_v3 = vunpack.c.l.bf16 %v166_v0  ;;  %v416_v4 = vunpack.c.l.bf16 %v167_v1  ;;  %v415_v5 = vunpack.c.h.bf16 %v166_v0  ;;  %v417_v6 = vunpack.c.h.bf16 %v167_v1  ;;  %v159_v7 = vld [vmem:[#allocation3 + $0x388] sm:$0xff] }
   0x7   :  { %v398_v8 = vunpack.c.l.bf16 %v158_v2  ;;  %v400_v9 = vunpack.c.l.bf16 %v159_v7  ;;  %v399_v10 = vunpack.c.h.bf16 %v158_v2  ;;  %v401_v11 = vunpack.c.h.bf16 %v159_v7  ;;  %v150_v12 = vld [vmem:[#allocation3 + $0x340] sm:$0xff]  ;;  %v151_v13 = vld [vmem:[#allocation3 + $0x348] sm:$0xff] }
   0x8   :  { %471 = vmatpush.xpose.msra.mxu0 %v414_v3  ;;  %511 = vmatpush.xpose.msra.mxu2 %v416_v4  ;;  %v382_v14 = vunpack.c.l.bf16 %v150_v12  ;;  %v384_v15 = vunpack.c.l.bf16 %v151_v13  ;;  %v383_v16 = vunpack.c.h.bf16 %v150_v12  ;;  %v385_v17 = vunpack.c.h.bf16 %v151_v13  ;;  %v142_v18 = vld [vmem:[#allocation3 + $0x300] sm:$0xff]  ;;  %v143_v19 = vld [vmem:[#allocation3 + $0x308] sm:$0xff] }
   0x9   :  { %491 = vmatpush.xpose.msra.mxu1 %v415_v5  ;;  %531 = vmatpush.xpose.msra.mxu3 %v417_v6  ;;  %v366_v20 = vunpack.c.l.bf16 %v142_v18  ;;  %v368_v21 = vunpack.c.l.bf16 %v143_v19  ;;  %v367_v22 = vunpack.c.h.bf16 %v142_v18  ;;  %v369_v23 = vunpack.c.h.bf16 %v143_v19  ;;  %v134_v24 = vld [vmem:[#allocation3 + $0x2c0] sm:$0xff]  ;;  %v135_v25 = vld [vmem:[#allocation3 + $0x2c8] sm:$0xff] }
   0xa   :  { %v350_v26 = vunpack.c.l.bf16 %v134_v24  ;;  %v352_v27 = vunpack.c.l.bf16 %v135_v25  ;;  %v351_v28 = vunpack.c.h.bf16 %v134_v24  ;;  %v353_v29 = vunpack.c.h.bf16 %v135_v25  ;;  %v126_v30 = vld [vmem:[#allocation3 + $0x280] sm:$0xff]  ;;  %v127_v31 = vld [vmem:[#allocation3 + $0x288] sm:$0xff] }
   0xb   :  { %v334_v32 = vunpack.c.l.bf16 %v126_v30  ;;  %v336_v33 = vunpack.c.l.bf16 %v127_v31  ;;  %v335_v34 = vunpack.c.h.bf16 %v126_v30  ;;  %v337_v35 = vunpack.c.h.bf16 %v127_v31  ;;  %v118_v36 = vld [vmem:[#allocation3 + $0x240] sm:$0xff]  ;;  %v119_v37 = vld [vmem:[#allocation3 + $0x248] sm:$0xff] }
   0xc   :  { %472 = vmatpush.xpose.msra.mxu0 %v398_v8  ;;  %512 = vmatpush.xpose.msra.mxu2 %v400_v9  ;;  %v318_v38 = vunpack.c.l.bf16 %v118_v36  ;;  %v320_v39 = vunpack.c.l.bf16 %v119_v37  ;;  %v319_v40 = vunpack.c.h.bf16 %v118_v36  ;;  %v321_v41 = vunpack.c.h.bf16 %v119_v37  ;;  %v110_v42 = vld [vmem:[#allocation3 + $0x200] sm:$0xff]  ;;  %v111_v43 = vld [vmem:[#allocation3 + $0x208] sm:$0xff]  ;;  %v160_v36 = vld [vmem:[#allocation3 + $0x390] sm:$0xff] }
   0xd   :  { %492 = vmatpush.xpose.msra.mxu1 %v399_v10  ;;  %532 = vmatpush.xpose.msra.mxu3 %v401_v11  ;;  %v302_v44 = vunpack.c.l.bf16 %v110_v42  ;;  %v304_v45 = vunpack.c.l.bf16 %v111_v43  ;;  %v303_v46 = vunpack.c.h.bf16 %v110_v42  ;;  %v305_v47 = vunpack.c.h.bf16 %v111_v43  ;;  %v102_v48 = vld [vmem:[#allocation3 + $0x1c0] sm:$0xff]  ;;  %v103_v49 = vld [vmem:[#allocation3 + $0x1c8] sm:$0xff]  ;;  %v161_v37 = vld [vmem:[#allocation3 + $0x398] sm:$0xff] }
   0xe   :  { %v286_v50 = vunpack.c.l.bf16 %v102_v48  ;;  %v288_v51 = vunpack.c.l.bf16 %v103_v49  ;;  %v287_v52 = vunpack.c.h.bf16 %v102_v48  ;;  %v289_v53 = vunpack.c.h.bf16 %v103_v49  ;;  %v94_v54 = vld [vmem:[#allocation3 + $0x180] sm:$0xff]  ;;  %v95_v55 = vld [vmem:[#allocation3 + $0x188] sm:$0xff]  ;;  %v152_v42 = vld [vmem:[#allocation3 + $0x350] sm:$0xff] }
   0xf   :  { %v270_v56 = vunpack.c.l.bf16 %v94_v54  ;;  %v272_v57 = vunpack.c.l.bf16 %v95_v55  ;;  %v271_v58 = vunpack.c.h.bf16 %v94_v54  ;;  %v273_v59 = vunpack.c.h.bf16 %v95_v55  ;;  %v86_v60 = vld [vmem:[#allocation3 + $0x140] sm:$0xff]  ;;  %v87_v61 = vld [vmem:[#allocation3 + $0x148] sm:$0xff]  ;;  %v153_v43 = vld [vmem:[#allocation3 + $0x358] sm:$0xff] }
  0x10   :  { %473 = vmatpush.xpose.msra.mxu0 %v382_v14  ;;  %513 = vmatpush.xpose.msra.mxu2 %v384_v15  ;;  %v254_v62 = vunpack.c.l.bf16 %v86_v60  ;;  %v256_v63 = vunpack.c.l.bf16 %v87_v61  ;;  %v255_v0 = vunpack.c.h.bf16 %v86_v60  ;;  %v257_v1 = vunpack.c.h.bf16 %v87_v61  ;;  %v78_v2 = vld [vmem:[#allocation3 + $0x100] sm:$0xff]  ;;  %v79_v3 = vld [vmem:[#allocation3 + $0x108] sm:$0xff]  ;;  %v144_v48 = vld [vmem:[#allocation3 + $0x310] sm:$0xff] }
  0x11   :  { %493 = vmatpush.xpose.msra.mxu1 %v383_v16  ;;  %533 = vmatpush.xpose.msra.mxu3 %v385_v17  ;;  %v238_v4 = vunpack.c.l.bf16 %v78_v2  ;;  %v240_v5 = vunpack.c.l.bf16 %v79_v3  ;;  %v239_v6 = vunpack.c.h.bf16 %v78_v2  ;;  %v241_v7 = vunpack.c.h.bf16 %v79_v3  ;;  %v70_v8 = vld [vmem:[#allocation3 + $0xc0] sm:$0xff]  ;;  %v71_v9 = vld [vmem:[#allocation3 + $0xc8] sm:$0xff]  ;;  %v145_v49 = vld [vmem:[#allocation3 + $0x318] sm:$0xff] }
  0x12   :  { %v222_v10 = vunpack.c.l.bf16 %v70_v8  ;;  %v224_v11 = vunpack.c.l.bf16 %v71_v9  ;;  %v223_v12 = vunpack.c.h.bf16 %v70_v8  ;;  %v225_v13 = vunpack.c.h.bf16 %v71_v9  ;;  %v62_v14 = vld [vmem:[#allocation3 + $0x80] sm:$0xff]  ;;  %v63_v15 = vld [vmem:[#allocation3 + $0x88] sm:$0xff]  ;;  %v136_v54 = vld [vmem:[#allocation3 + $0x2d0] sm:$0xff] }
  0x13   :  { %v206_v16 = vunpack.c.l.bf16 %v62_v14  ;;  %v208_v17 = vunpack.c.l.bf16 %v63_v15  ;;  %v207_v18 = vunpack.c.h.bf16 %v62_v14  ;;  %v209_v19 = vunpack.c.h.bf16 %v63_v15  ;;  %v137_v55 = vld [vmem:[#allocation3 + $0x2d8] sm:$0xff]  ;;  %v128_v60 = vld [vmem:[#allocation3 + $0x290] sm:$0xff] }
  0x14   :  { %474 = vmatpush.xpose.msra.mxu0 %v366_v20  ;;  %514 = vmatpush.xpose.msra.mxu2 %v368_v21  ;;  %v54_v20 = vld [vmem:[#allocation3 + $0x40] sm:$0xff]  ;;  %v55_v21 = vld [vmem:[#allocation3 + $0x48] sm:$0xff]  ;;  %v129_v61 = vld [vmem:[#allocation3 + $0x298] sm:$0xff] }
  0x15   :  { %494 = vmatpush.xpose.msra.mxu1 %v367_v22  ;;  %534 = vmatpush.xpose.msra.mxu3 %v369_v23  ;;  %v190_v22 = vunpack.c.l.bf16 %v54_v20  ;;  %v192_v23 = vunpack.c.l.bf16 %v55_v21  ;;  %v191_v24 = vunpack.c.h.bf16 %v54_v20  ;;  %v193_v25 = vunpack.c.h.bf16 %v55_v21  ;;  %v120_v2 = vld [vmem:[#allocation3 + $0x250] sm:$0xff]  ;;  %v121_v3 = vld [vmem:[#allocation3 + $0x258] sm:$0xff] }
  0x16   :  { %v324_v8 = vunpack.c.l.bf16 %v121_v3  ;;  %v112_v9 = vld [vmem:[#allocation3 + $0x210] sm:$0xff]  ;;  %v43_v20 = vld [vmem:[%s1000_s0 + $0x8] sm:$0xff] }
  0x17   :  { %v104_v15 = vld [vmem:[#allocation3 + $0x1d0] sm:$0xff]  ;;  %436 = vst [vmem:[#allocation1 + $0x20] ss:$4 sm:$0xff] %v43_v20 }
  0x18   :  { %475 = vmatpush.xpose.msra.mxu0 %v350_v26  ;;  %515 = vmatpush.xpose.msra.mxu2 %v352_v27  ;;  %v46_v26 = vld [vmem:[#allocation3] sm:$0xff]  ;;  %v47_v27 = vld [vmem:[#allocation3 + $0x8] sm:$0xff]  ;;  %v290_v21 = vunpack.c.l.bf16 %v104_v15 }
  0x19   :  { %495 = vmatpush.xpose.msra.mxu1 %v351_v28  ;;  %535 = vmatpush.xpose.msra.mxu3 %v353_v29  ;;  %v168_v28 = vld [vmem:[#allocation3 + $0x3d0] sm:$0xff]  ;;  %v169_v29 = vld [vmem:[#allocation3 + $0x3d8] sm:$0xff]  ;;  %v174_v30 = vunpack.c.l.bf16 %v46_v26  ;;  %v176_v31 = vunpack.c.l.bf16 %v47_v27 }
  0x1c   :  { %476 = vmatpush.xpose.msra.mxu0 %v334_v32  ;;  %516 = vmatpush.xpose.msra.mxu2 %v336_v33  ;;  %v418_v32 = vunpack.c.l.bf16 %v168_v28  ;;  %v420_v33 = vunpack.c.l.bf16 %v169_v29 }
  0x1d   :  { %496 = vmatpush.xpose.msra.mxu1 %v335_v34  ;;  %536 = vmatpush.xpose.msra.mxu3 %v337_v35  ;;  %v175_v34 = vunpack.c.h.bf16 %v46_v26  ;;  %v177_v35 = vunpack.c.h.bf16 %v47_v27  ;;  %v97_v26 = vld [vmem:[#allocation3 + $0x198] sm:$0xff]  ;;  %v291_v27 = vunpack.c.h.bf16 %v104_v15 }
  0x20   :  { %477 = vmatpush.xpose.msra.mxu0 %v318_v38  ;;  %517 = vmatpush.xpose.msra.mxu2 %v320_v39  ;;  %v419_v38 = vunpack.c.h.bf16 %v168_v28  ;;  %v421_v39 = vunpack.c.h.bf16 %v169_v29  ;;  %v44_v29 = vld [vmem:[%s1000_s0 + $0x10] sm:$0xff] }
  0x21   :  { %497 = vmatpush.xpose.msra.mxu1 %v319_v40  ;;  %537 = vmatpush.xpose.msra.mxu3 %v321_v41  ;;  %v402_v40 = vunpack.c.l.bf16 %v160_v36  ;;  %v404_v41 = vunpack.c.l.bf16 %v161_v37 }
  0x24   :  { %478 = vmatpush.xpose.msra.mxu0 %v302_v44  ;;  %518 = vmatpush.xpose.msra.mxu2 %v304_v45  ;;  %v403_v44 = vunpack.c.h.bf16 %v160_v36  ;;  %v405_v45 = vunpack.c.h.bf16 %v161_v37  ;;  %v277_v36 = vunpack.c.h.bf16 %v97_v26 }
  0x25   :  { %498 = vmatpush.xpose.msra.mxu1 %v303_v46  ;;  %538 = vmatpush.xpose.msra.mxu3 %v305_v47  ;;  %v386_v46 = vunpack.c.l.bf16 %v152_v42  ;;  %v388_v47 = vunpack.c.l.bf16 %v153_v43 }
  0x28   :  { %479 = vmatpush.xpose.msra.mxu0 %v286_v50  ;;  %519 = vmatpush.xpose.msra.mxu2 %v288_v51  ;;  %v387_v50 = vunpack.c.h.bf16 %v152_v42  ;;  %v389_v51 = vunpack.c.h.bf16 %v153_v43  ;;  %v930_v42 = vld.sshfl [vmem:[#allocation1 + $0x20] sm:$0xff pattern:$0x73625140]  ;;  %v45_v43 = vld [vmem:[%s1000_s0 + $0x18] sm:$0xff] }
  0x29   :  { %499 = vmatpush.xpose.msra.mxu1 %v287_v52  ;;  %539 = vmatpush.xpose.msra.mxu3 %v289_v53  ;;  %v370_v52 = vunpack.c.l.bf16 %v144_v48  ;;  %v372_v53 = vunpack.c.l.bf16 %v145_v49 }
  0x2c   :  { %480 = vmatpush.xpose.msra.mxu0 %v270_v56  ;;  %520 = vmatpush.xpose.msra.mxu2 %v272_v57  ;;  %v371_v56 = vunpack.c.h.bf16 %v144_v48  ;;  %v373_v57 = vunpack.c.h.bf16 %v145_v49 }
  0x2d   :  { %500 = vmatpush.xpose.msra.mxu1 %v271_v58  ;;  %540 = vmatpush.xpose.msra.mxu3 %v273_v59  ;;  %v354_v58 = vunpack.c.l.bf16 %v136_v54  ;;  %v356_v59 = vunpack.c.l.bf16 %v137_v55 }
  0x30   :  { %481 = vmatpush.xpose.msra.mxu0 %v254_v62  ;;  %521 = vmatpush.xpose.msra.mxu2 %v256_v63  ;;  %v355_v62 = vunpack.c.h.bf16 %v136_v54  ;;  %v357_v63 = vunpack.c.h.bf16 %v137_v55 }
  0x31   :  { %501 = vmatpush.xpose.msra.mxu1 %v255_v0  ;;  %541 = vmatpush.xpose.msra.mxu3 %v257_v1  ;;  %v338_v0 = vunpack.c.l.bf16 %v128_v60  ;;  %v340_v1 = vunpack.c.l.bf16 %v129_v61 }
  0x34   :  { %482 = vmatpush.xpose.msra.mxu0 %v238_v4  ;;  %522 = vmatpush.xpose.msra.mxu2 %v240_v5  ;;  %v339_v4 = vunpack.c.h.bf16 %v128_v60  ;;  %v341_v5 = vunpack.c.h.bf16 %v129_v61 }
  0x35   :  { %502 = vmatpush.xpose.msra.mxu1 %v239_v6  ;;  %542 = vmatpush.xpose.msra.mxu3 %v241_v7  ;;  %v42_v6 = vld [vmem:[%s1000_s0] sm:$0xff]  ;;  %v322_v7 = vunpack.c.l.bf16 %v120_v2 }
  0x36   :  { %434 = vst [vmem:[#allocation1] ss:$4 sm:$0xff] %v42_v6 }
  0x38   :  { %483 = vmatpush.xpose.msra.mxu0 %v222_v10  ;;  %523 = vmatpush.xpose.msra.mxu2 %v224_v11  ;;  %v113_v10 = vld [vmem:[#allocation3 + $0x218] sm:$0xff]  ;;  %v323_v11 = vunpack.c.h.bf16 %v120_v2 }
  0x39   :  { %503 = vmatpush.xpose.msra.mxu1 %v223_v12  ;;  %543 = vmatpush.xpose.msra.mxu3 %v225_v13  ;;  %v325_v12 = vunpack.c.h.bf16 %v121_v3  ;;  %v306_v13 = vunpack.c.l.bf16 %v112_v9  ;;  %v308_v14 = vunpack.c.l.bf16 %v113_v10 }
  0x3c   :  { %484 = vmatpush.xpose.msra.mxu0 %v206_v16  ;;  %524 = vmatpush.xpose.msra.mxu2 %v208_v17  ;;  %v105_v16 = vld [vmem:[#allocation3 + $0x1d8] sm:$0xff]  ;;  %v307_v17 = vunpack.c.h.bf16 %v112_v9  ;;  %v171_v9 = vld [vmem:[#allocation3 + $0x3e8] sm:$0xff] }
  0x3d   :  { %504 = vmatpush.xpose.msra.mxu1 %v207_v18  ;;  %544 = vmatpush.xpose.msra.mxu3 %v209_v19  ;;  %v309_v18 = vunpack.c.h.bf16 %v113_v10  ;;  %v439_v19 = vld.sshfl [vmem:[#allocation1 + $0x10] sm:$0xff pattern:$0x73625140]  ;;  %v293_v28 = vunpack.c.h.bf16 %v105_v16 }
  0x40   :  { %485 = vmatpush.xpose.msra.mxu0 %v190_v22  ;;  %525 = vmatpush.xpose.msra.mxu2 %v192_v23  ;;  %v292_v22 = vunpack.c.l.bf16 %v105_v16  ;;  %v437_v23 = vld.sshfl [vmem:[#allocation1] sm:$0xff pattern:$0x73625140]  ;;  %v162_v16 = vld [vmem:[#allocation3 + $0x3a0] sm:$0xff] }
  0x41   :  { %505 = vmatpush.xpose.msra.mxu1 %v191_v24  ;;  %545 = vmatpush.xpose.msra.mxu3 %v193_v25  ;;  %v440_v24 = vld.sshfl [vmem:[#allocation1 + $0x18] sm:$0xff pattern:$0x73625140]  ;;  %v406_v20 = vunpack.c.l.bf16 %v162_v16 }
  0x42   :  { %v96_v25 = vld [vmem:[#allocation3 + $0x190] sm:$0xff] }
  0x44   :  { %486 = vmatpush.xpose.msra.mxu0 %v174_v30  ;;  %526 = vmatpush.xpose.msra.mxu2 %v176_v31  ;;  %v438_v30 = vld.sshfl [vmem:[#allocation1 + $0x8] sm:$0xff pattern:$0x73625140]  ;;  %v274_v31 = vunpack.c.l.bf16 %v96_v25 }
  0x45   :  { %506 = vmatpush.xpose.msra.mxu1 %v175_v34  ;;  %546 = vmatpush.xpose.msra.mxu3 %v177_v35  ;;  %445 = vst [vmem:[#allocation1] ss:$4 sm:$0xff] %v44_v29  ;;  %v89_v34 = vld [vmem:[#allocation3 + $0x158] sm:$0xff]  ;;  %v275_v35 = vunpack.c.h.bf16 %v96_v25  ;;  %v147_v29 = vld [vmem:[#allocation3 + $0x328] sm:$0xff] }
  0x47   :  { %527 = vmatmul.f32.vlgmr.msra.gmra.mxu2 %v439_v19  ;;  %487 = vmatmul.f32.vlgmr.msra.gmra.mxu0 %v437_v23  ;;  %v425_v19 = vunpack.c.h.bf16 %v171_v9  ;;  %v155_v23 = vld [vmem:[#allocation3 + $0x368] sm:$0xff] }
  0x48   :  { %551 = vmatpush.xpose.msrb.mxu0 %v418_v32  ;;  %591 = vmatpush.xpose.msrb.mxu2 %v420_v33  ;;  %v276_v32 = vunpack.c.l.bf16 %v97_v26  ;;  %v88_v33 = vld [vmem:[#allocation3 + $0x150] sm:$0xff] }
  0x49   :  { %571 = vmatpush.xpose.msrb.mxu1 %v419_v38  ;;  %611 = vmatpush.xpose.msrb.mxu3 %v421_v39  ;;  %v258_v37 = vunpack.c.l.bf16 %v88_v33  ;;  %v260_v38 = vunpack.c.l.bf16 %v89_v34  ;;  %v80_v39 = vld [vmem:[#allocation3 + $0x110] sm:$0xff] }
  0x4a   :  { %547 = vmatmul.f32.vlgmr.msra.gmra.mxu3 %v440_v24  ;;  %507 = vmatmul.f32.vlgmr.msra.gmra.mxu1 %v438_v30  ;;  %v242_v48 = vunpack.c.l.bf16 %v80_v39  ;;  %v407_v24 = vunpack.c.h.bf16 %v162_v16 }
  0x4c   :  { %552 = vmatpush.xpose.msrb.mxu0 %v402_v40  ;;  %592 = vmatpush.xpose.msrb.mxu2 %v404_v41  ;;  %v928_v40 = vld.sshfl [vmem:[#allocation1 + $0x30] sm:$0xff pattern:$0x73625140]  ;;  %v81_v41 = vld [vmem:[#allocation3 + $0x118] sm:$0xff] }
  0x4d   :  { %572 = vmatpush.xpose.msrb.mxu1 %v403_v44  ;;  %612 = vmatpush.xpose.msrb.mxu3 %v405_v45  ;;  %v259_v44 = vunpack.c.h.bf16 %v88_v33  ;;  %v261_v45 = vunpack.c.h.bf16 %v89_v34  ;;  %v244_v49 = vunpack.c.l.bf16 %v81_v41  ;;  %v376_v33 = vunpack.c.l.bf16 %v147_v29  ;;  %v138_v34 = vld [vmem:[#allocation3 + $0x2e0] sm:$0xff] }
  0x50   :  { %553 = vmatpush.xpose.msrb.mxu0 %v386_v46  ;;  %593 = vmatpush.xpose.msrb.mxu2 %v388_v47  ;;  %v935_v46 = vld.sshfl [vmem:[#allocation1 + $0x38] sm:$0xff pattern:$0x73625140]  ;;  %v937_v47 = vld.sshfl [vmem:[#allocation1 + $0x28] sm:$0xff pattern:$0x73625140] }
  0x51   :  { %573 = vmatpush.xpose.msrb.mxu1 %v387_v50  ;;  %613 = vmatpush.xpose.msrb.mxu3 %v389_v51  ;;  %446 = vst [vmem:[#allocation1 + $0x20] ss:$4 sm:$0xff] %v45_v43  ;;  %v72_v50 = vld [vmem:[#allocation3 + $0xd0] sm:$0xff]  ;;  %v73_v51 = vld [vmem:[#allocation3 + $0xd8] sm:$0xff] }
  0x52   :  { %v226_v54 = vunpack.c.l.bf16 %v72_v50  ;;  %v228_v55 = vunpack.c.l.bf16 %v73_v51 }
  0x54   :  { %554 = vmatpush.xpose.msrb.mxu0 %v370_v52  ;;  %594 = vmatpush.xpose.msrb.mxu2 %v372_v53  ;;  %v243_v52 = vunpack.c.h.bf16 %v80_v39  ;;  %v245_v53 = vunpack.c.h.bf16 %v81_v41  ;;  %v131_v41 = vld [vmem:[#allocation3 + $0x2a8] sm:$0xff] }
  0x55   :  { %574 = vmatpush.xpose.msrb.mxu1 %v371_v56  ;;  %614 = vmatpush.xpose.msrb.mxu3 %v373_v57  ;;  %v64_v56 = vld [vmem:[#allocation3 + $0x90] sm:$0xff]  ;;  %v65_v57 = vld [vmem:[#allocation3 + $0x98] sm:$0xff] }
  0x56   :  { %v210_v60 = vunpack.c.l.bf16 %v64_v56  ;;  %v212_v61 = vunpack.c.l.bf16 %v65_v57 }
  0x58   :  { %555 = vmatpush.xpose.msrb.mxu0 %v354_v58  ;;  %595 = vmatpush.xpose.msrb.mxu2 %v356_v59  ;;  %v227_v58 = vunpack.c.h.bf16 %v72_v50  ;;  %v229_v59 = vunpack.c.h.bf16 %v73_v51 }
  0x59   :  { %575 = vmatpush.xpose.msrb.mxu1 %v355_v62  ;;  %615 = vmatpush.xpose.msrb.mxu3 %v357_v63  ;;  %v56_v62 = vld [vmem:[#allocation3 + $0x50] sm:$0xff]  ;;  %v57_v63 = vld [vmem:[#allocation3 + $0x58] sm:$0xff] }
  0x5a   :  { %v194_v2 = vunpack.c.l.bf16 %v56_v62  ;;  %v196_v3 = vunpack.c.l.bf16 %v57_v63  ;;  %v195_v6 = vunpack.c.h.bf16 %v56_v62 }
  0x5c   :  { %556 = vmatpush.xpose.msrb.mxu0 %v338_v0  ;;  %596 = vmatpush.xpose.msrb.mxu2 %v340_v1  ;;  %v211_v0 = vunpack.c.h.bf16 %v64_v56  ;;  %v213_v1 = vunpack.c.h.bf16 %v65_v57 }
  0x5d   :  { %576 = vmatpush.xpose.msrb.mxu1 %v339_v4  ;;  %616 = vmatpush.xpose.msrb.mxu3 %v341_v5  ;;  %v48_v4 = vld [vmem:[#allocation3 + $0x10] sm:$0xff]  ;;  %v49_v5 = vld [vmem:[#allocation3 + $0x18] sm:$0xff] }
  0x5e   :  { %v178_v10 = vunpack.c.l.bf16 %v48_v4  ;;  %v181_v15 = vunpack.c.h.bf16 %v49_v5 }
  0x60   :  { %557 = vmatpush.xpose.msrb.mxu0 %v322_v7  ;;  %597 = vmatpush.xpose.msrb.mxu2 %v324_v8  ;;  %v197_v7 = vunpack.c.h.bf16 %v57_v63  ;;  %v170_v8 = vld [vmem:[#allocation3 + $0x3e0] sm:$0xff] }
  0x61   :  { %577 = vmatpush.xpose.msrb.mxu1 %v323_v11  ;;  %617 = vmatpush.xpose.msrb.mxu3 %v325_v12  ;;  %v180_v11 = vunpack.c.l.bf16 %v49_v5  ;;  %v422_v12 = vunpack.c.l.bf16 %v170_v8 }
  0x64   :  { %558 = vmatpush.xpose.msrb.mxu0 %v306_v13  ;;  %598 = vmatpush.xpose.msrb.mxu2 %v308_v14  ;;  %v424_v13 = vunpack.c.l.bf16 %v171_v9  ;;  %v179_v14 = vunpack.c.h.bf16 %v48_v4 }
  0x65   :  { %578 = vmatpush.xpose.msrb.mxu1 %v307_v17  ;;  %618 = vmatpush.xpose.msrb.mxu3 %v309_v18  ;;  %v163_v17 = vld [vmem:[#allocation3 + $0x3a8] sm:$0xff]  ;;  %v423_v18 = vunpack.c.h.bf16 %v170_v8 }
  0x66   :  { %v409_v25 = vunpack.c.h.bf16 %v163_v17 }
  0x68   :  { %559 = vmatpush.xpose.msrb.mxu0 %v290_v21  ;;  %599 = vmatpush.xpose.msrb.mxu2 %v292_v22  ;;  %v408_v21 = vunpack.c.l.bf16 %v163_v17  ;;  %v154_v22 = vld [vmem:[#allocation3 + $0x360] sm:$0xff] }
  0x69   :  { %579 = vmatpush.xpose.msrb.mxu1 %v291_v27  ;;  %619 = vmatpush.xpose.msrb.mxu3 %v293_v28  ;;  %v390_v26 = vunpack.c.l.bf16 %v154_v22  ;;  %v392_v27 = vunpack.c.l.bf16 %v155_v23  ;;  %v146_v28 = vld [vmem:[#allocation3 + $0x320] sm:$0xff]  ;;  %v391_v30 = vunpack.c.h.bf16 %v154_v22 }
  0x6c   :  { %560 = vmatpush.xpose.msrb.mxu0 %v274_v31  ;;  %600 = vmatpush.xpose.msrb.mxu2 %v276_v32  ;;  %v393_v31 = vunpack.c.h.bf16 %v155_v23  ;;  %v374_v32 = vunpack.c.l.bf16 %v146_v28 }
  0x6d   :  { %580 = vmatpush.xpose.msrb.mxu1 %v275_v35  ;;  %620 = vmatpush.xpose.msrb.mxu3 %v277_v36  ;;  %v139_v35 = vld [vmem:[#allocation3 + $0x2e8] sm:$0xff]  ;;  %v375_v36 = vunpack.c.h.bf16 %v146_v28 }
  0x6e   :  { %v360_v39 = vunpack.c.l.bf16 %v139_v35  ;;  %v361_v43 = vunpack.c.h.bf16 %v139_v35 }
  0x70   :  { %561 = vmatpush.xpose.msrb.mxu0 %v258_v37  ;;  %601 = vmatpush.xpose.msrb.mxu2 %v260_v38  ;;  %v377_v37 = vunpack.c.h.bf16 %v147_v29  ;;  %v358_v38 = vunpack.c.l.bf16 %v138_v34 }
  0x71   :  { %581 = vmatpush.xpose.msrb.mxu1 %v259_v44  ;;  %621 = vmatpush.xpose.msrb.mxu3 %v261_v45  ;;  %v344_v45 = vunpack.c.l.bf16 %v131_v41 }
  0x74   :  { %562 = vmatpush.xpose.msrb.mxu0 %v242_v48  ;;  %602 = vmatpush.xpose.msrb.mxu2 %v244_v49  ;;  %v345_v49 = vunpack.c.h.bf16 %v131_v41  ;;  %v173_v41 = vld [vmem:[#allocation3 + $0x3f8] sm:$0xff] }
  0x75   :  { %582 = vmatpush.xpose.msrb.mxu1 %v243_v52  ;;  %622 = vmatpush.xpose.msrb.mxu3 %v245_v53  ;;  %v114_v52 = vld [vmem:[#allocation3 + $0x220] sm:$0xff]  ;;  %v115_v53 = vld [vmem:[#allocation3 + $0x228] sm:$0xff] }
  0x76   :  { %v310_v56 = vunpack.c.l.bf16 %v114_v52  ;;  %v312_v57 = vunpack.c.l.bf16 %v115_v53 }
  0x78   :  { %563 = vmatpush.xpose.msrb.mxu0 %v226_v54  ;;  %603 = vmatpush.xpose.msrb.mxu2 %v228_v55 }
  0x79   :  { %583 = vmatpush.xpose.msrb.mxu1 %v227_v58  ;;  %623 = vmatpush.xpose.msrb.mxu3 %v229_v59  ;;  %v106_v58 = vld [vmem:[#allocation3 + $0x1e0] sm:$0xff]  ;;  %v107_v59 = vld [vmem:[#allocation3 + $0x1e8] sm:$0xff] }
  0x7a   :  { %v294_v62 = vunpack.c.l.bf16 %v106_v58  ;;  %v296_v63 = vunpack.c.l.bf16 %v107_v59 }
  0x7c   :  { %564 = vmatpush.xpose.msrb.mxu0 %v210_v60  ;;  %604 = vmatpush.xpose.msrb.mxu2 %v212_v61  ;;  %v311_v60 = vunpack.c.h.bf16 %v114_v52  ;;  %v313_v61 = vunpack.c.h.bf16 %v115_v53  ;;  %v429_v53 = vunpack.c.h.bf16 %v173_v41 }
  0x7d   :  { %584 = vmatpush.xpose.msrb.mxu1 %v211_v0  ;;  %624 = vmatpush.xpose.msrb.mxu3 %v213_v1  ;;  %v98_v0 = vld [vmem:[#allocation3 + $0x1a0] sm:$0xff]  ;;  %v99_v1 = vld [vmem:[#allocation3 + $0x1a8] sm:$0xff] }
  0x7e   :  { %v278_v4 = vunpack.c.l.bf16 %v98_v0  ;;  %v280_v5 = vunpack.c.l.bf16 %v99_v1  ;;  %v279_v8 = vunpack.c.h.bf16 %v98_v0  ;;  %v281_v9 = vunpack.c.h.bf16 %v99_v1  ;;  %v148_v0 = vld [vmem:[#allocation3 + $0x330] sm:$0xff]  ;;  %v149_v1 = vld [vmem:[#allocation3 + $0x338] sm:$0xff] }
  0x80   :  { %565 = vmatpush.xpose.msrb.mxu0 %v194_v2  ;;  %605 = vmatpush.xpose.msrb.mxu2 %v196_v3  ;;  %v295_v2 = vunpack.c.h.bf16 %v106_v58  ;;  %v297_v3 = vunpack.c.h.bf16 %v107_v59  ;;  %v156_v58 = vld [vmem:[#allocation3 + $0x370] sm:$0xff]  ;;  %v157_v59 = vld [vmem:[#allocation3 + $0x378] sm:$0xff] }
  0x81   :  { %585 = vmatpush.xpose.msrb.mxu1 %v195_v6  ;;  %625 = vmatpush.xpose.msrb.mxu3 %v197_v7  ;;  %v90_v6 = vld [vmem:[#allocation3 + $0x160] sm:$0xff]  ;;  %v91_v7 = vld [vmem:[#allocation3 + $0x168] sm:$0xff] }
  0x84   :  { %566 = vmatpush.xpose.msrb.mxu0 %v178_v10  ;;  %606 = vmatpush.xpose.msrb.mxu2 %v180_v11  ;;  %v262_v10 = vunpack.c.l.bf16 %v90_v6  ;;  %v264_v11 = vunpack.c.l.bf16 %v91_v7 }
  0x85   :  { %586 = vmatpush.xpose.msrb.mxu1 %v179_v14  ;;  %626 = vmatpush.xpose.msrb.mxu3 %v181_v15  ;;  %v263_v14 = vunpack.c.h.bf16 %v90_v6  ;;  %v265_v15 = vunpack.c.h.bf16 %v91_v7  ;;  %v140_v6 = vld [vmem:[#allocation3 + $0x2f0] sm:$0xff]  ;;  %v141_v7 = vld [vmem:[#allocation3 + $0x2f8] sm:$0xff] }
  0x87   :  { %607 = vmatmul.f32.vlgmr.msrb.gmra.mxu2 %v928_v40  ;;  %567 = vmatmul.f32.vlgmr.msrb.gmra.mxu0 %v930_v42  ;;  %v130_v40 = vld [vmem:[#allocation3 + $0x2a0] sm:$0xff]  ;;  %v359_v42 = vunpack.c.h.bf16 %v138_v34 }
  0x88   :  { %631 = vmatpush.xpose.msra.mxu0 %v422_v12  ;;  %671 = vmatpush.xpose.msra.mxu2 %v424_v13  ;;  %v342_v44 = vunpack.c.l.bf16 %v130_v40  ;;  %v343_v48 = vunpack.c.h.bf16 %v130_v40  ;;  %v82_v12 = vld [vmem:[#allocation3 + $0x120] sm:$0xff]  ;;  %v83_v13 = vld [vmem:[#allocation3 + $0x128] sm:$0xff]  ;;  %v172_v40 = vld [vmem:[#allocation3 + $0x3f0] sm:$0xff] }
  0x89   :  { %651 = vmatpush.xpose.msra.mxu1 %v423_v18  ;;  %691 = vmatpush.xpose.msra.mxu3 %v425_v19  ;;  %v246_v16 = vunpack.c.l.bf16 %v82_v12  ;;  %v248_v17 = vunpack.c.l.bf16 %v83_v13  ;;  %v74_v18 = vld [vmem:[#allocation3 + $0xe0] sm:$0xff]  ;;  %v75_v19 = vld [vmem:[#allocation3 + $0xe8] sm:$0xff]  ;;  %v427_v52 = vunpack.c.h.bf16 %v172_v40 }
  0x8a   :  { %627 = vmatmul.f32.vlgmr.msrb.gmra.mxu3 %v935_v46  ;;  %587 = vmatmul.f32.vlgmr.msrb.gmra.mxu1 %v937_v47  ;;  %v122_v46 = vld [vmem:[#allocation3 + $0x260] sm:$0xff]  ;;  %v123_v47 = vld [vmem:[#allocation3 + $0x268] sm:$0xff]  ;;  %v230_v22 = vunpack.c.l.bf16 %v74_v18  ;;  %v232_v23 = vunpack.c.l.bf16 %v75_v19 }
  0x8b   :  { %v326_v50 = vunpack.c.l.bf16 %v122_v46  ;;  %v328_v51 = vunpack.c.l.bf16 %v123_v47  ;;  %v327_v54 = vunpack.c.h.bf16 %v122_v46  ;;  %v329_v55 = vunpack.c.h.bf16 %v123_v47 }
  0x8c   :  { %632 = vmatpush.xpose.msra.mxu0 %v406_v20  ;;  %672 = vmatpush.xpose.msra.mxu2 %v408_v21  ;;  %v247_v20 = vunpack.c.h.bf16 %v82_v12  ;;  %v249_v21 = vunpack.c.h.bf16 %v83_v13  ;;  %v132_v12 = vld [vmem:[#allocation3 + $0x2b0] sm:$0xff]  ;;  %v133_v13 = vld [vmem:[#allocation3 + $0x2b8] sm:$0xff] }
  0x8d   :  { %652 = vmatpush.xpose.msra.mxu1 %v407_v24  ;;  %692 = vmatpush.xpose.msra.mxu3 %v409_v25  ;;  %v66_v24 = vld [vmem:[#allocation3 + $0xa0] sm:$0xff]  ;;  %v67_v25 = vld [vmem:[#allocation3 + $0xa8] sm:$0xff] }
  0x8e   :  { %v214_v28 = vunpack.c.l.bf16 %v66_v24  ;;  %v216_v29 = vunpack.c.l.bf16 %v67_v25 }
  0x90   :  { %633 = vmatpush.xpose.msra.mxu0 %v390_v26  ;;  %673 = vmatpush.xpose.msra.mxu2 %v392_v27  ;;  %v231_v26 = vunpack.c.h.bf16 %v74_v18  ;;  %v233_v27 = vunpack.c.h.bf16 %v75_v19  ;;  %v124_v18 = vld [vmem:[#allocation3 + $0x270] sm:$0xff]  ;;  %v125_v19 = vld [vmem:[#allocation3 + $0x278] sm:$0xff] }
  0x91   :  { %653 = vmatpush.xpose.msra.mxu1 %v391_v30  ;;  %693 = vmatpush.xpose.msra.mxu3 %v393_v31  ;;  %v58_v30 = vld [vmem:[#allocation3 + $0x60] sm:$0xff]  ;;  %v59_v31 = vld [vmem:[#allocation3 + $0x68] sm:$0xff] }
  0x92   :  { %v198_v34 = vunpack.c.l.bf16 %v58_v30  ;;  %v200_v35 = vunpack.c.l.bf16 %v59_v31 }
  0x94   :  { %634 = vmatpush.xpose.msra.mxu0 %v374_v32  ;;  %674 = vmatpush.xpose.msra.mxu2 %v376_v33  ;;  %v215_v32 = vunpack.c.h.bf16 %v66_v24  ;;  %v217_v33 = vunpack.c.h.bf16 %v67_v25  ;;  %v116_v24 = vld [vmem:[#allocation3 + $0x230] sm:$0xff]  ;;  %v117_v25 = vld [vmem:[#allocation3 + $0x238] sm:$0xff] }
  0x95   :  { %654 = vmatpush.xpose.msra.mxu1 %v375_v36  ;;  %694 = vmatpush.xpose.msra.mxu3 %v377_v37  ;;  %v50_v36 = vld [vmem:[#allocation3 + $0x20] sm:$0xff]  ;;  %v51_v37 = vld [vmem:[#allocation3 + $0x28] sm:$0xff] }
  0x96   :  { %v183_v46 = vunpack.c.h.bf16 %v50_v36  ;;  %v185_v47 = vunpack.c.h.bf16 %v51_v37 }
  0x98   :  { %635 = vmatpush.xpose.msra.mxu0 %v358_v38  ;;  %675 = vmatpush.xpose.msra.mxu2 %v360_v39  ;;  %v199_v38 = vunpack.c.h.bf16 %v58_v30  ;;  %v201_v39 = vunpack.c.h.bf16 %v59_v31  ;;  %v108_v30 = vld [vmem:[#allocation3 + $0x1f0] sm:$0xff]  ;;  %v109_v31 = vld [vmem:[#allocation3 + $0x1f8] sm:$0xff] }
  0x99   :  { %655 = vmatpush.xpose.msra.mxu1 %v359_v42  ;;  %695 = vmatpush.xpose.msra.mxu3 %v361_v43  ;;  %v182_v42 = vunpack.c.l.bf16 %v50_v36  ;;  %v184_v43 = vunpack.c.l.bf16 %v51_v37  ;;  %v100_v36 = vld [vmem:[#allocation3 + $0x1b0] sm:$0xff]  ;;  %v101_v37 = vld [vmem:[#allocation3 + $0x1b8] sm:$0xff] }
  0x9c   :  { %636 = vmatpush.xpose.msra.mxu0 %v342_v44  ;;  %676 = vmatpush.xpose.msra.mxu2 %v344_v45  ;;  %v426_v44 = vunpack.c.l.bf16 %v172_v40  ;;  %v428_v45 = vunpack.c.l.bf16 %v173_v41  ;;  %v282_v40 = vunpack.c.l.bf16 %v100_v36  ;;  %v284_v41 = vunpack.c.l.bf16 %v101_v37 }
  0x9d   :  { %656 = vmatpush.xpose.msra.mxu1 %v343_v48  ;;  %696 = vmatpush.xpose.msra.mxu3 %v345_v49  ;;  %v164_v48 = vld [vmem:[#allocation3 + $0x3b0] sm:$0xff]  ;;  %v165_v49 = vld [vmem:[#allocation3 + $0x3b8] sm:$0xff] }
  0xa0   :  { %637 = vmatpush.xpose.msra.mxu0 %v326_v50  ;;  %677 = vmatpush.xpose.msra.mxu2 %v328_v51  ;;  %v447_v50 = vld.sshfl [vmem:[#allocation1] sm:$0xff pattern:$0x73625140]  ;;  %v449_v51 = vld.sshfl [vmem:[#allocation1 + $0x10] sm:$0xff pattern:$0x73625140] }
  0xa1   :  { %657 = vmatpush.xpose.msra.mxu1 %v327_v54  ;;  %697 = vmatpush.xpose.msra.mxu3 %v329_v55  ;;  %v448_v54 = vld.sshfl [vmem:[#allocation1 + $0x8] sm:$0xff pattern:$0x73625140]  ;;  %v450_v55 = vld.sshfl [vmem:[#allocation1 + $0x18] sm:$0xff pattern:$0x73625140] }
  0xa4   :  { %638 = vmatpush.xpose.msra.mxu0 %v310_v56  ;;  %678 = vmatpush.xpose.msra.mxu2 %v312_v57  ;;  %v410_v56 = vunpack.c.l.bf16 %v164_v48  ;;  %v412_v57 = vunpack.c.l.bf16 %v165_v49 }
  0xa5   :  { %658 = vmatpush.xpose.msra.mxu1 %v311_v60  ;;  %698 = vmatpush.xpose.msra.mxu3 %v313_v61  ;;  %v411_v60 = vunpack.c.h.bf16 %v164_v48  ;;  %v413_v61 = vunpack.c.h.bf16 %v165_v49  ;;  %v84_v48 = vld [vmem:[#allocation3 + $0x130] sm:$0xff]  ;;  %v85_v49 = vld [vmem:[#allocation3 + $0x138] sm:$0xff] }
  0xa8   :  { %639 = vmatpush.xpose.msra.mxu0 %v294_v62  ;;  %679 = vmatpush.xpose.msra.mxu2 %v296_v63  ;;  %v394_v62 = vunpack.c.l.bf16 %v156_v58  ;;  %v396_v63 = vunpack.c.l.bf16 %v157_v59 }
  0xa9   :  { %659 = vmatpush.xpose.msra.mxu1 %v295_v2  ;;  %699 = vmatpush.xpose.msra.mxu3 %v297_v3  ;;  %v395_v2 = vunpack.c.h.bf16 %v156_v58  ;;  %v397_v3 = vunpack.c.h.bf16 %v157_v59 }
  0xac   :  { %640 = vmatpush.xpose.msra.mxu0 %v278_v4  ;;  %680 = vmatpush.xpose.msra.mxu2 %v280_v5  ;;  %v378_v4 = vunpack.c.l.bf16 %v148_v0  ;;  %v380_v5 = vunpack.c.l.bf16 %v149_v1 }
  0xad   :  { %660 = vmatpush.xpose.msra.mxu1 %v279_v8  ;;  %700 = vmatpush.xpose.msra.mxu3 %v281_v9  ;;  %v379_v8 = vunpack.c.h.bf16 %v148_v0  ;;  %v381_v9 = vunpack.c.h.bf16 %v149_v1 }
  0xb0   :  { %641 = vmatpush.xpose.msra.mxu0 %v262_v10  ;;  %681 = vmatpush.xpose.msra.mxu2 %v264_v11  ;;  %v362_v10 = vunpack.c.l.bf16 %v140_v6  ;;  %v364_v11 = vunpack.c.l.bf16 %v141_v7 }
  0xb1   :  { %661 = vmatpush.xpose.msra.mxu1 %v263_v14  ;;  %701 = vmatpush.xpose.msra.mxu3 %v265_v15  ;;  %v363_v14 = vunpack.c.h.bf16 %v140_v6  ;;  %v365_v15 = vunpack.c.h.bf16 %v141_v7 }
  0xb4   :  { %642 = vmatpush.xpose.msra.mxu0 %v246_v16  ;;  %682 = vmatpush.xpose.msra.mxu2 %v248_v17  ;;  %v346_v16 = vunpack.c.l.bf16 %v132_v12  ;;  %v348_v17 = vunpack.c.l.bf16 %v133_v13 }
  0xb5   :  { %662 = vmatpush.xpose.msra.mxu1 %v247_v20  ;;  %702 = vmatpush.xpose.msra.mxu3 %v249_v21  ;;  %v347_v20 = vunpack.c.h.bf16 %v132_v12  ;;  %v349_v21 = vunpack.c.h.bf16 %v133_v13 }
  0xb8   :  { %643 = vmatpush.xpose.msra.mxu0 %v230_v22  ;;  %683 = vmatpush.xpose.msra.mxu2 %v232_v23  ;;  %v330_v22 = vunpack.c.l.bf16 %v124_v18  ;;  %v332_v23 = vunpack.c.l.bf16 %v125_v19 }
  0xb9   :  { %663 = vmatpush.xpose.msra.mxu1 %v231_v26  ;;  %703 = vmatpush.xpose.msra.mxu3 %v233_v27  ;;  %v331_v26 = vunpack.c.h.bf16 %v124_v18  ;;  %v333_v27 = vunpack.c.h.bf16 %v125_v19  ;;  %v452_v18 = vld.sshfl [vmem:[#allocation1 + $0x28] sm:$0xff pattern:$0x73625140]  ;;  %v454_v19 = vld.sshfl [vmem:[#allocation1 + $0x38] sm:$0xff pattern:$0x73625140] }
  0xbc   :  { %644 = vmatpush.xpose.msra.mxu0 %v214_v28  ;;  %684 = vmatpush.xpose.msra.mxu2 %v216_v29  ;;  %v314_v28 = vunpack.c.l.bf16 %v116_v24  ;;  %v316_v29 = vunpack.c.l.bf16 %v117_v25 }
  0xbd   :  { %664 = vmatpush.xpose.msra.mxu1 %v215_v32  ;;  %704 = vmatpush.xpose.msra.mxu3 %v217_v33  ;;  %v315_v32 = vunpack.c.h.bf16 %v116_v24  ;;  %v317_v33 = vunpack.c.h.bf16 %v117_v25  ;;  %v814_v24 = vld [vmem:[%s1003_s3 + $0x58] sm:$0xff]  ;;  %v813_v25 = vld [vmem:[%s1003_s3 + $0x50] sm:$0xff] }
  0xc0   :  { %645 = vmatpush.xpose.msra.mxu0 %v198_v34  ;;  %685 = vmatpush.xpose.msra.mxu2 %v200_v35  ;;  %v298_v34 = vunpack.c.l.bf16 %v108_v30  ;;  %v300_v35 = vunpack.c.l.bf16 %v109_v31 }
  0xc1   :  { %665 = vmatpush.xpose.msra.mxu1 %v199_v38  ;;  %705 = vmatpush.xpose.msra.mxu3 %v201_v39  ;;  %v299_v38 = vunpack.c.h.bf16 %v108_v30  ;;  %v301_v39 = vunpack.c.h.bf16 %v109_v31 }
  0xc4   :  { %646 = vmatpush.xpose.msra.mxu0 %v182_v42  ;;  %686 = vmatpush.xpose.msra.mxu2 %v184_v43  ;;  %v92_v42 = vld [vmem:[#allocation3 + $0x170] sm:$0xff]  ;;  %v93_v43 = vld [vmem:[#allocation3 + $0x178] sm:$0xff]  ;;  %v488_v31 = vpop.f32.mrf.mxu0 }
  0xc5   :  { %666 = vmatpush.xpose.msra.mxu1 %v183_v46  ;;  %706 = vmatpush.xpose.msra.mxu3 %v185_v47  ;;  %v266_v46 = vunpack.c.l.bf16 %v92_v42  ;;  %v268_v47 = vunpack.c.l.bf16 %v93_v43 }
  0xc7   :  { %647 = vmatmul.f32.vlgmr.msra.gmra.mxu0 %v447_v50  ;;  %687 = vmatmul.f32.vlgmr.msra.gmra.mxu2 %v449_v51  ;;  %v267_v50 = vunpack.c.h.bf16 %v92_v42  ;;  %v269_v51 = vunpack.c.h.bf16 %v93_v43  ;;  %v508_v30 = vpop.f32.mrf.mxu1  ;;  %v806_v43 = vld [vmem:[%s1003_s3 + $0x18] sm:$0xff] }
  0xc8   :  { %711 = vmatpush.xpose.msrb.mxu0 %v426_v44  ;;  %751 = vmatpush.xpose.msrb.mxu2 %v428_v45  ;;  %v283_v44 = vunpack.c.h.bf16 %v100_v36  ;;  %v285_v45 = vunpack.c.h.bf16 %v101_v37  ;;  %v808_v36 = vld [vmem:[%s1003_s3 + $0x28] sm:$0xff] }
  0xc9   :  { %731 = vmatpush.xpose.msrb.mxu1 %v427_v52  ;;  %771 = vmatpush.xpose.msrb.mxu3 %v429_v53  ;;  %v250_v52 = vunpack.c.l.bf16 %v84_v48  ;;  %v252_v53 = vunpack.c.l.bf16 %v85_v49 }
  0xca   :  { %667 = vmatmul.f32.vlgmr.msra.gmra.mxu1 %v448_v54  ;;  %707 = vmatmul.f32.vlgmr.msra.gmra.mxu3 %v450_v55  ;;  %v76_v54 = vld [vmem:[#allocation3 + $0xf0] sm:$0xff]  ;;  %v77_v55 = vld [vmem:[#allocation3 + $0xf8] sm:$0xff] }
  0xcb   :  { %v234_v58 = vunpack.c.l.bf16 %v76_v54  ;;  %v236_v59 = vunpack.c.l.bf16 %v77_v55 }
  0xcc   :  { %712 = vmatpush.xpose.msrb.mxu0 %v410_v56  ;;  %752 = vmatpush.xpose.msrb.mxu2 %v412_v57  ;;  %v251_v56 = vunpack.c.h.bf16 %v84_v48  ;;  %v253_v57 = vunpack.c.h.bf16 %v85_v49  ;;  %v804_v48 = vld [vmem:[%s1003_s3 + $0x8] sm:$0xff] }
  0xcd   :  { %732 = vmatpush.xpose.msrb.mxu1 %v411_v60  ;;  %772 = vmatpush.xpose.msrb.mxu3 %v413_v61  ;;  %v68_v60 = vld [vmem:[#allocation3 + $0xb0] sm:$0xff]  ;;  %v69_v61 = vld [vmem:[#allocation3 + $0xb8] sm:$0xff] }
  0xce   :  { %v218_v0 = vunpack.c.l.bf16 %v68_v60  ;;  %v220_v1 = vunpack.c.l.bf16 %v69_v61 }
  0xd0   :  { %713 = vmatpush.xpose.msrb.mxu0 %v394_v62  ;;  %753 = vmatpush.xpose.msrb.mxu2 %v396_v63  ;;  %v235_v62 = vunpack.c.h.bf16 %v76_v54  ;;  %v237_v63 = vunpack.c.h.bf16 %v77_v55 }
  0xd1   :  { %733 = vmatpush.xpose.msrb.mxu1 %v395_v2  ;;  %773 = vmatpush.xpose.msrb.mxu3 %v397_v3  ;;  %v60_v2 = vld [vmem:[#allocation3 + $0x70] sm:$0xff]  ;;  %v61_v3 = vld [vmem:[#allocation3 + $0x78] sm:$0xff] }
  0xd2   :  { %v202_v6 = vunpack.c.l.bf16 %v60_v2  ;;  %v204_v7 = vunpack.c.l.bf16 %v61_v3 }
  0xd4   :  { %714 = vmatpush.xpose.msrb.mxu0 %v378_v4  ;;  %754 = vmatpush.xpose.msrb.mxu2 %v380_v5  ;;  %v219_v4 = vunpack.c.h.bf16 %v68_v60  ;;  %v221_v5 = vunpack.c.h.bf16 %v69_v61 }
  0xd5   :  { %734 = vmatpush.xpose.msrb.mxu1 %v379_v8  ;;  %774 = vmatpush.xpose.msrb.mxu3 %v381_v9  ;;  %v52_v8 = vld [vmem:[#allocation3 + $0x30] sm:$0xff]  ;;  %v53_v9 = vld [vmem:[#allocation3 + $0x38] sm:$0xff] }
  0xd6   :  { %v186_v12 = vunpack.c.l.bf16 %v52_v8  ;;  %v188_v13 = vunpack.c.l.bf16 %v53_v9 }
  0xd8   :  { %715 = vmatpush.xpose.msrb.mxu0 %v362_v10  ;;  %755 = vmatpush.xpose.msrb.mxu2 %v364_v11  ;;  %v203_v10 = vunpack.c.h.bf16 %v60_v2  ;;  %v205_v11 = vunpack.c.h.bf16 %v61_v3 }
  0xd9   :  { %735 = vmatpush.xpose.msrb.mxu1 %v363_v14  ;;  %775 = vmatpush.xpose.msrb.mxu3 %v365_v15  ;;  %v187_v14 = vunpack.c.h.bf16 %v52_v8  ;;  %v189_v15 = vunpack.c.h.bf16 %v53_v9 }
  0xdc   :  { %716 = vmatpush.xpose.msrb.mxu0 %v346_v16  ;;  %756 = vmatpush.xpose.msrb.mxu2 %v348_v17  ;;  %v451_v16 = vld.sshfl [vmem:[#allocation1 + $0x20] sm:$0xff pattern:$0x73625140]  ;;  %v453_v17 = vld.sshfl [vmem:[#allocation1 + $0x30] sm:$0xff pattern:$0x73625140] }
  0xdd   :  { %736 = vmatpush.xpose.msrb.mxu1 %v347_v20  ;;  %776 = vmatpush.xpose.msrb.mxu3 %v349_v21  ;;  %v818_v20 = vld [vmem:[%s1003_s3 + $0x78] sm:$0xff]  ;;  %v817_v21 = vld [vmem:[%s1003_s3 + $0x70] sm:$0xff] }
  0xe0   :  { %717 = vmatpush.xpose.msrb.mxu0 %v330_v22  ;;  %757 = vmatpush.xpose.msrb.mxu2 %v332_v23  ;;  %v816_v22 = vld [vmem:[%s1003_s3 + $0x68] sm:$0xff]  ;;  %v815_v23 = vld [vmem:[%s1003_s3 + $0x60] sm:$0xff] }
  0xe1   :  { %737 = vmatpush.xpose.msrb.mxu1 %v331_v26  ;;  %777 = vmatpush.xpose.msrb.mxu3 %v333_v27  ;;  %v812_v26 = vld [vmem:[%s1003_s3 + $0x48] sm:$0xff]  ;;  %v811_v27 = vld [vmem:[%s1003_s3 + $0x40] sm:$0xff] }
  0xe4   :  { %718 = vmatpush.xpose.msrb.mxu0 %v314_v28  ;;  %758 = vmatpush.xpose.msrb.mxu2 %v316_v29  ;;  %v810_v28 = vld [vmem:[%s1003_s3 + $0x38] sm:$0xff]  ;;  %v809_v29 = vld [vmem:[%s1003_s3 + $0x30] sm:$0xff] }
  0xe5   :  { %738 = vmatpush.xpose.msrb.mxu1 %v315_v32  ;;  %778 = vmatpush.xpose.msrb.mxu3 %v317_v33  ;;  %v509_v32 = vadd.f32 %v508_v30, %v488_v31  ;;  %v528_v33 = vpop.f32.mrf.mxu2 }
  0xe8   :  { %719 = vmatpush.xpose.msrb.mxu0 %v298_v34  ;;  %759 = vmatpush.xpose.msrb.mxu2 %v300_v35  ;;  %v529_v34 = vadd.f32 %v528_v33, %v509_v32  ;;  %v548_v35 = vpop.f32.mrf.mxu3 }
  0xe9   :  { %739 = vmatpush.xpose.msrb.mxu1 %v299_v38  ;;  %779 = vmatpush.xpose.msrb.mxu3 %v301_v39  ;;  %v885_v38 = vmov 0.0  }
  0xea   :  { %v549_v37 = vadd.f32 %v548_v35, %v529_v34  ;;  %40 = vst [vmem:[#allocation2] sm:$0x3] %v885_v38 }
  0xec   :  { %720 = vmatpush.xpose.msrb.mxu0 %v282_v40  ;;  %760 = vmatpush.xpose.msrb.mxu2 %v284_v41  ;;  %v807_v40 = vld [vmem:[%s1003_s3 + $0x20] sm:$0xff] }
  0xed   :  { %740 = vmatpush.xpose.msrb.mxu1 %v283_v44  ;;  %780 = vmatpush.xpose.msrb.mxu3 %v285_v45 }
  0xf0   :  { %721 = vmatpush.xpose.msrb.mxu0 %v266_v46  ;;  %761 = vmatpush.xpose.msrb.mxu2 %v268_v47  ;;  %v805_v46 = vld [vmem:[%s1003_s3 + $0x10] sm:$0xff] }
  0xf1   :  { %741 = vmatpush.xpose.msrb.mxu1 %v267_v50  ;;  %781 = vmatpush.xpose.msrb.mxu3 %v269_v51  ;;  %v41_v2 = vld [vmem:[#allocation2] sm:$0x3] }
  0xf4   :  { %722 = vmatpush.xpose.msrb.mxu0 %v250_v52  ;;  %762 = vmatpush.xpose.msrb.mxu2 %v252_v53  ;;  %v803_v52 = vld [vmem:[%s1003_s3] sm:$0xff] }
  0xf5   :  { %742 = vmatpush.xpose.msrb.mxu1 %v251_v56  ;;  %782 = vmatpush.xpose.msrb.mxu3 %v253_v57 }
  0xf8   :  { %723 = vmatpush.xpose.msrb.mxu0 %v234_v58  ;;  %763 = vmatpush.xpose.msrb.mxu2 %v236_v59 }
  0xf9   :  { %743 = vmatpush.xpose.msrb.mxu1 %v235_v62  ;;  %783 = vmatpush.xpose.msrb.mxu3 %v237_v63 }
  0xfc   :  { %724 = vmatpush.xpose.msrb.mxu0 %v218_v0  ;;  %764 = vmatpush.xpose.msrb.mxu2 %v220_v1 }
  0xfd   :  { %744 = vmatpush.xpose.msrb.mxu1 %v219_v4  ;;  %784 = vmatpush.xpose.msrb.mxu3 %v221_v5 }
 0x100   :  { %725 = vmatpush.xpose.msrb.mxu0 %v202_v6  ;;  %765 = vmatpush.xpose.msrb.mxu2 %v204_v7  ;;  %v854_v6 = vld [vmem:[%s1002_s2] ss:$0 sm:$0xff] }
 0x101   :  { %745 = vmatpush.xpose.msrb.mxu1 %v203_v10  ;;  %785 = vmatpush.xpose.msrb.mxu3 %v205_v11  ;;  %v855_v10 = vld [vmem:[%s1004_s4] ss:$0 sm:$0xff] }
 0x104   :  { %726 = vmatpush.xpose.msrb.mxu0 %v186_v12  ;;  %766 = vmatpush.xpose.msrb.mxu2 %v188_v13  ;;  %v568_v39 = vpop.f32.mrf.mxu0 }
 0x105   :  { %746 = vmatpush.xpose.msrb.mxu1 %v187_v14  ;;  %786 = vmatpush.xpose.msrb.mxu3 %v189_v15  ;;  %v569_v41 = vadd.f32 %v568_v39, %v549_v37 }
 0x107   :  { %727 = vmatmul.f32.vlgmr.msrb.gmra.mxu0 %v451_v16  ;;  %767 = vmatmul.f32.vlgmr.msrb.gmra.mxu2 %v453_v17  ;;  %v588_v42 = vpop.f32.mrf.mxu1 }
 0x108   :  { %747 = vmatmul.f32.vlgmr.msrb.gmra.mxu1 %v452_v18  ;;  %787 = vmatmul.f32.vlgmr.msrb.gmra.mxu3 %v454_v19  ;;  %v589_v44 = vadd.f32 %v588_v42, %v569_v41 }
 0x109   :  { %823 = vmatpush.xpose.msra.mxu0 %v818_v20 }
 0x10a   :  { %v608_v45 = vpop.f32.mrf.mxu2 }
 0x10b   :  { %v609_v47 = vadd.f32 %v608_v45, %v589_v44 }
 0x10d   :  { %824 = vmatpush.xpose.msra.mxu0 %v817_v21  ;;  %v628_v49 = vpop.f32.mrf.mxu3 }
 0x10e   :  { %v629_v51 = vadd.f32 %v628_v49, %v609_v47 }
 0x111   :  { %825 = vmatpush.xpose.msra.mxu0 %v816_v22 }
 0x115   :  { %826 = vmatpush.xpose.msra.mxu0 %v815_v23 }
 0x119   :  { %827 = vmatpush.xpose.msra.mxu0 %v814_v24 }
 0x11d   :  { %828 = vmatpush.xpose.msra.mxu0 %v813_v25 }
 0x121   :  { %829 = vmatpush.xpose.msra.mxu0 %v812_v26 }
 0x125   :  { %830 = vmatpush.xpose.msra.mxu0 %v811_v27 }
 0x129   :  { %831 = vmatpush.xpose.msra.mxu0 %v810_v28 }
 0x12d   :  { %832 = vmatpush.xpose.msra.mxu0 %v809_v29 }
 0x131   :  { %833 = vmatpush.xpose.msra.mxu0 %v808_v36 }
 0x135   :  { %834 = vmatpush.xpose.msra.mxu0 %v807_v40 }
 0x139   :  { %835 = vmatpush.xpose.msra.mxu0 %v806_v43 }
 0x13d   :  { %836 = vmatpush.xpose.msra.mxu0 %v805_v46 }
 0x141   :  { %837 = vmatpush.xpose.msra.mxu0 %v804_v48 }
 0x144   :  { %v648_v50 = vpop.f32.mrf.mxu0 }
 0x145   :  { %v649_v53 = vadd.f32 %v648_v50, %v629_v51  ;;  %838 = vmatpush.xpose.msra.mxu0 %v803_v52 }
 0x147   :  { %v668_v54 = vpop.f32.mrf.mxu1 }
 0x148   :  { %v669_v56 = vadd.f32 %v668_v54, %v649_v53 }
 0x14a   :  { %v688_v55 = vpop.f32.mrf.mxu2 }
 0x14b   :  { %v689_v57 = vadd.f32 %v688_v55, %v669_v56 }
 0x14d   :  { %v708_v58 = vpop.f32.mrf.mxu3 }
 0x14e   :  { %v709_v59 = vadd.f32 %v708_v58, %v689_v57 }
 0x184   :  { %v728_v60 = vpop.f32.mrf.mxu0 }
 0x185   :  { %v729_v61 = vadd.f32 %v728_v60, %v709_v59  ;;  %v748_v62 = vpop.f32.mrf.mxu1 }
 0x187   :  { %v749_v63 = vadd.f32 %v748_v62, %v729_v61 }
 0x18a   :  { %v768_v0 = vpop.f32.mrf.mxu2 }
 0x18b   :  { %v769_v1 = vadd.f32 %v768_v0, %v749_v63  ;;  %v788_v3 = vpop.f32.mrf.mxu3 }
 0x18d   :  { %v789_v4 = vadd.f32 %v788_v3, %v769_v1 }
 0x18f   :  { %v791_v5 = vadd.f32 %v789_v4, %v41_v2 }
 0x191   :  { %792 = vst [vmem:[#allocation2] sm:$0x3] %v791_v5 }
 0x198   :  { %v796_v7 = vld [vmem:[#allocation2] sm:$0x3] }
 0x199   :  { %v801_v8 = vadd.f32 %v854_v6, %v796_v7 }
 0x19b   :  { %v802_v9 = vmax.f32 %v801_v8, 0.0 }
 0x19d   :  { %839 = vmatmul.f32.vlgmr.msra.gmra.mxu0 %v802_v9 }
 0x21a   :  { %v840_v11 = vpop.f32.mrf.mxu0 }
 0x21b   :  { %v841_v12 = vadd.f32 %v855_v10, %v840_v11 }
 0x21d   :  { %v843_v13 = vmax.f32 %v841_v12, 0.0 }
 0x21f   :  { %844 = vst [vmem:[%s1005_s5] sm:$0x3] %v843_v13 }
 0x220   :  { %849 = vsyncpa [#allocation4], 1 }

// kernel: transformer_forward.5
= control target key start
LH: loop header
LB: loop body
LE: loop exit
PB: predicated region body
PF: predicated region fallthrough
CT: control target
= control target key end

     0   :  { %9 = vsyncpa [#allocation3], 0  ;;  %s1687_s18 = smov [#allocation2]   ;;  %s1688_s20 = smov 64   ;;  %s1791_s0 = inlined_call_operand.vmem [shape: f32[2,128], index: 0, kind: input, shape index: {}]   ;;  %s1792_s1 = inlined_call_operand.hbm [shape: bf16[2048,128], index: 1, kind: input, shape index: {}]   ;;  %s1793_s2 = inlined_call_operand.vmem [shape: f32[1,2048], index: 2, kind: input, shape index: {}]   ;;  %s1794_s3 = inlined_call_operand.vmem [shape: f32[2,2048], index: 3, kind: input, shape index: {}]   ;;  %s1795_s4 = inlined_call_operand.vmem [shape: f32[2,2048], index: 4, kind: output, shape index: {}]  }
   0x1   :  { %s16_s17 = sshll.u32 %s1792_s1, 4  ;;  %s18_s19 = sshll.u32 %s1687_s18, 4  ;;  %s17_s17 = int_to_ptr.hbm [resolvable:$true] %s16_s17  ;;  %s19_s19 = int_to_ptr.vmem [resolvable:$true] %s18_s19 }
   0x2   :  { %s1689_s21 = smov 4  }
   0x3   :  { %24 = dma.hbm_to_vmem [thread:$0]  %s17_s17, 16384, %s19_s19, [#allocation3], %s1688_s20, %s1688_s20, %s1689_s21  }
   0x4   :  { %1685 = dma.done.wait [#allocation3], 16384  }
   0x5   :  { %1686 = vsyncadd [#allocation3], 4294950912  ;;  %v1553_v0 = vld [vmem:[#allocation2 + $0xb8] sm:$0xff]   ;;  %v1552_v10 = vld [vmem:[#allocation2 + $0xb0] sm:$0xff]   ;;  %vm991_vm0 = vcmask 1041408   ;;  %vm993_vm1 = vcmask 1045508  }
   0x6   :  { %v1561_v1 = vld [vmem:[#allocation2 + $0xf8] sm:$0xff]   ;;  %v1114_v3 = vunpack.c.h.bf16 %v1553_v0  ;;  %v1113_v8 = vunpack.c.l.bf16 %v1553_v0  ;;  %v1560_v11 = vld [vmem:[#allocation2 + $0xf0] sm:$0xff]   ;;  %v1110_v16 = vunpack.c.h.bf16 %v1552_v10  ;;  %v1109_v20 = vunpack.c.l.bf16 %v1552_v10  ;;  %v1551_v22 = vld [vmem:[#allocation2 + $0xa8] sm:$0xff]  }
   0x7   :  { %v1545_v2 = vld [vmem:[#allocation2 + $0x78] sm:$0xff]   ;;  %v1146_v4 = vunpack.c.h.bf16 %v1561_v1  ;;  %v1145_v9 = vunpack.c.l.bf16 %v1561_v1  ;;  %v1544_v14 = vld [vmem:[#allocation2 + $0x70] sm:$0xff]   ;;  %v1142_v17 = vunpack.c.h.bf16 %v1560_v11  ;;  %v1141_v21 = vunpack.c.l.bf16 %v1560_v11  ;;  %v1559_v23 = vld [vmem:[#allocation2 + $0xe8] sm:$0xff]  }
   0x8   :  { %v1537_v5 = vld [vmem:[#allocation2 + $0x38] sm:$0xff]   ;;  %v1082_v6 = vunpack.c.h.bf16 %v1545_v2  ;;  %622 = vmatpush.xpose.msra.mxu2 %v1114_v3  ;;  %v1081_v12 = vunpack.c.l.bf16 %v1545_v2  ;;  %v1536_v15 = vld [vmem:[#allocation2 + $0x30] sm:$0xff]   ;;  %v1078_v18 = vunpack.c.h.bf16 %v1544_v14  ;;  %v1077_v24 = vunpack.c.l.bf16 %v1544_v14  ;;  %v1543_v26 = vld [vmem:[#allocation2 + $0x68] sm:$0xff]  }
   0x9   :  { %v1050_v7 = vunpack.c.h.bf16 %v1537_v5  ;;  %642 = vmatpush.xpose.msra.mxu3 %v1146_v4  ;;  %v1049_v13 = vunpack.c.l.bf16 %v1537_v5  ;;  %v1046_v19 = vunpack.c.h.bf16 %v1536_v15  ;;  %v1045_v25 = vunpack.c.l.bf16 %v1536_v15  ;;  %v1535_v27 = vld [vmem:[#allocation2 + $0x28] sm:$0xff]   ;;  %v1550_v34 = vld [vmem:[#allocation2 + $0xa0] sm:$0xff]   ;;  %v1549_v46 = vld [vmem:[#allocation2 + $0x98] sm:$0xff]  }
   0xa   :  { %602 = vmatpush.xpose.msra.mxu1 %v1082_v6  ;;  %v1106_v28 = vunpack.c.h.bf16 %v1551_v22  ;;  %v1138_v29 = vunpack.c.h.bf16 %v1559_v23  ;;  %v1074_v30 = vunpack.c.h.bf16 %v1543_v26  ;;  %v1042_v31 = vunpack.c.h.bf16 %v1535_v27  ;;  %v1558_v35 = vld [vmem:[#allocation2 + $0xe0] sm:$0xff]   ;;  %v1557_v47 = vld [vmem:[#allocation2 + $0xd8] sm:$0xff]   ;;  %v1548_v58 = vld [vmem:[#allocation2 + $0x90] sm:$0xff]  }
   0xb   :  { %582 = vmatpush.xpose.msra.mxu0 %v1050_v7  ;;  %v1105_v32 = vunpack.c.l.bf16 %v1551_v22  ;;  %v1137_v33 = vunpack.c.l.bf16 %v1559_v23  ;;  %v1073_v36 = vunpack.c.l.bf16 %v1543_v26  ;;  %v1041_v37 = vunpack.c.l.bf16 %v1535_v27  ;;  %v1542_v38 = vld [vmem:[#allocation2 + $0x60] sm:$0xff]   ;;  %v1541_v50 = vld [vmem:[#allocation2 + $0x58] sm:$0xff]   ;;  %v1556_v59 = vld [vmem:[#allocation2 + $0xd0] sm:$0xff]  }
   0xc   :  { %623 = vmatpush.xpose.msra.mxu2 %v1113_v8  ;;  %v1534_v39 = vld [vmem:[#allocation2 + $0x20] sm:$0xff]   ;;  %v1102_v40 = vunpack.c.h.bf16 %v1550_v34  ;;  %v1134_v41 = vunpack.c.h.bf16 %v1558_v35  ;;  %v1070_v42 = vunpack.c.h.bf16 %v1542_v38  ;;  %v1101_v44 = vunpack.c.l.bf16 %v1550_v34  ;;  %v1533_v51 = vld [vmem:[#allocation2 + $0x18] sm:$0xff]   ;;  %v1540_v62 = vld [vmem:[#allocation2 + $0x50] sm:$0xff]  }
   0xd   :  { %643 = vmatpush.xpose.msra.mxu3 %v1145_v9  ;;  %v1038_v43 = vunpack.c.h.bf16 %v1534_v39  ;;  %v1133_v45 = vunpack.c.l.bf16 %v1558_v35  ;;  %v1069_v48 = vunpack.c.l.bf16 %v1542_v38  ;;  %v1037_v49 = vunpack.c.l.bf16 %v1534_v39  ;;  %v1532_v63 = vld [vmem:[#allocation2 + $0x10] sm:$0xff]   ;;  %v1547_v6 = vld [vmem:[#allocation2 + $0x88] sm:$0xff]   ;;  %v1538_v22 = vld [vmem:[#allocation2 + $0x40] sm:$0xff]  }
   0xe   :  { %603 = vmatpush.xpose.msra.mxu1 %v1081_v12  ;;  %v1098_v52 = vunpack.c.h.bf16 %v1549_v46  ;;  %v1130_v53 = vunpack.c.h.bf16 %v1557_v47  ;;  %v1066_v54 = vunpack.c.h.bf16 %v1541_v50  ;;  %v1034_v55 = vunpack.c.h.bf16 %v1533_v51  ;;  %v1555_v7 = vld [vmem:[#allocation2 + $0xc8] sm:$0xff]   ;;  %v1020_v23 = vld [vmem:[#allocation2] sm:$0xff]  }
   0xf   :  { %583 = vmatpush.xpose.msra.mxu0 %v1049_v13  ;;  %v1097_v56 = vunpack.c.l.bf16 %v1549_v46  ;;  %v1129_v57 = vunpack.c.l.bf16 %v1557_v47  ;;  %v1065_v60 = vunpack.c.l.bf16 %v1541_v50  ;;  %v1033_v61 = vunpack.c.l.bf16 %v1533_v51  ;;  %v1539_v10 = vld [vmem:[#allocation2 + $0x48] sm:$0xff]   ;;  %v1576_v46 = vld [vmem:[#allocation2 + $0x170] sm:$0xff]  }
  0x10   :  { %624 = vmatpush.xpose.msra.mxu2 %v1110_v16  ;;  %v1094_v0 = vunpack.c.h.bf16 %v1548_v58  ;;  %v1126_v1 = vunpack.c.h.bf16 %v1556_v59  ;;  %v1062_v2 = vunpack.c.h.bf16 %v1540_v62  ;;  %v1030_v3 = vunpack.c.h.bf16 %v1532_v63  ;;  %v1531_v11 = vld [vmem:[#allocation2 + $0x8] sm:$0xff]   ;;  %v1568_v47 = vld [vmem:[#allocation2 + $0x130] sm:$0xff]  }
  0x11   :  { %644 = vmatpush.xpose.msra.mxu3 %v1142_v17  ;;  %v1093_v4 = vunpack.c.l.bf16 %v1548_v58  ;;  %v1125_v5 = vunpack.c.l.bf16 %v1556_v59  ;;  %v1061_v8 = vunpack.c.l.bf16 %v1540_v62  ;;  %v1029_v9 = vunpack.c.l.bf16 %v1532_v63  ;;  %v1575_v58 = vld [vmem:[#allocation2 + $0x168] sm:$0xff]  }
  0x12   :  { %604 = vmatpush.xpose.msra.mxu1 %v1078_v18  ;;  %v1090_v12 = vunpack.c.h.bf16 %v1547_v6  ;;  %v1122_v13 = vunpack.c.h.bf16 %v1555_v7  ;;  %v1058_v14 = vunpack.c.h.bf16 %v1539_v10  ;;  %v1026_v15 = vunpack.c.h.bf16 %v1531_v11  ;;  %v1546_v18 = vld [vmem:[#allocation2 + $0x80] sm:$0xff]   ;;  %v1567_v59 = vld [vmem:[#allocation2 + $0x128] sm:$0xff]  }
  0x13   :  { %584 = vmatpush.xpose.msra.mxu0 %v1046_v19  ;;  %v1089_v16 = vunpack.c.l.bf16 %v1547_v6  ;;  %v1121_v17 = vunpack.c.l.bf16 %v1555_v7  ;;  %v1554_v19 = vld [vmem:[#allocation2 + $0xc0] sm:$0xff]   ;;  %v1054_v26 = vunpack.c.h.bf16 %v1538_v22  ;;  %v1022_v27 = vunpack.c.h.bf16 %v1020_v23 }
  0x14   :  { %625 = vmatpush.xpose.msra.mxu2 %v1109_v20  ;;  %v1057_v20 = vunpack.c.l.bf16 %v1539_v10  ;;  %v1206_v50 = vunpack.c.h.bf16 %v1576_v46  ;;  %v1174_v51 = vunpack.c.h.bf16 %v1568_v47  ;;  %v1202_v62 = vunpack.c.h.bf16 %v1575_v58  ;;  %v1574_v6 = vld [vmem:[#allocation2 + $0x160] sm:$0xff]  }
  0x15   :  { %645 = vmatpush.xpose.msra.mxu3 %v1141_v21  ;;  %v1025_v21 = vunpack.c.l.bf16 %v1531_v11  ;;  %v1170_v63 = vunpack.c.h.bf16 %v1567_v59  ;;  %v1566_v7 = vld [vmem:[#allocation2 + $0x120] sm:$0xff]   ;;  %v1198_v10 = vunpack.c.h.bf16 %v1574_v6  ;;  %vm995_vm2 = vcmask 1043456  }
  0x16   :  { %605 = vmatpush.xpose.msra.mxu1 %v1077_v24  ;;  %v1086_v24 = vunpack.c.h.bf16 %v1546_v18  ;;  %v1166_v11 = vunpack.c.h.bf16 %v1566_v7 }
  0x17   :  { %585 = vmatpush.xpose.msra.mxu0 %v1045_v25  ;;  %v1118_v25 = vunpack.c.h.bf16 %v1554_v19 }
  0x18   :  { %626 = vmatpush.xpose.msra.mxu2 %v1106_v28  ;;  %v1585_v28 = vld [vmem:[#allocation2 + $0x1b8] sm:$0xff]  }
  0x19   :  { %646 = vmatpush.xpose.msra.mxu3 %v1138_v29  ;;  %v1593_v29 = vld [vmem:[#allocation2 + $0x1f8] sm:$0xff]   ;;  %v1242_v34 = vunpack.c.h.bf16 %v1585_v28 }
  0x1a   :  { %606 = vmatpush.xpose.msra.mxu1 %v1074_v30  ;;  %v1085_v30 = vunpack.c.l.bf16 %v1546_v18  ;;  %v1274_v35 = vunpack.c.h.bf16 %v1593_v29  ;;  %v1573_v18 = vld [vmem:[#allocation2 + $0x158] sm:$0xff]  }
  0x1b   :  { %586 = vmatpush.xpose.msra.mxu0 %v1042_v31  ;;  %v1117_v31 = vunpack.c.l.bf16 %v1554_v19  ;;  %v1565_v19 = vld [vmem:[#allocation2 + $0x118] sm:$0xff]  }
  0x1c   :  { %627 = vmatpush.xpose.msra.mxu2 %v1105_v32  ;;  %v1577_v32 = vld [vmem:[#allocation2 + $0x178] sm:$0xff]  }
  0x1d   :  { %647 = vmatpush.xpose.msra.mxu3 %v1137_v33  ;;  %v1569_v33 = vld [vmem:[#allocation2 + $0x138] sm:$0xff]   ;;  %v1210_v38 = vunpack.c.h.bf16 %v1577_v32 }
  0x1e   :  { %607 = vmatpush.xpose.msra.mxu1 %v1073_v36  ;;  %v1053_v36 = vunpack.c.l.bf16 %v1538_v22  ;;  %v1178_v39 = vunpack.c.h.bf16 %v1569_v33  ;;  %v1721_v22 = vld [vmem:[%s1791_s0] sm:$0x3] }
  0x1f   :  { %587 = vmatpush.xpose.msra.mxu0 %v1041_v37  ;;  %v1021_v37 = vunpack.c.l.bf16 %v1020_v23  ;;  %v1194_v23 = vunpack.c.h.bf16 %v1573_v18 }
  0x20   :  { %628 = vmatpush.xpose.msra.mxu2 %v1102_v40  ;;  %v1241_v40 = vunpack.c.l.bf16 %v1585_v28  ;;  %v1588_v28 = vld [vmem:[#allocation2 + $0x1d0] sm:$0xff]  }
  0x21   :  { %648 = vmatpush.xpose.msra.mxu3 %v1134_v41  ;;  %v1273_v41 = vunpack.c.l.bf16 %v1593_v29  ;;  %v1193_v29 = vunpack.c.l.bf16 %v1573_v18 }
  0x22   :  { %608 = vmatpush.xpose.msra.mxu1 %v1070_v42  ;;  %v1584_v42 = vld [vmem:[#allocation2 + $0x1b0] sm:$0xff]  }
  0x23   :  { %588 = vmatpush.xpose.msra.mxu0 %v1038_v43  ;;  %v1592_v43 = vld [vmem:[#allocation2 + $0x1f0] sm:$0xff]  }
  0x24   :  { %629 = vmatpush.xpose.msra.mxu2 %v1101_v44  ;;  %v1209_v44 = vunpack.c.l.bf16 %v1577_v32  ;;  %v1564_v32 = vld [vmem:[#allocation2 + $0x110] sm:$0xff]  }
  0x25   :  { %649 = vmatpush.xpose.msra.mxu3 %v1133_v45  ;;  %v1177_v45 = vunpack.c.l.bf16 %v1569_v33 }
  0x26   :  { %609 = vmatpush.xpose.msra.mxu1 %v1069_v48  ;;  %v1238_v48 = vunpack.c.h.bf16 %v1584_v42 }
  0x27   :  { %589 = vmatpush.xpose.msra.mxu0 %v1037_v49  ;;  %v1270_v49 = vunpack.c.h.bf16 %v1592_v43 }
  0x28   :  { %630 = vmatpush.xpose.msra.mxu2 %v1098_v52  ;;  %v1237_v52 = vunpack.c.l.bf16 %v1584_v42  ;;  %v1157_v42 = vunpack.c.l.bf16 %v1564_v32 }
  0x29   :  { %650 = vmatpush.xpose.msra.mxu3 %v1130_v53  ;;  %v1269_v53 = vunpack.c.l.bf16 %v1592_v43  ;;  %v1571_v43 = vld [vmem:[#allocation2 + $0x148] sm:$0xff]  }
  0x2a   :  { %610 = vmatpush.xpose.msra.mxu1 %v1066_v54  ;;  %v1583_v54 = vld [vmem:[#allocation2 + $0x1a8] sm:$0xff]  }
  0x2b   :  { %590 = vmatpush.xpose.msra.mxu0 %v1034_v55  ;;  %v1591_v55 = vld [vmem:[#allocation2 + $0x1e8] sm:$0xff]  }
  0x2c   :  { %631 = vmatpush.xpose.msra.mxu2 %v1097_v56  ;;  %v1205_v56 = vunpack.c.l.bf16 %v1576_v46 }
  0x2d   :  { %651 = vmatpush.xpose.msra.mxu3 %v1129_v57  ;;  %v1173_v57 = vunpack.c.l.bf16 %v1568_v47  ;;  %v1186_v47 = vunpack.c.h.bf16 %v1571_v43 }
  0x2e   :  { %611 = vmatpush.xpose.msra.mxu1 %v1065_v60  ;;  %v1234_v60 = vunpack.c.h.bf16 %v1583_v54 }
  0x2f   :  { %591 = vmatpush.xpose.msra.mxu0 %v1033_v61  ;;  %v1266_v61 = vunpack.c.h.bf16 %v1591_v55 }
  0x30   :  { %632 = vmatpush.xpose.msra.mxu2 %v1094_v0  ;;  %v1233_v0 = vunpack.c.l.bf16 %v1583_v54 }
  0x31   :  { %652 = vmatpush.xpose.msra.mxu3 %v1126_v1  ;;  %v1265_v1 = vunpack.c.l.bf16 %v1591_v55  ;;  %v1570_v55 = vld [vmem:[#allocation2 + $0x140] sm:$0xff]  }
  0x32   :  { %612 = vmatpush.xpose.msra.mxu1 %v1062_v2  ;;  %v1582_v2 = vld [vmem:[#allocation2 + $0x1a0] sm:$0xff]  }
  0x33   :  { %592 = vmatpush.xpose.msra.mxu0 %v1030_v3  ;;  %v1590_v3 = vld [vmem:[#allocation2 + $0x1e0] sm:$0xff]  }
  0x34   :  { %633 = vmatpush.xpose.msra.mxu2 %v1093_v4  ;;  %v1201_v4 = vunpack.c.l.bf16 %v1575_v58 }
  0x35   :  { %653 = vmatpush.xpose.msra.mxu3 %v1125_v5  ;;  %v1169_v5 = vunpack.c.l.bf16 %v1567_v59  ;;  %v1617_v59 = vld [vmem:[#allocation2 + $0x2b8] sm:$0xff]  }
  0x36   :  { %613 = vmatpush.xpose.msra.mxu1 %v1061_v8  ;;  %v1230_v8 = vunpack.c.h.bf16 %v1582_v2 }
  0x37   :  { %593 = vmatpush.xpose.msra.mxu0 %v1029_v9  ;;  %v1262_v9 = vunpack.c.h.bf16 %v1590_v3 }
  0x38   :  { %634 = vmatpush.xpose.msra.mxu2 %v1090_v12  ;;  %v1229_v12 = vunpack.c.l.bf16 %v1582_v2  ;;  %v1601_v2 = vld [vmem:[#allocation2 + $0x238] sm:$0xff]  }
  0x39   :  { %654 = vmatpush.xpose.msra.mxu3 %v1122_v13  ;;  %v1261_v13 = vunpack.c.l.bf16 %v1590_v3  ;;  %v1370_v3 = vunpack.c.h.bf16 %v1617_v59 }
  0x3a   :  { %614 = vmatpush.xpose.msra.mxu1 %v1058_v14  ;;  %v1581_v14 = vld [vmem:[#allocation2 + $0x198] sm:$0xff]  }
  0x3b   :  { %594 = vmatpush.xpose.msra.mxu0 %v1026_v15  ;;  %v1589_v15 = vld [vmem:[#allocation2 + $0x1d8] sm:$0xff]  }
  0x3c   :  { %635 = vmatpush.xpose.msra.mxu2 %v1089_v16  ;;  %v1197_v16 = vunpack.c.l.bf16 %v1574_v6 }
  0x3d   :  { %655 = vmatpush.xpose.msra.mxu3 %v1121_v17  ;;  %v1165_v17 = vunpack.c.l.bf16 %v1566_v7 }
  0x3e   :  { %615 = vmatpush.xpose.msra.mxu1 %v1057_v20  ;;  %v1226_v20 = vunpack.c.h.bf16 %v1581_v14 }
  0x3f   :  { %595 = vmatpush.xpose.msra.mxu0 %v1025_v21  ;;  %v1258_v21 = vunpack.c.h.bf16 %v1589_v15 }
  0x40   :  { %636 = vmatpush.xpose.msra.mxu2 %v1086_v24  ;;  %v1162_v24 = vunpack.c.h.bf16 %v1565_v19 }
  0x41   :  { %656 = vmatpush.xpose.msra.mxu3 %v1118_v25  ;;  %v1225_v25 = vunpack.c.l.bf16 %v1581_v14  ;;  %v1305_v14 = vunpack.c.l.bf16 %v1601_v2 }
  0x42   :  { %616 = vmatpush.xpose.msra.mxu1 %v1054_v26  ;;  %v1257_v26 = vunpack.c.l.bf16 %v1589_v15  ;;  %v1608_v15 = vld [vmem:[#allocation2 + $0x270] sm:$0xff]  }
  0x43   :  { %596 = vmatpush.xpose.msra.mxu0 %v1022_v27  ;;  %v1580_v27 = vld [vmem:[#allocation2 + $0x190] sm:$0xff]  }
  0x44   :  { %637 = vmatpush.xpose.msra.mxu2 %v1085_v30  ;;  %v1161_v30 = vunpack.c.l.bf16 %v1565_v19  ;;  %v1222_v33 = vunpack.c.h.bf16 %v1580_v27  ;;  %v1334_v19 = vunpack.c.h.bf16 %v1608_v15 }
  0x45   :  { %657 = vmatpush.xpose.msra.mxu3 %v1117_v31  ;;  %v1572_v31 = vld [vmem:[#allocation2 + $0x150] sm:$0xff]  }
  0x46   :  { %617 = vmatpush.xpose.msra.mxu1 %v1053_v36  ;;  %v1158_v36 = vunpack.c.h.bf16 %v1564_v32 }
  0x47   :  { %597 = vmatpush.xpose.msra.mxu0 %v1021_v37  ;;  %638 = vmatmul.f32.vlgmr.msra.gmra.mxu2 %v1721_v22  ;;  %v1221_v37 = vunpack.c.l.bf16 %v1580_v27 }
  0x48   :  { %702 = vmatpush.xpose.msrb.mxu2 %v1242_v34  ;;  %658 = vmatmul.f32.vlgmr.msra.gmra.mxu3 %v1721_v22  ;;  %v1254_v34 = vunpack.c.h.bf16 %v1588_v28 }
  0x49   :  { %722 = vmatpush.xpose.msrb.mxu3 %v1274_v35  ;;  %618 = vmatmul.f32.vlgmr.msra.gmra.mxu1 %v1721_v22  ;;  %v1190_v35 = vunpack.c.h.bf16 %v1572_v31 }
  0x4a   :  { %682 = vmatpush.xpose.msrb.mxu1 %v1210_v38  ;;  %598 = vmatmul.f32.vlgmr.msra.gmra.mxu0 %v1721_v22  ;;  %v1253_v38 = vunpack.c.l.bf16 %v1588_v28  ;;  %v1607_v28 = vld [vmem:[#allocation2 + $0x268] sm:$0xff]  }
  0x4b   :  { %662 = vmatpush.xpose.msrb.mxu0 %v1178_v39  ;;  %v1579_v39 = vld [vmem:[#allocation2 + $0x188] sm:$0xff]   ;;  %v1330_v32 = vunpack.c.h.bf16 %v1607_v28 }
  0x4c   :  { %703 = vmatpush.xpose.msrb.mxu2 %v1241_v40  ;;  %v1587_v40 = vld [vmem:[#allocation2 + $0x1c8] sm:$0xff]  }
  0x4d   :  { %723 = vmatpush.xpose.msrb.mxu3 %v1273_v41  ;;  %v1189_v41 = vunpack.c.l.bf16 %v1572_v31  ;;  %v1250_v46 = vunpack.c.h.bf16 %v1587_v40 }
  0x4e   :  { %683 = vmatpush.xpose.msrb.mxu1 %v1209_v44  ;;  %v1563_v44 = vld [vmem:[#allocation2 + $0x108] sm:$0xff]  }
  0x4f   :  { %663 = vmatpush.xpose.msrb.mxu0 %v1177_v45  ;;  %v1218_v45 = vunpack.c.h.bf16 %v1579_v39  ;;  %v1153_v54 = vunpack.c.l.bf16 %v1563_v44 }
  0x50   :  { %704 = vmatpush.xpose.msrb.mxu2 %v1238_v48  ;;  %v1154_v48 = vunpack.c.h.bf16 %v1563_v44 }
  0x51   :  { %724 = vmatpush.xpose.msrb.mxu3 %v1270_v49  ;;  %v1217_v49 = vunpack.c.l.bf16 %v1579_v39 }
  0x52   :  { %684 = vmatpush.xpose.msrb.mxu1 %v1206_v50  ;;  %v1249_v50 = vunpack.c.l.bf16 %v1587_v40  ;;  %v1606_v40 = vld [vmem:[#allocation2 + $0x260] sm:$0xff]  }
  0x53   :  { %664 = vmatpush.xpose.msrb.mxu0 %v1174_v51  ;;  %v1578_v51 = vld [vmem:[#allocation2 + $0x180] sm:$0xff]   ;;  %v1326_v44 = vunpack.c.h.bf16 %v1606_v40 }
  0x54   :  { %705 = vmatpush.xpose.msrb.mxu2 %v1237_v52  ;;  %v1586_v52 = vld [vmem:[#allocation2 + $0x1c0] sm:$0xff]  }
  0x55   :  { %725 = vmatpush.xpose.msrb.mxu3 %v1269_v53  ;;  %v1185_v53 = vunpack.c.l.bf16 %v1571_v43  ;;  %v1246_v58 = vunpack.c.h.bf16 %v1586_v52 }
  0x56   :  { %685 = vmatpush.xpose.msrb.mxu1 %v1205_v56  ;;  %v1562_v56 = vld [vmem:[#allocation2 + $0x100] sm:$0xff]  }
  0x57   :  { %665 = vmatpush.xpose.msrb.mxu0 %v1173_v57  ;;  %v1214_v57 = vunpack.c.h.bf16 %v1578_v51  ;;  %v1149_v6 = vunpack.c.l.bf16 %v1562_v56 }
  0x58   :  { %706 = vmatpush.xpose.msrb.mxu2 %v1234_v60  ;;  %v1625_v60 = vld [vmem:[#allocation2 + $0x2f8] sm:$0xff]  }
  0x59   :  { %726 = vmatpush.xpose.msrb.mxu3 %v1266_v61  ;;  %v1182_v61 = vunpack.c.h.bf16 %v1570_v55 }
  0x5a   :  { %686 = vmatpush.xpose.msrb.mxu1 %v1202_v62  ;;  %v1150_v62 = vunpack.c.h.bf16 %v1562_v56 }
  0x5b   :  { %666 = vmatpush.xpose.msrb.mxu0 %v1170_v63  ;;  %v1213_v63 = vunpack.c.l.bf16 %v1578_v51 }
  0x5c   :  { %707 = vmatpush.xpose.msrb.mxu2 %v1233_v0  ;;  %v1245_v0 = vunpack.c.l.bf16 %v1586_v52  ;;  %v1605_v52 = vld [vmem:[#allocation2 + $0x258] sm:$0xff]  }
  0x5d   :  { %727 = vmatpush.xpose.msrb.mxu3 %v1265_v1  ;;  %v1609_v1 = vld [vmem:[#allocation2 + $0x278] sm:$0xff]   ;;  %v1322_v56 = vunpack.c.h.bf16 %v1605_v52 }
  0x5e   :  { %687 = vmatpush.xpose.msrb.mxu1 %v1201_v4  ;;  %v1402_v4 = vunpack.c.h.bf16 %v1625_v60  ;;  %v1338_v7 = vunpack.c.h.bf16 %v1609_v1 }
  0x5f   :  { %667 = vmatpush.xpose.msrb.mxu0 %v1169_v5  ;;  %v1181_v5 = vunpack.c.l.bf16 %v1570_v55 }
  0x60   :  { %708 = vmatpush.xpose.msrb.mxu2 %v1230_v8  ;;  %v1306_v8 = vunpack.c.h.bf16 %v1601_v2 }
  0x61   :  { %728 = vmatpush.xpose.msrb.mxu3 %v1262_v9  ;;  %v1369_v9 = vunpack.c.l.bf16 %v1617_v59 }
  0x62   :  { %688 = vmatpush.xpose.msrb.mxu1 %v1198_v10  ;;  %v1401_v10 = vunpack.c.l.bf16 %v1625_v60  ;;  %v1612_v60 = vld [vmem:[#allocation2 + $0x290] sm:$0xff]  }
  0x63   :  { %668 = vmatpush.xpose.msrb.mxu0 %v1166_v11  ;;  %v1616_v11 = vld [vmem:[#allocation2 + $0x2b0] sm:$0xff]   ;;  %v1350_v2 = vunpack.c.h.bf16 %v1612_v60 }
  0x64   :  { %709 = vmatpush.xpose.msrb.mxu2 %v1229_v12  ;;  %v1624_v12 = vld [vmem:[#allocation2 + $0x2f0] sm:$0xff]  }
  0x65   :  { %729 = vmatpush.xpose.msrb.mxu3 %v1261_v13  ;;  %v1337_v13 = vunpack.c.l.bf16 %v1609_v1  ;;  %v1398_v18 = vunpack.c.h.bf16 %v1624_v12  ;;  %v1596_v1 = vld [vmem:[#allocation2 + $0x210] sm:$0xff]  }
  0x66   :  { %689 = vmatpush.xpose.msrb.mxu1 %v1197_v16  ;;  %v1600_v16 = vld [vmem:[#allocation2 + $0x230] sm:$0xff]  }
  0x67   :  { %669 = vmatpush.xpose.msrb.mxu0 %v1165_v17  ;;  %v1366_v17 = vunpack.c.h.bf16 %v1616_v11  ;;  %v1301_v27 = vunpack.c.l.bf16 %v1600_v16 }
  0x68   :  { %710 = vmatpush.xpose.msrb.mxu2 %v1226_v20  ;;  %v1302_v20 = vunpack.c.h.bf16 %v1600_v16 }
  0x69   :  { %730 = vmatpush.xpose.msrb.mxu3 %v1258_v21  ;;  %v1365_v21 = vunpack.c.l.bf16 %v1616_v11  ;;  %v1285_v11 = vunpack.c.l.bf16 %v1596_v1 }
  0x6a   :  { %690 = vmatpush.xpose.msrb.mxu1 %v1194_v23  ;;  %v1397_v23 = vunpack.c.l.bf16 %v1624_v12  ;;  %v1603_v12 = vld [vmem:[#allocation2 + $0x248] sm:$0xff]  }
  0x6b   :  { %670 = vmatpush.xpose.msrb.mxu0 %v1162_v24  ;;  %v1615_v24 = vld [vmem:[#allocation2 + $0x2a8] sm:$0xff]   ;;  %v1314_v16 = vunpack.c.h.bf16 %v1603_v12 }
  0x6c   :  { %711 = vmatpush.xpose.msrb.mxu2 %v1225_v25  ;;  %v1623_v25 = vld [vmem:[#allocation2 + $0x2e8] sm:$0xff]  }
  0x6d   :  { %731 = vmatpush.xpose.msrb.mxu3 %v1257_v26  ;;  %v1333_v26 = vunpack.c.l.bf16 %v1608_v15  ;;  %v1394_v31 = vunpack.c.h.bf16 %v1623_v25 }
  0x6e   :  { %691 = vmatpush.xpose.msrb.mxu1 %v1193_v29  ;;  %v1599_v29 = vld [vmem:[#allocation2 + $0x228] sm:$0xff]  }
  0x6f   :  { %671 = vmatpush.xpose.msrb.mxu0 %v1161_v30  ;;  %v1362_v30 = vunpack.c.h.bf16 %v1615_v24  ;;  %v1297_v39 = vunpack.c.l.bf16 %v1599_v29 }
  0x70   :  { %712 = vmatpush.xpose.msrb.mxu2 %v1222_v33  ;;  %v1298_v33 = vunpack.c.h.bf16 %v1599_v29  ;;  %v1649_v29 = vld [vmem:[#allocation2 + $0x3b8] sm:$0xff]  }
  0x71   :  { %732 = vmatpush.xpose.msrb.mxu3 %v1254_v34  ;;  %v1361_v34 = vunpack.c.l.bf16 %v1615_v24 }
  0x72   :  { %692 = vmatpush.xpose.msrb.mxu1 %v1190_v35  ;;  %v1393_v35 = vunpack.c.l.bf16 %v1623_v25  ;;  %v1602_v25 = vld [vmem:[#allocation2 + $0x240] sm:$0xff]  }
  0x73   :  { %672 = vmatpush.xpose.msrb.mxu0 %v1158_v36  ;;  %v1614_v36 = vld [vmem:[#allocation2 + $0x2a0] sm:$0xff]  }
  0x74   :  { %713 = vmatpush.xpose.msrb.mxu2 %v1221_v37  ;;  %v1622_v37 = vld [vmem:[#allocation2 + $0x2e0] sm:$0xff]  }
  0x75   :  { %733 = vmatpush.xpose.msrb.mxu3 %v1253_v38  ;;  %v1329_v38 = vunpack.c.l.bf16 %v1607_v28  ;;  %v1390_v43 = vunpack.c.h.bf16 %v1622_v37 }
  0x76   :  { %693 = vmatpush.xpose.msrb.mxu1 %v1189_v41  ;;  %v1598_v41 = vld [vmem:[#allocation2 + $0x220] sm:$0xff]  }
  0x77   :  { %673 = vmatpush.xpose.msrb.mxu0 %v1157_v42  ;;  %v1358_v42 = vunpack.c.h.bf16 %v1614_v36  ;;  %v1293_v51 = vunpack.c.l.bf16 %v1598_v41 }
  0x78   :  { %714 = vmatpush.xpose.msrb.mxu2 %v1218_v45  ;;  %v1294_v45 = vunpack.c.h.bf16 %v1598_v41 }
  0x79   :  { %734 = vmatpush.xpose.msrb.mxu3 %v1250_v46  ;;  %v1357_v46 = vunpack.c.l.bf16 %v1614_v36  ;;  %v1633_v36 = vld [vmem:[#allocation2 + $0x338] sm:$0xff]  }
  0x7a   :  { %694 = vmatpush.xpose.msrb.mxu1 %v1186_v47  ;;  %v1389_v47 = vunpack.c.l.bf16 %v1622_v37  ;;  %v1498_v37 = vunpack.c.h.bf16 %v1649_v29 }
  0x7b   :  { %674 = vmatpush.xpose.msrb.mxu0 %v1154_v48  ;;  %v1613_v48 = vld [vmem:[#allocation2 + $0x298] sm:$0xff]  }
  0x7c   :  { %715 = vmatpush.xpose.msrb.mxu2 %v1217_v49  ;;  %v1621_v49 = vld [vmem:[#allocation2 + $0x2d8] sm:$0xff]  }
  0x7d   :  { %735 = vmatpush.xpose.msrb.mxu3 %v1249_v50  ;;  %v1325_v50 = vunpack.c.l.bf16 %v1606_v40  ;;  %v1386_v55 = vunpack.c.h.bf16 %v1621_v49  ;;  %v1385_v59 = vunpack.c.l.bf16 %v1621_v49  ;;  %v1640_v49 = vld [vmem:[#allocation2 + $0x370] sm:$0xff]  }
  0x7e   :  { %695 = vmatpush.xpose.msrb.mxu1 %v1185_v53  ;;  %v1597_v53 = vld [vmem:[#allocation2 + $0x218] sm:$0xff]  }
  0x7f   :  { %675 = vmatpush.xpose.msrb.mxu0 %v1153_v54  ;;  %v1354_v54 = vunpack.c.h.bf16 %v1613_v48 }
  0x80   :  { %716 = vmatpush.xpose.msrb.mxu2 %v1214_v57  ;;  %v1290_v57 = vunpack.c.h.bf16 %v1597_v53 }
  0x81   :  { %736 = vmatpush.xpose.msrb.mxu3 %v1246_v58  ;;  %v1353_v58 = vunpack.c.l.bf16 %v1613_v48  ;;  %v1433_v48 = vunpack.c.l.bf16 %v1633_v36 }
  0x82   :  { %696 = vmatpush.xpose.msrb.mxu1 %v1182_v61  ;;  %v1620_v61 = vld [vmem:[#allocation2 + $0x2d0] sm:$0xff]  }
  0x83   :  { %676 = vmatpush.xpose.msrb.mxu0 %v1150_v62  ;;  %v1321_v62 = vunpack.c.l.bf16 %v1605_v52 }
  0x84   :  { %717 = vmatpush.xpose.msrb.mxu2 %v1213_v63  ;;  %v1289_v63 = vunpack.c.l.bf16 %v1597_v53  ;;  %v1462_v53 = vunpack.c.h.bf16 %v1640_v49 }
  0x85   :  { %737 = vmatpush.xpose.msrb.mxu3 %v1245_v0  ;;  %v1604_v0 = vld [vmem:[#allocation2 + $0x250] sm:$0xff]  }
  0x86   :  { %697 = vmatpush.xpose.msrb.mxu1 %v1181_v5  ;;  %v1286_v5 = vunpack.c.h.bf16 %v1596_v1 }
  0x87   :  { %677 = vmatpush.xpose.msrb.mxu0 %v1149_v6  ;;  %718 = vmatmul.f32.vlgmr.msrb.gmra.mxu2 %v1721_v22  ;;  %v1349_v6 = vunpack.c.l.bf16 %v1612_v60 }
  0x88   :  { %782 = vmatpush.xpose.msra.mxu2 %v1370_v3  ;;  %738 = vmatmul.f32.vlgmr.msrb.gmra.mxu3 %v1721_v22  ;;  %v1382_v3 = vunpack.c.h.bf16 %v1620_v61 }
  0x89   :  { %802 = vmatpush.xpose.msra.mxu3 %v1402_v4  ;;  %698 = vmatmul.f32.vlgmr.msrb.gmra.mxu1 %v1721_v22  ;;  %v1318_v4 = vunpack.c.h.bf16 %v1604_v0 }
  0x8a   :  { %762 = vmatpush.xpose.msra.mxu1 %v1338_v7  ;;  %678 = vmatmul.f32.vlgmr.msrb.gmra.mxu0 %v1721_v22  ;;  %v1381_v7 = vunpack.c.l.bf16 %v1620_v61  ;;  %v1639_v61 = vld [vmem:[#allocation2 + $0x368] sm:$0xff]  }
  0x8b   :  { %742 = vmatpush.xpose.msra.mxu0 %v1306_v8  ;;  %v1611_v8 = vld [vmem:[#allocation2 + $0x288] sm:$0xff]   ;;  %v1458_v1 = vunpack.c.h.bf16 %v1639_v61 }
  0x8c   :  { %783 = vmatpush.xpose.msra.mxu2 %v1369_v9  ;;  %v1619_v9 = vld [vmem:[#allocation2 + $0x2c8] sm:$0xff]  }
  0x8d   :  { %803 = vmatpush.xpose.msra.mxu3 %v1401_v10  ;;  %v1317_v10 = vunpack.c.l.bf16 %v1604_v0  ;;  %v1378_v15 = vunpack.c.h.bf16 %v1619_v9 }
  0x8e   :  { %763 = vmatpush.xpose.msra.mxu1 %v1337_v13  ;;  %v1595_v13 = vld [vmem:[#allocation2 + $0x208] sm:$0xff]  }
  0x8f   :  { %743 = vmatpush.xpose.msra.mxu0 %v1305_v14  ;;  %v1346_v14 = vunpack.c.h.bf16 %v1611_v8  ;;  %v1281_v24 = vunpack.c.l.bf16 %v1595_v13 }
  0x90   :  { %784 = vmatpush.xpose.msra.mxu2 %v1366_v17  ;;  %v1282_v17 = vunpack.c.h.bf16 %v1595_v13 }
  0x91   :  { %804 = vmatpush.xpose.msra.mxu3 %v1398_v18  ;;  %v1345_v18 = vunpack.c.l.bf16 %v1611_v8 }
  0x92   :  { %764 = vmatpush.xpose.msra.mxu1 %v1334_v19  ;;  %v1377_v19 = vunpack.c.l.bf16 %v1619_v9  ;;  %v1638_v9 = vld [vmem:[#allocation2 + $0x360] sm:$0xff]  }
  0x93   :  { %744 = vmatpush.xpose.msra.mxu0 %v1302_v20  ;;  %v1610_v20 = vld [vmem:[#allocation2 + $0x280] sm:$0xff]   ;;  %v1454_v13 = vunpack.c.h.bf16 %v1638_v9 }
  0x94   :  { %785 = vmatpush.xpose.msra.mxu2 %v1365_v21  ;;  %v1618_v21 = vld [vmem:[#allocation2 + $0x2c0] sm:$0xff]  }
  0x95   :  { %805 = vmatpush.xpose.msra.mxu3 %v1397_v23  ;;  %v1313_v23 = vunpack.c.l.bf16 %v1603_v12  ;;  %v1374_v28 = vunpack.c.h.bf16 %v1618_v21 }
  0x96   :  { %765 = vmatpush.xpose.msra.mxu1 %v1333_v26  ;;  %v1594_v26 = vld [vmem:[#allocation2 + $0x200] sm:$0xff]  }
  0x97   :  { %745 = vmatpush.xpose.msra.mxu0 %v1301_v27  ;;  %v1342_v27 = vunpack.c.h.bf16 %v1610_v20  ;;  %v1277_v40 = vunpack.c.l.bf16 %v1594_v26 }
  0x98   :  { %786 = vmatpush.xpose.msra.mxu2 %v1362_v30  ;;  %v1657_v30 = vld [vmem:[#allocation2 + $0x3f8] sm:$0xff]  }
  0x99   :  { %806 = vmatpush.xpose.msra.mxu3 %v1394_v31  ;;  %v1310_v31 = vunpack.c.h.bf16 %v1602_v25 }
  0x9a   :  { %766 = vmatpush.xpose.msra.mxu1 %v1330_v32  ;;  %v1278_v32 = vunpack.c.h.bf16 %v1594_v26 }
  0x9b   :  { %746 = vmatpush.xpose.msra.mxu0 %v1298_v33  ;;  %v1341_v33 = vunpack.c.l.bf16 %v1610_v20 }
  0x9c   :  { %787 = vmatpush.xpose.msra.mxu2 %v1361_v34  ;;  %v1373_v34 = vunpack.c.l.bf16 %v1618_v21  ;;  %v1637_v21 = vld [vmem:[#allocation2 + $0x358] sm:$0xff]  }
  0x9d   :  { %807 = vmatpush.xpose.msra.mxu3 %v1393_v35  ;;  %v1641_v35 = vld [vmem:[#allocation2 + $0x378] sm:$0xff]   ;;  %v1450_v26 = vunpack.c.h.bf16 %v1637_v21 }
  0x9e   :  { %767 = vmatpush.xpose.msra.mxu1 %v1329_v38  ;;  %v1530_v38 = vunpack.c.h.bf16 %v1657_v30  ;;  %v1466_v41 = vunpack.c.h.bf16 %v1641_v35 }
  0x9f   :  { %747 = vmatpush.xpose.msra.mxu0 %v1297_v39  ;;  %v1309_v39 = vunpack.c.l.bf16 %v1602_v25 }
  0xa0   :  { %788 = vmatpush.xpose.msra.mxu2 %v1358_v42  ;;  %v1434_v42 = vunpack.c.h.bf16 %v1633_v36 }
  0xa1   :  { %808 = vmatpush.xpose.msra.mxu3 %v1390_v43  ;;  %v1497_v43 = vunpack.c.l.bf16 %v1649_v29 }
  0xa2   :  { %768 = vmatpush.xpose.msra.mxu1 %v1326_v44  ;;  %v1529_v44 = vunpack.c.l.bf16 %v1657_v30  ;;  %v902_v30 = vld [vmem:[%s1794_s3] sm:$0xff] }
  0xa3   :  { %748 = vmatpush.xpose.msra.mxu0 %v1294_v45  ;;  %v1648_v45 = vld [vmem:[#allocation2 + $0x3b0] sm:$0xff]   ;;  %910 = vst [vmem:[#allocation1] ss:$4 sm:$0xff] %v902_v30  ;;  %v1634_v30 = vld [vmem:[#allocation2 + $0x340] sm:$0xff]  }
  0xa4   :  { %789 = vmatpush.xpose.msra.mxu2 %v1357_v46  ;;  %v1656_v46 = vld [vmem:[#allocation2 + $0x3f0] sm:$0xff]  }
  0xa5   :  { %809 = vmatpush.xpose.msra.mxu3 %v1389_v47  ;;  %v1465_v47 = vunpack.c.l.bf16 %v1641_v35  ;;  %v1526_v52 = vunpack.c.h.bf16 %v1656_v46 }
  0xa6   :  { %769 = vmatpush.xpose.msra.mxu1 %v1325_v50  ;;  %v1632_v50 = vld [vmem:[#allocation2 + $0x330] sm:$0xff]  }
  0xa7   :  { %749 = vmatpush.xpose.msra.mxu0 %v1293_v51  ;;  %v1494_v51 = vunpack.c.h.bf16 %v1648_v45  ;;  %v1429_v60 = vunpack.c.l.bf16 %v1632_v50 }
  0xa8   :  { %790 = vmatpush.xpose.msra.mxu2 %v1354_v54  ;;  %v1430_v54 = vunpack.c.h.bf16 %v1632_v50 }
  0xa9   :  { %810 = vmatpush.xpose.msra.mxu3 %v1386_v55  ;;  %v1493_v55 = vunpack.c.l.bf16 %v1648_v45 }
  0xaa   :  { %770 = vmatpush.xpose.msra.mxu1 %v1322_v56  ;;  %v1525_v56 = vunpack.c.l.bf16 %v1656_v46 }
  0xab   :  { %750 = vmatpush.xpose.msra.mxu0 %v1290_v57  ;;  %v1647_v57 = vld [vmem:[#allocation2 + $0x3a8] sm:$0xff]  }
  0xac   :  { %791 = vmatpush.xpose.msra.mxu2 %v1353_v58  ;;  %v1655_v58 = vld [vmem:[#allocation2 + $0x3e8] sm:$0xff]  }
  0xad   :  { %811 = vmatpush.xpose.msra.mxu3 %v1385_v59  ;;  %v1461_v59 = vunpack.c.l.bf16 %v1640_v49  ;;  %v1522_v0 = vunpack.c.h.bf16 %v1655_v58 }
  0xae   :  { %771 = vmatpush.xpose.msra.mxu1 %v1321_v62  ;;  %v1631_v62 = vld [vmem:[#allocation2 + $0x328] sm:$0xff]  }
  0xaf   :  { %751 = vmatpush.xpose.msra.mxu0 %v1289_v63  ;;  %v1490_v63 = vunpack.c.h.bf16 %v1647_v57  ;;  %v1425_v8 = vunpack.c.l.bf16 %v1631_v62 }
  0xb0   :  { %792 = vmatpush.xpose.msra.mxu2 %v1350_v2  ;;  %v1426_v2 = vunpack.c.h.bf16 %v1631_v62 }
  0xb1   :  { %812 = vmatpush.xpose.msra.mxu3 %v1382_v3  ;;  %v1489_v3 = vunpack.c.l.bf16 %v1647_v57  ;;  %v904_v57 = vld [vmem:[%s1794_s3 + $0x10] sm:$0xff] }
  0xb2   :  { %772 = vmatpush.xpose.msra.mxu1 %v1318_v4  ;;  %v1521_v4 = vunpack.c.l.bf16 %v1655_v58 }
  0xb3   :  { %752 = vmatpush.xpose.msra.mxu0 %v1286_v5  ;;  %v1646_v5 = vld [vmem:[#allocation2 + $0x3a0] sm:$0xff]  }
  0xb4   :  { %793 = vmatpush.xpose.msra.mxu2 %v1349_v6  ;;  %v1654_v6 = vld [vmem:[#allocation2 + $0x3e0] sm:$0xff]  }
  0xb5   :  { %813 = vmatpush.xpose.msra.mxu3 %v1381_v7  ;;  %v1457_v7 = vunpack.c.l.bf16 %v1639_v61  ;;  %v1518_v12 = vunpack.c.h.bf16 %v1654_v6  ;;  %v915_v61 = vld.sshfl [vmem:[#allocation1 + $0x10] sm:$0xff pattern:$0x73625140] }
  0xb6   :  { %773 = vmatpush.xpose.msra.mxu1 %v1317_v10  ;;  %v1630_v10 = vld [vmem:[#allocation2 + $0x320] sm:$0xff]  }
  0xb7   :  { %753 = vmatpush.xpose.msra.mxu0 %v1285_v11  ;;  %v1486_v11 = vunpack.c.h.bf16 %v1646_v5  ;;  %v1421_v20 = vunpack.c.l.bf16 %v1630_v10 }
  0xb8   :  { %794 = vmatpush.xpose.msra.mxu2 %v1346_v14  ;;  %v1422_v14 = vunpack.c.h.bf16 %v1630_v10 }
  0xb9   :  { %814 = vmatpush.xpose.msra.mxu3 %v1378_v15  ;;  %v1485_v15 = vunpack.c.l.bf16 %v1646_v5 }
  0xba   :  { %774 = vmatpush.xpose.msra.mxu1 %v1314_v16  ;;  %v1517_v16 = vunpack.c.l.bf16 %v1654_v6  ;;  %v1635_v6 = vld [vmem:[#allocation2 + $0x348] sm:$0xff]  }
  0xbb   :  { %754 = vmatpush.xpose.msra.mxu0 %v1282_v17  ;;  %v1645_v17 = vld [vmem:[#allocation2 + $0x398] sm:$0xff]  }
  0xbc   :  { %795 = vmatpush.xpose.msra.mxu2 %v1345_v18  ;;  %v1653_v18 = vld [vmem:[#allocation2 + $0x3d8] sm:$0xff]  }
  0xbd   :  { %815 = vmatpush.xpose.msra.mxu3 %v1377_v19  ;;  %v1453_v19 = vunpack.c.l.bf16 %v1638_v9  ;;  %v1514_v25 = vunpack.c.h.bf16 %v1653_v18  ;;  %v1513_v29 = vunpack.c.l.bf16 %v1653_v18 }
  0xbe   :  { %775 = vmatpush.xpose.msra.mxu1 %v1313_v23  ;;  %v1629_v23 = vld [vmem:[#allocation2 + $0x318] sm:$0xff]  }
  0xbf   :  { %755 = vmatpush.xpose.msra.mxu0 %v1281_v24  ;;  %v1482_v24 = vunpack.c.h.bf16 %v1645_v17  ;;  %v1417_v35 = vunpack.c.l.bf16 %v1629_v23 }
  0xc0   :  { %796 = vmatpush.xpose.msra.mxu2 %v1342_v27  ;;  %v1418_v27 = vunpack.c.h.bf16 %v1629_v23 }
  0xc1   :  { %816 = vmatpush.xpose.msra.mxu3 %v1374_v28  ;;  %v1481_v28 = vunpack.c.l.bf16 %v1645_v17 }
  0xc2   :  { %776 = vmatpush.xpose.msra.mxu1 %v1310_v31  ;;  %v1644_v31 = vld [vmem:[#allocation2 + $0x390] sm:$0xff]  }
  0xc3   :  { %756 = vmatpush.xpose.msra.mxu0 %v1278_v32  ;;  %v1652_v32 = vld [vmem:[#allocation2 + $0x3d0] sm:$0xff]   ;;  %v1477_v58 = vunpack.c.l.bf16 %v1644_v31 }
  0xc4   :  { %797 = vmatpush.xpose.msra.mxu2 %v1341_v33  ;;  %v1741_v33 = vld [vmem:[%s1793_s2] sm:$0xff]  ;;  %v1510_v45 = vunpack.c.h.bf16 %v1652_v32 }
  0xc5   :  { %817 = vmatpush.xpose.msra.mxu3 %v1373_v34  ;;  %v1449_v34 = vunpack.c.l.bf16 %v1637_v21  ;;  %v551_v36 = vperm.slane %v1741_v33, 1 }
  0xc6   :  { %777 = vmatpush.xpose.msra.mxu1 %v1309_v39  ;;  %v1636_v39 = vld [vmem:[#allocation2 + $0x350] sm:$0xff]  }
  0xc7   :  { %757 = vmatpush.xpose.msra.mxu0 %v1277_v40  ;;  %798 = vmatmul.f32.vlgmr.msra.gmra.mxu2 %v1721_v22  ;;  %v1628_v40 = vld [vmem:[#allocation2 + $0x310] sm:$0xff]   ;;  %v1445_v62 = vunpack.c.l.bf16 %v1636_v39 }
  0xc8   :  { %862 = vmatpush.xpose.msrb.mxu2 %v1498_v37  ;;  %818 = vmatmul.f32.vlgmr.msra.gmra.mxu3 %v1721_v22  ;;  %v619_v37 = vpop.f32.mrf.mxu1 }
  0xc9   :  { %882 = vmatpush.xpose.msrb.mxu3 %v1530_v38  ;;  %778 = vmatmul.f32.vlgmr.msra.gmra.mxu1 %v1721_v22  ;;  %v550_v38 = vperm.slane %v1741_v33, 0  ;;  %v620_v46 = vadd.f32 %v619_v37, %v551_v36 }
  0xca   :  { %842 = vmatpush.xpose.msrb.mxu1 %v1466_v41  ;;  %758 = vmatmul.f32.vlgmr.msra.gmra.mxu0 %v1721_v22  ;;  %v552_v41 = vperm.slane %v1741_v33, 2  ;;  %v639_v49 = vpop.f32.mrf.mxu2 }
  0xcb   :  { %822 = vmatpush.xpose.msrb.mxu0 %v1434_v42  ;;  %v553_v42 = vperm.slane %v1741_v33, 3  ;;  %v659_v50 = vpop.f32.mrf.mxu3 }
  0xcc   :  { %863 = vmatpush.xpose.msrb.mxu2 %v1497_v43  ;;  %v599_v43 = vpop.f32.mrf.mxu0 }
  0xcd   :  { %883 = vmatpush.xpose.msrb.mxu3 %v1529_v44  ;;  %v1478_v44 = vunpack.c.h.bf16 %v1644_v31  ;;  %v1626_v31 = vld [vmem:[#allocation2 + $0x300] sm:$0xff]  }
  0xce   :  { %843 = vmatpush.xpose.msrb.mxu1 %v1465_v47  ;;  %v1446_v47 = vunpack.c.h.bf16 %v1636_v39  ;;  %v1406_v36 = vunpack.c.h.bf16 %v1626_v31  ;;  %v1437_v39 = vunpack.c.l.bf16 %v1634_v30 }
  0xcf   :  { %823 = vmatpush.xpose.msrb.mxu0 %v1433_v48  ;;  %v1414_v48 = vunpack.c.h.bf16 %v1628_v40 }
  0xd0   :  { %864 = vmatpush.xpose.msrb.mxu2 %v1494_v51  ;;  %v600_v51 = vadd.f32 %v599_v43, %v550_v38 }
  0xd1   :  { %884 = vmatpush.xpose.msrb.mxu3 %v1526_v52  ;;  %v903_v52 = vld [vmem:[%s1794_s3 + $0x8] sm:$0xff] }
  0xd2   :  { %844 = vmatpush.xpose.msrb.mxu1 %v1462_v53  ;;  %v1643_v53 = vld [vmem:[#allocation2 + $0x388] sm:$0xff]   ;;  %912 = vst [vmem:[#allocation1 + $0x20] ss:$4 sm:$0xff] %v903_v52 }
  0xd3   :  { %824 = vmatpush.xpose.msrb.mxu0 %v1430_v54  ;;  %v1651_v54 = vld [vmem:[#allocation2 + $0x3c8] sm:$0xff]   ;;  %v1474_v10 = vunpack.c.h.bf16 %v1643_v53  ;;  %v1473_v21 = vunpack.c.l.bf16 %v1643_v53 }
  0xd4   :  { %865 = vmatpush.xpose.msrb.mxu2 %v1493_v55  ;;  %v640_v55 = vadd.f32 %v639_v49, %v552_v41  ;;  %v1505_v23 = vunpack.c.l.bf16 %v1651_v54  ;;  %v555_v41 = vperm.slane %v1741_v33, 5 }
  0xd5   :  { %885 = vmatpush.xpose.msrb.mxu3 %v1525_v56  ;;  %v660_v56 = vadd.f32 %v659_v50, %v553_v42  ;;  %v554_v42 = vperm.slane %v1741_v33, 4 }
  0xd6   :  { %845 = vmatpush.xpose.msrb.mxu1 %v1461_v59  ;;  %v1509_v59 = vunpack.c.l.bf16 %v1652_v32 }
  0xd7   :  { %825 = vmatpush.xpose.msrb.mxu0 %v1429_v60  ;;  %v914_v60 = vld.sshfl [vmem:[#allocation1 + $0x8] sm:$0xff pattern:$0x73625140] }
  0xd8   :  { %866 = vmatpush.xpose.msrb.mxu2 %v1490_v63  ;;  %v948_v63 = vadd.f32 %v914_v60, %v620_v46  ;;  %v556_v46 = vperm.slane %v1741_v33, 6 }
  0xd9   :  { %886 = vmatpush.xpose.msrb.mxu3 %v1522_v0  ;;  %v949_v0 = vadd.f32 %v915_v61, %v640_v55  ;;  %v918_v17 = vld.sshfl [vmem:[#allocation1 + $0x28] sm:$0xff pattern:$0x73625140] }
  0xda   :  { %846 = vmatpush.xpose.msrb.mxu1 %v1458_v1  ;;  %v916_v1 = vld.sshfl [vmem:[#allocation1 + $0x18] sm:$0xff pattern:$0x73625140] }
  0xdb   :  { %826 = vmatpush.xpose.msrb.mxu0 %v1426_v2  ;;  %v913_v2 = vld.sshfl [vmem:[#allocation1] sm:$0xff pattern:$0x73625140]  ;;  %v980_v9 = vrot.slane %v949_v0, 4 }
  0xdc   :  { %867 = vmatpush.xpose.msrb.mxu2 %v1489_v3  ;;  %v1413_v3 = vunpack.c.l.bf16 %v1628_v40  ;;  %921 = vst [vmem:[#allocation1] ss:$4 sm:$0xff] %v904_v57  ;;  %v947_v5 = vadd.f32 %v913_v2, %v600_v51  ;;  %v1405_v40 = vunpack.c.l.bf16 %v1626_v31 }
  0xdd   :  { %887 = vmatpush.xpose.msrb.mxu3 %v1521_v4  ;;  %v950_v4 = vadd.f32 %v916_v1, %v660_v56 }
  0xde   :  { %847 = vmatpush.xpose.msrb.mxu1 %v1457_v7  ;;  %v1627_v7 = vld [vmem:[#allocation2 + $0x308] sm:$0xff]  }
  0xdf   :  { %827 = vmatpush.xpose.msrb.mxu0 %v1425_v8  ;;  %v979_v8 = vrot.slane %v948_v63, 6 }
  0xe0   :  { %868 = vmatpush.xpose.msrb.mxu2 %v1486_v11  ;;  %v1506_v11 = vunpack.c.h.bf16 %v1651_v54 }
  0xe1   :  { %888 = vmatpush.xpose.msrb.mxu3 %v1518_v12  ;;  %v981_v12 = vrot.slane %v950_v4, 2 }
  0xe2   :  { %848 = vmatpush.xpose.msrb.mxu1 %v1454_v13  ;;  %v992_v13 = vsel %vm991_vm0, %v947_v5, %v979_v8 }
  0xe3   :  { %828 = vmatpush.xpose.msrb.mxu0 %v1422_v14  ;;  %v1442_v14 = vunpack.c.h.bf16 %v1635_v6  ;;  %v924_v1 = vld.sshfl [vmem:[#allocation1 + $0x8] sm:$0xff pattern:$0x73625140] }
  0xe4   :  { %869 = vmatpush.xpose.msrb.mxu2 %v1485_v15  ;;  %v1410_v15 = vunpack.c.h.bf16 %v1627_v7 }
  0xe5   :  { %889 = vmatpush.xpose.msrb.mxu3 %v1517_v16  ;;  %v994_v16 = vsel %vm993_vm1, %v980_v9, %v981_v12  ;;  %v926_v12 = vld.sshfl [vmem:[#allocation1 + $0x18] sm:$0xff pattern:$0x73625140] }
  0xe6   :  { %849 = vmatpush.xpose.msrb.mxu1 %v1453_v19  ;;  %v996_v18 = vsel %vm995_vm2, %v992_v13, %v994_v16  ;;  %v919_v19 = vld.sshfl [vmem:[#allocation1 + $0x30] sm:$0xff pattern:$0x73625140] }
  0xe7   :  { %829 = vmatpush.xpose.msrb.mxu0 %v1421_v20  ;;  %v920_v20 = vld.sshfl [vmem:[#allocation1 + $0x38] sm:$0xff pattern:$0x73625140]  ;;  %1010 = vst [vmem:[%s1795_s4] sm:$0xff] %v996_v18 }
  0xe8   :  { %870 = vmatpush.xpose.msrb.mxu2 %v1482_v24  ;;  %v905_v24 = vld [vmem:[%s1794_s3 + $0x18] sm:$0xff] }
  0xe9   :  { %890 = vmatpush.xpose.msrb.mxu3 %v1514_v25  ;;  %v917_v25 = vld.sshfl [vmem:[#allocation1 + $0x20] sm:$0xff pattern:$0x73625140] }
  0xea   :  { %850 = vmatpush.xpose.msrb.mxu1 %v1450_v26  ;;  %v1642_v26 = vld [vmem:[#allocation2 + $0x380] sm:$0xff]   ;;  %922 = vst [vmem:[#allocation1 + $0x20] ss:$4 sm:$0xff] %v905_v24 }
  0xeb   :  { %830 = vmatpush.xpose.msrb.mxu0 %v1418_v27  ;;  %v1650_v27 = vld [vmem:[#allocation2 + $0x3c0] sm:$0xff]   ;;  %v1470_v32 = vunpack.c.h.bf16 %v1642_v26  ;;  %v1469_v37 = vunpack.c.l.bf16 %v1642_v26 }
  0xec   :  { %871 = vmatpush.xpose.msrb.mxu2 %v1481_v28  ;;  %v1441_v28 = vunpack.c.l.bf16 %v1635_v6  ;;  %v1501_v38 = vunpack.c.l.bf16 %v1650_v27 }
  0xed   :  { %891 = vmatpush.xpose.msrb.mxu3 %v1513_v29  ;;  %v1409_v29 = vunpack.c.l.bf16 %v1627_v7  ;;  %v923_v7 = vld.sshfl [vmem:[#allocation1] sm:$0xff pattern:$0x73625140] }
  0xee   :  { %851 = vmatpush.xpose.msrb.mxu1 %v1449_v34  ;;  %v1502_v34 = vunpack.c.h.bf16 %v1650_v27 }
  0xef   :  { %831 = vmatpush.xpose.msrb.mxu0 %v1417_v35  ;;  %v1438_v35 = vunpack.c.h.bf16 %v1634_v30 }
  0xf0   :  { %872 = vmatpush.xpose.msrb.mxu2 %v1478_v44 }
  0xf1   :  { %892 = vmatpush.xpose.msrb.mxu3 %v1510_v45 }
  0xf2   :  { %852 = vmatpush.xpose.msrb.mxu1 %v1446_v47  ;;  %v557_v47 = vperm.slane %v1741_v33, 7  ;;  %v547_v33 = vld [vmem:[%s1793_s2 + $0x8] sm:$0xff] }
  0xf3   :  { %832 = vmatpush.xpose.msrb.mxu0 %v1414_v48  ;;  %v558_v63 = vperm.slane %v547_v33, 0  ;;  %v560_v4 = vperm.slane %v547_v33, 2  ;;  %v561_v5 = vperm.slane %v547_v33, 3  ;;  %v562_v26 = vperm.slane %v547_v33, 4 }
  0xf4   :  { %873 = vmatpush.xpose.msrb.mxu2 %v1477_v58  ;;  %v564_v31 = vperm.slane %v547_v33, 6 }
  0xf5   :  { %893 = vmatpush.xpose.msrb.mxu3 %v1509_v59 }
  0xf6   :  { %853 = vmatpush.xpose.msrb.mxu1 %v1445_v62  ;;  %v559_v62 = vperm.slane %v547_v33, 1 }
  0xf7   :  { %833 = vmatpush.xpose.msrb.mxu0 %v1413_v3 }
  0xf8   :  { %874 = vmatpush.xpose.msrb.mxu2 %v1474_v10  ;;  %v925_v10 = vld.sshfl [vmem:[#allocation1 + $0x10] sm:$0xff pattern:$0x73625140] }
  0xf9   :  { %894 = vmatpush.xpose.msrb.mxu3 %v1506_v11 }
  0xfa   :  { %854 = vmatpush.xpose.msrb.mxu1 %v1442_v14 }
  0xfb   :  { %834 = vmatpush.xpose.msrb.mxu0 %v1410_v15 }
  0xfc   :  { %875 = vmatpush.xpose.msrb.mxu2 %v1473_v21 }
  0xfd   :  { %895 = vmatpush.xpose.msrb.mxu3 %v1505_v23 }
  0xfe   :  { %855 = vmatpush.xpose.msrb.mxu1 %v1441_v28  ;;  %v928_v28 = vld.sshfl [vmem:[#allocation1 + $0x28] sm:$0xff pattern:$0x73625140] }
  0xff   :  { %835 = vmatpush.xpose.msrb.mxu0 %v1409_v29 }
 0x100   :  { %876 = vmatpush.xpose.msrb.mxu2 %v1470_v32  ;;  %v565_v32 = vperm.slane %v547_v33, 7 }
 0x101   :  { %896 = vmatpush.xpose.msrb.mxu3 %v1502_v34 }
 0x102   :  { %856 = vmatpush.xpose.msrb.mxu1 %v1438_v35  ;;  %v927_v35 = vld.sshfl [vmem:[#allocation1 + $0x20] sm:$0xff pattern:$0x73625140] }
 0x103   :  { %836 = vmatpush.xpose.msrb.mxu0 %v1406_v36 }
 0x104   :  { %877 = vmatpush.xpose.msrb.mxu2 %v1469_v37 }
 0x105   :  { %897 = vmatpush.xpose.msrb.mxu3 %v1501_v38  ;;  %v929_v38 = vld.sshfl [vmem:[#allocation1 + $0x30] sm:$0xff pattern:$0x73625140] }
 0x106   :  { %857 = vmatpush.xpose.msrb.mxu1 %v1437_v39  ;;  %v699_v43 = vpop.f32.mrf.mxu1 }
 0x107   :  { %837 = vmatpush.xpose.msrb.mxu0 %v1405_v40  ;;  %878 = vmatmul.f32.vlgmr.msrb.gmra.mxu2 %v1721_v22  ;;  %v679_v44 = vpop.f32.mrf.mxu0  ;;  %v700_v45 = vadd.f32 %v699_v43, %v555_v41  ;;  %v930_v40 = vld.sshfl [vmem:[#allocation1 + $0x38] sm:$0xff pattern:$0x73625140] }
 0x108   :  { %898 = vmatmul.f32.vlgmr.msrb.gmra.mxu3 %v1721_v22  ;;  %v680_v48 = vadd.f32 %v679_v44, %v554_v42 }
 0x109   :  { %858 = vmatmul.f32.vlgmr.msrb.gmra.mxu1 %v1721_v22  ;;  %v952_v49 = vadd.f32 %v918_v17, %v700_v45 }
 0x10a   :  { %838 = vmatmul.f32.vlgmr.msrb.gmra.mxu0 %v1721_v22  ;;  %v719_v50 = vpop.f32.mrf.mxu2  ;;  %v951_v55 = vadd.f32 %v917_v25, %v680_v48  ;;  %v563_v25 = vperm.slane %v547_v33, 5 }
 0x10b   :  { %v739_v51 = vpop.f32.mrf.mxu3  ;;  %v982_v52 = vrot.slane %v952_v49, 6  ;;  %v720_v53 = vadd.f32 %v719_v50, %v556_v46 }
 0x10c   :  { %v740_v54 = vadd.f32 %v739_v51, %v557_v47 }
 0x10d   :  { %v953_v22 = vadd.f32 %v919_v19, %v720_v53  ;;  %v997_v59 = vsel %vm991_vm0, %v951_v55, %v982_v52 }
 0x10e   :  { %v954_v56 = vadd.f32 %v920_v20, %v740_v54 }
 0x10f   :  { %v983_v57 = vrot.slane %v953_v22, 4 }
 0x110   :  { %v984_v58 = vrot.slane %v954_v56, 2 }
 0x112   :  { %v998_v60 = vsel %vm993_vm1, %v983_v57, %v984_v58 }
 0x113   :  { %v999_v61 = vsel %vm995_vm2, %v997_v59, %v998_v60 }
 0x114   :  { %1011 = vst [vmem:[%s1795_s4 + $0x8] sm:$0xff] %v999_v61 }
 0x146   :  { %v779_v0 = vpop.f32.mrf.mxu1 }
 0x147   :  { %v759_v2 = vpop.f32.mrf.mxu0  ;;  %v780_v3 = vadd.f32 %v779_v0, %v559_v62 }
 0x148   :  { %v760_v6 = vadd.f32 %v759_v2, %v558_v63 }
 0x149   :  { %v956_v8 = vadd.f32 %v924_v1, %v780_v3 }
 0x14a   :  { %v799_v9 = vpop.f32.mrf.mxu2  ;;  %v955_v16 = vadd.f32 %v923_v7, %v760_v6 }
 0x14b   :  { %v819_v11 = vpop.f32.mrf.mxu3  ;;  %v985_v13 = vrot.slane %v956_v8, 6  ;;  %v800_v14 = vadd.f32 %v799_v9, %v560_v4 }
 0x14c   :  { %v820_v15 = vadd.f32 %v819_v11, %v561_v5 }
 0x14d   :  { %v957_v17 = vadd.f32 %v925_v10, %v800_v14  ;;  %v1000_v21 = vsel %vm991_vm0, %v955_v16, %v985_v13 }
 0x14e   :  { %v958_v18 = vadd.f32 %v926_v12, %v820_v15 }
 0x14f   :  { %v986_v19 = vrot.slane %v957_v17, 4 }
 0x150   :  { %v987_v20 = vrot.slane %v958_v18, 2 }
 0x152   :  { %v1001_v23 = vsel %vm993_vm1, %v986_v19, %v987_v20 }
 0x153   :  { %v1002_v24 = vsel %vm995_vm2, %v1000_v21, %v1001_v23 }
 0x154   :  { %1012 = vst [vmem:[%s1795_s4 + $0x10] sm:$0xff] %v1002_v24 }
 0x186   :  { %v859_v27 = vpop.f32.mrf.mxu1 }
 0x187   :  { %v839_v29 = vpop.f32.mrf.mxu0  ;;  %v860_v30 = vadd.f32 %v859_v27, %v563_v25 }
 0x188   :  { %v840_v34 = vadd.f32 %v839_v29, %v562_v26 }
 0x189   :  { %v960_v36 = vadd.f32 %v928_v28, %v860_v30 }
 0x18a   :  { %v879_v37 = vpop.f32.mrf.mxu2  ;;  %v959_v44 = vadd.f32 %v927_v35, %v840_v34 }
 0x18b   :  { %v899_v39 = vpop.f32.mrf.mxu3  ;;  %v988_v41 = vrot.slane %v960_v36, 6  ;;  %v880_v42 = vadd.f32 %v879_v37, %v564_v31 }
 0x18c   :  { %v900_v43 = vadd.f32 %v899_v39, %v565_v32 }
 0x18d   :  { %v961_v45 = vadd.f32 %v929_v38, %v880_v42  ;;  %v1003_v49 = vsel %vm991_vm0, %v959_v44, %v988_v41 }
 0x18e   :  { %v962_v46 = vadd.f32 %v930_v40, %v900_v43 }
 0x18f   :  { %v989_v47 = vrot.slane %v961_v45, 4 }
 0x190   :  { %v990_v48 = vrot.slane %v962_v46, 2 }
 0x192   :  { %v1004_v50 = vsel %vm993_vm1, %v989_v47, %v990_v48 }
 0x193   :  { %v1005_v51 = vsel %vm995_vm2, %v1003_v49, %v1004_v50 }
 0x194   :  { %1013 = vst [vmem:[%s1795_s4 + $0x18] sm:$0xff] %v1005_v51 }
 0x195   :  { %1018 = vsyncpa [#allocation3], 1 }

// kernel: transformer_forward.3
= control target key start
LH: loop header
LB: loop body
LE: loop exit
PB: predicated region body
PF: predicated region fallthrough
CT: control target
= control target key end

     0   :  { %s2490_s29 = smov 64   ;;  %vm136_vm0 = vcmask 130048   ;;  %vm84_vm1 = vcmask 523264   ;;  %vm410_vm14 = vcmask 261120   ;;  %vm1364_vm15 = vcmask 31744   ;;  %s3639_s0 = inlined_call_operand.vmem [shape: f32[2,32,64], index: 0, kind: input, shape index: {}, may-alias: {0,1}]   ;;  %s3640_s6 = inlined_call_operand.vmem [shape: f32[128,16], index: 6, kind: input, shape index: {}]   ;;  %s3641_s2 = inlined_call_operand.vmem [shape: f32[1,128], index: 2, kind: input, shape index: {}]   ;;  %s3642_s3 = inlined_call_operand.vmem [shape: f32[1,128], index: 3, kind: input, shape index: {}]   ;;  %s3643_s8 = inlined_call_operand.vmem [shape: f32[96,1], index: 8, kind: input, shape index: {}]   ;;  %s3644_s7 = inlined_call_operand.vmem [shape: bf16[96,32], index: 7, kind: input, shape index: {}]   ;;  %s3645_s11 = inlined_call_operand.vmem [shape: f32[32,4], index: 11, kind: input, shape index: {}]   ;;  %s3646_s10 = inlined_call_operand.vmem [shape: f32[32,1], index: 10, kind: input, shape index: {}]   ;;  %s3647_s1 = inlined_call_operand.vmem [shape: f32[2,32,64], index: 1, kind: input, shape index: {}, may-alias: {0,1}]   ;;  %s3648_s9 = inlined_call_operand.vmem [shape: bf16[32,32], index: 9, kind: input, shape index: {}]   ;;  %s3649_s12 = inlined_call_operand.vmem [shape: f32[2,32,64], index: 12, kind: output, shape index: {0}]   ;;  %s3650_s4 = inlined_call_operand.vmem [shape: f32[1,128], index: 4, kind: input, shape index: {}]   ;;  %s3651_s5 = inlined_call_operand.vmem [shape: f32[1,128], index: 5, kind: input, shape index: {}]   ;;  %s3652_s13 = inlined_call_operand.vmem [shape: f32[2,32,64], index: 13, kind: output, shape index: {1}]  }
   0x1   :  { %v2130_v0 = vld [vmem:[%s3639_s0 + $0x20] sm:$0xff]  ;;  %v2132_v1 = vld [vmem:[%s3639_s0 + $0x30] sm:$0xff]  ;;  %v2573_v2 = vld [vmem:[%s3640_s6 + $0x78] sm:$0xff] }
   0x2   :  { %72 = vrot.lane.b32.xlu0 %v2130_v0, %s2490_s29  ;;  %76 = vrot.lane.b32.xlu1 %v2132_v1, %s2490_s29  ;;  %v2579_v3 = vld [vmem:[%s3640_s6 + $0x70] sm:$0xff]  ;;  %v2585_v4 = vld [vmem:[%s3640_s6 + $0x68] sm:$0xff] }
   0x3   :  { %107 = vmatpush.msra.mxu0 %v2573_v2  ;;  %238 = vmatpush.msra.mxu2 %v2573_v2  ;;  %v2592_v5 = vld [vmem:[%s3640_s6 + $0x60] sm:$0xff]  ;;  %v2131_v6 = vld [vmem:[%s3639_s0 + $0x28] sm:$0xff]  ;;  %v2133_v7 = vld [vmem:[%s3639_s0 + $0x38] sm:$0xff] }
   0x4   :  { %v2605_v8 = vld [vmem:[%s3640_s6 + $0x58] sm:$0xff]  ;;  %v2614_v9 = vld [vmem:[%s3640_s6 + $0x50] sm:$0xff]  ;;  %v2621_v10 = vld [vmem:[%s3640_s6 + $0x48] sm:$0xff]  ;;  %2134 = vmatpush.xpose.msk.msra.mxu3 %vm136_vm0, %v2573_v2 }
   0x5   :  { %108 = vmatpush.msra.mxu0 %v2579_v3  ;;  %239 = vmatpush.msra.mxu2 %v2579_v3  ;;  %v2628_v11 = vld [vmem:[%s3640_s6 + $0x40] sm:$0xff]  ;;  %v2635_v12 = vld [vmem:[%s3640_s6 + $0x38] sm:$0xff]  ;;  %v2642_v13 = vld [vmem:[%s3640_s6 + $0x30] sm:$0xff] }
   0x6   :  { %v2649_v14 = vld [vmem:[%s3640_s6 + $0x28] sm:$0xff]  ;;  %v93_v15 = vld [vmem:[%s3640_s6 + $0x20] sm:$0xff]  ;;  %v92_v16 = vld [vmem:[%s3640_s6 + $0x18] sm:$0xff] }
   0x7   :  { %109 = vmatpush.msra.mxu0 %v2585_v4  ;;  %240 = vmatpush.msra.mxu2 %v2585_v4  ;;  %v91_v17 = vld [vmem:[%s3640_s6 + $0x10] sm:$0xff]  ;;  %v90_v18 = vld [vmem:[%s3640_s6 + $0x8] sm:$0xff]  ;;  %v89_v19 = vld [vmem:[%s3640_s6] sm:$0xff] }
   0x8   :  { %v59_v20 = vld [vmem:[%s3639_s0] sm:$0xff]  ;;  %2135 = vmatpush.xpose.msk.msra.mxu3 %vm136_vm0, %v2579_v3  ;;  %v60_v23 = vld [vmem:[%s3639_s0 + $0x8] sm:$0xff]  ;;  %v61_v27 = vld [vmem:[%s3639_s0 + $0x10] sm:$0xff] }
   0x9   :  { %110 = vmatpush.msra.mxu0 %v2592_v5  ;;  %241 = vmatpush.msra.mxu2 %v2592_v5  ;;  %v62_v30 = vld [vmem:[%s3639_s0 + $0x18] sm:$0xff] }
   0xa   :  { %74 = vrot.lane.b32.xlu0 %v2131_v6, %s2490_s29  ;;  %78 = vrot.lane.b32.xlu1 %v2133_v7, %s2490_s29  ;;  %v2491_v6 = vmov 0   ;;  %v540_v7 = vld [vmem:[%s3643_s8 + $0x8] sm:$0xff] }
   0xb   :  { %111 = vmatpush.msra.mxu0 %v2605_v8  ;;  %242 = vmatpush.msra.mxu2 %v2605_v8 }
   0xc   :  { %2136 = vmatpush.xpose.msk.msra.mxu3 %vm136_vm0, %v2585_v4  ;;  %2372 = vset.pattern.permute.xlu0 %v2491_v6 }
   0xd   :  { %112 = vmatpush.msra.mxu0 %v2614_v9  ;;  %243 = vmatpush.msra.mxu2 %v2614_v9 }
   0xe   :  { %2371 = vset.pattern.permute.xlu2 %v2491_v6  ;;  %2373 = vset.pattern.permute.xlu1 %v2491_v6 }
   0xf   :  { %113 = vmatpush.msra.mxu0 %v2621_v10  ;;  %244 = vmatpush.msra.mxu2 %v2621_v10 }
  0x10   :  { %2137 = vmatpush.xpose.msk.msra.mxu3 %vm136_vm0, %v2592_v5 }
  0x11   :  { %114 = vmatpush.msra.mxu0 %v2628_v11  ;;  %245 = vmatpush.msra.mxu2 %v2628_v11 }
  0x12   :  { %558 = vperm.xlu0 %2372, %v540_v7   ;;  %v2361_v7 = vld [vmem:[%s3644_s7 + $0x20] sm:$0xff]  }
  0x13   :  { %115 = vmatpush.msra.mxu0 %v2635_v12  ;;  %246 = vmatpush.msra.mxu2 %v2635_v12 }
  0x14   :  { %2138 = vmatpush.xpose.msk.msra.mxu3 %vm136_vm0, %v2605_v8 }
  0x15   :  { %116 = vmatpush.msra.mxu0 %v2642_v13  ;;  %247 = vmatpush.msra.mxu2 %v2642_v13 }
  0x17   :  { %117 = vmatpush.msra.mxu0 %v2649_v14  ;;  %248 = vmatpush.msra.mxu2 %v2649_v14 }
  0x18   :  { %2139 = vmatpush.xpose.msk.msra.mxu3 %vm136_vm0, %v2614_v9 }
  0x19   :  { %118 = vmatpush.msra.mxu0 %v93_v15  ;;  %249 = vmatpush.msra.mxu2 %v93_v15 }
  0x1b   :  { %119 = vmatpush.msra.mxu0 %v92_v16  ;;  %250 = vmatpush.msra.mxu2 %v92_v16 }
  0x1c   :  { %2140 = vmatpush.xpose.msk.msra.mxu3 %vm136_vm0, %v2621_v10 }
  0x1d   :  { %120 = vmatpush.msra.mxu0 %v91_v17  ;;  %251 = vmatpush.msra.mxu2 %v91_v17 }
  0x1f   :  { %121 = vmatpush.msra.mxu0 %v90_v18  ;;  %252 = vmatpush.msra.mxu2 %v90_v18 }
  0x20   :  { %2141 = vmatpush.xpose.msk.msra.mxu3 %vm136_vm0, %v2628_v11 }
  0x21   :  { %122 = vmatpush.msra.mxu0 %v89_v19  ;;  %253 = vmatpush.msra.mxu2 %v89_v19 }
  0x24   :  { %2142 = vmatpush.xpose.msk.msra.mxu3 %vm136_vm0, %v2635_v12 }
  0x28   :  { %2143 = vmatpush.xpose.msk.msra.mxu3 %vm136_vm0, %v2642_v13 }
  0x2c   :  { %2144 = vmatpush.xpose.msk.msra.mxu3 %vm136_vm0, %v2649_v14 }
  0x30   :  { %2145 = vmatpush.xpose.msk.msra.mxu3 %vm136_vm0, %v93_v15 }
  0x34   :  { %2146 = vmatpush.xpose.msk.msra.mxu3 %vm136_vm0, %v92_v16 }
  0x38   :  { %2147 = vmatpush.xpose.msk.msra.mxu3 %vm136_vm0, %v91_v17 }
  0x3c   :  { %2148 = vmatpush.xpose.msk.msra.mxu3 %vm136_vm0, %v90_v18 }
  0x40   :  { %2149 = vmatpush.xpose.msk.msra.mxu3 %vm136_vm0, %v89_v19 }
  0x44   :  { %2154 = vmatpush.xpose.msk.msrb.mxu3 %vm136_vm0, %v2573_v2 }
  0x48   :  { %2155 = vmatpush.xpose.msk.msrb.mxu3 %vm136_vm0, %v2579_v3 }
  0x4c   :  { %2156 = vmatpush.xpose.msk.msrb.mxu3 %vm136_vm0, %v2585_v4 }
  0x50   :  { %2157 = vmatpush.xpose.msk.msrb.mxu3 %vm136_vm0, %v2592_v5 }
  0x54   :  { %2158 = vmatpush.xpose.msk.msrb.mxu3 %vm136_vm0, %v2605_v8 }
  0x58   :  { %2159 = vmatpush.xpose.msk.msrb.mxu3 %vm136_vm0, %v2614_v9 }
  0x5c   :  { %2160 = vmatpush.xpose.msk.msrb.mxu3 %vm136_vm0, %v2621_v10 }
  0x60   :  { %2161 = vmatpush.xpose.msk.msrb.mxu3 %vm136_vm0, %v2628_v11 }
  0x64   :  { %2162 = vmatpush.xpose.msk.msrb.mxu3 %vm136_vm0, %v2635_v12 }
  0x68   :  { %2163 = vmatpush.xpose.msk.msrb.mxu3 %vm136_vm0, %v2642_v13 }
  0x6c   :  { %2164 = vmatpush.xpose.msk.msrb.mxu3 %vm136_vm0, %v2649_v14 }
  0x70   :  { %2165 = vmatpush.xpose.msk.msrb.mxu3 %vm136_vm0, %v93_v15 }
  0x74   :  { %v73_v21 = vpop.permute.xlu0 %72  ;;  %v77_v26 = vpop.permute.xlu1 %76  ;;  %2166 = vmatpush.xpose.msk.msrb.mxu3 %vm136_vm0, %v92_v16 }
  0x75   :  { %v85_v22 = vsel %vm84_vm1, %v59_v20, %v73_v21  ;;  %v87_v28 = vsel %vm84_vm1, %v61_v27, %v77_v26 }
  0x76   :  { %123 = vmatmul.f32.vlgmr.msra.gmra.mxu0 %v85_v22 }
  0x78   :  { %2167 = vmatpush.xpose.msk.msrb.mxu3 %vm136_vm0, %v91_v17  ;;  %v546_v17 = vld [vmem:[%s3643_s8 + $0x38] sm:$0xff] }
  0x79   :  { %588 = vperm.xlu0 %2372, %v546_v17  }
  0x7c   :  { %v75_v24 = vpop.permute.xlu0 %74  ;;  %v79_v29 = vpop.permute.xlu1 %78  ;;  %2168 = vmatpush.xpose.msk.msrb.mxu3 %vm136_vm0, %v90_v18 }
  0x7d   :  { %v86_v25 = vsel %vm84_vm1, %v60_v23, %v75_v24  ;;  %v88_v31 = vsel %vm84_vm1, %v62_v30, %v79_v29 }
  0x7e   :  { %126 = vmatmul.f32.gmra.mxu0 %v86_v25 }
  0x80   :  { %2169 = vmatpush.xpose.msk.msrb.mxu3 %vm136_vm0, %v89_v19 }
  0x84   :  { %v559_v17 = vpop.permute.xlu0 %558 }
  0x86   :  { %129 = vmatmul.f32.gmra.mxu0 %v87_v28 }
  0x8e   :  { %132 = vmatmul.f32.gmra.mxu0 %v88_v31 }
  0xf3   :  { %v124_v32 = vpop.f32.mrf.mxu0 }
  0xf4   :  { %2150 = vmatmul.msk.f32.vlgmr.msra.gmra.mxu3 %vm136_vm0, %v124_v32 }
  0xfb   :  { %v127_v33 = vpop.f32.mrf.mxu0 }
  0xfc   :  { %2151 = vmatmul.msk.f32.gmra.mxu3 %vm136_vm0, %v127_v33 }
 0x103   :  { %v130_v34 = vpop.f32.mrf.mxu0 }
 0x104   :  { %2152 = vmatmul.msk.f32.gmra.mxu3 %vm136_vm0, %v130_v34 }
 0x10b   :  { %v133_v35 = vpop.f32.mrf.mxu0 }
 0x10c   :  { %2153 = vmatmul.msk.f32.gmra.mxu3 %vm136_vm0, %v133_v35 }
 0x177   :  { %v214_v36 = vpop.f32.mrf.mxu3 }
 0x178   :  { %v226_v37 = vmul.f32 0.125, %v214_v36 }
 0x17a   :  { %v2744_v38 = vsub.f32 %v85_v22, %v226_v37 }
 0x17c   :  { %v234_v39 = vmul.f32 %v2744_v38, %v2744_v38 }
 0x17e   :  { %254 = vmatmul.f32.vlgmr.msra.gmra.mxu2 %v234_v39  ;;  %v2374_v39 = vld [vmem:[%s3641_s2] ss:$0 sm:$0xff] }
 0x17f   :  { %v217_v40 = vpop.f32.mrf.mxu3 }
 0x180   :  { %v227_v41 = vmul.f32 0.125, %v217_v40 }
 0x182   :  { %v2748_v42 = vsub.f32 %v86_v25, %v227_v41 }
 0x184   :  { %v235_v43 = vmul.f32 %v2748_v42, %v2748_v42 }
 0x186   :  { %257 = vmatmul.f32.gmra.mxu2 %v235_v43  ;;  %v2375_v43 = vld [vmem:[%s3642_s3] ss:$0 sm:$0xff] }
 0x187   :  { %v220_v44 = vpop.f32.mrf.mxu3 }
 0x188   :  { %v228_v45 = vmul.f32 0.125, %v220_v44 }
 0x18a   :  { %v2752_v46 = vsub.f32 %v87_v28, %v228_v45  ;;  %v547_v28 = vld [vmem:[%s3643_s8 + $0x40] sm:$0xff] }
 0x18b   :  { %593 = vperm.xlu0 %2372, %v547_v28  }
 0x18c   :  { %v236_v47 = vmul.f32 %v2752_v46, %v2752_v46 }
 0x18e   :  { %260 = vmatmul.f32.gmra.mxu2 %v236_v47 }
 0x18f   :  { %v223_v48 = vpop.f32.mrf.mxu3 }
 0x190   :  { %v229_v49 = vmul.f32 0.125, %v223_v48 }
 0x192   :  { %v2756_v50 = vsub.f32 %v88_v31, %v229_v49 }
 0x194   :  { %v237_v51 = vmul.f32 %v2756_v50, %v2756_v50 }
 0x196   :  { %263 = vmatmul.f32.gmra.mxu2 %v237_v51 }
 0x201   :  { %v255_v52 = vpop.f32.mrf.mxu2 }
 0x202   :  { %2170 = vmatmul.msk.f32.vlgmr.msrb.gmra.mxu3 %vm136_vm0, %v255_v52 }
 0x209   :  { %v258_v53 = vpop.f32.mrf.mxu2 }
 0x20a   :  { %2171 = vmatmul.msk.f32.gmra.mxu3 %vm136_vm0, %v258_v53 }
 0x211   :  { %v261_v54 = vpop.f32.mrf.mxu2 }
 0x212   :  { %2172 = vmatmul.msk.f32.gmra.mxu3 %vm136_vm0, %v261_v54  ;;  %v549_v54 = vld [vmem:[%s3643_s8 + $0x50] sm:$0xff] }
 0x219   :  { %v264_v55 = vpop.f32.mrf.mxu2 }
 0x21a   :  { %2173 = vmatmul.msk.f32.gmra.mxu3 %vm136_vm0, %v264_v55 }
 0x285   :  { %v296_v56 = vpop.f32.mrf.mxu3 }
 0x286   :  { %v308_v58 = vmul.f32 0.125, %v296_v56  ;;  %v543_v56 = vld [vmem:[%s3643_s8 + $0x20] sm:$0xff] }
 0x288   :  { %v312_v61 = vadd.f32 1e-05, %v308_v58  ;;  %v2358_v58 = vld [vmem:[%s3644_s7 + $0x8] sm:$0xff]  }
 0x28a   :  { %vm322_vm9 = vweird.f32 %v312_v61 }
 0x28d   :  { %v299_v57 = vpop.f32.mrf.mxu3 }
 0x28e   :  { %v309_v59 = vmul.f32 0.125, %v299_v57  ;;  %v550_v57 = vld [vmem:[%s3643_s8 + $0x58] sm:$0xff] }
 0x290   :  { %v313_v60 = vadd.f32 1e-05, %v309_v59  ;;  %v544_v59 = vld [vmem:[%s3643_s8 + $0x28] sm:$0xff] }
 0x291   :  { %578 = vperm.xlu1 %2373, %v544_v59  }
 0x292   :  { %2378 = vrsqrt.f32 %v313_v60  ;;  %vm332_vm6 = vweird.f32 %v313_v60 }
 0x293   :  { %2380 = vrsqrt.f32 %v312_v61 }
 0x295   :  { %v302_v62 = vpop.f32.mrf.mxu3 }
 0x296   :  { %v310_v63 = vmul.f32 0.125, %v302_v62  ;;  %v545_v62 = vld [vmem:[%s3643_s8 + $0x30] sm:$0xff] }
 0x298   :  { %v314_v0 = vadd.f32 1e-05, %v310_v63  ;;  %v2379_v1 = vpop.eup %2378  ;;  %v2333_v63 = vunpack.c.h.bf16 %v2358_v58 }
 0x299   :  { %v2381_v2 = vpop.eup %2380  ;;  %v327_v3 = vmul.f32 %v2379_v1, %v313_v60  ;;  %vm333_vm3 = vweird.f32 %v2379_v1  ;;  %v2332_v60 = vunpack.c.l.bf16 %v2358_v58  ;;  %583 = vperm.xlu1 %2373, %v545_v62  }
 0x29a   :  { %2382 = vrsqrt.f32 %v314_v0  ;;  %v317_v8 = vmul.f32 %v2381_v2, %v312_v61  ;;  %vm342_vm4 = vweird.f32 %v314_v0  ;;  %vm323_vm5 = vweird.f32 %v2381_v2  ;;  %vm334_vm10 = vmor %vm332_vm6, %vm333_vm3  ;;  %v541_v61 = vld [vmem:[%s3643_s8 + $0x10] sm:$0xff] }
 0x29b   :  { %v328_v11 = vmul.f32 %v2379_v1, %v327_v3  ;;  %vm324_vm11 = vmor %vm322_vm9, %vm323_vm5 }
 0x29c   :  { %v318_v13 = vmul.f32 %v2381_v2, %v317_v8  ;;  %v2344_v8 = vunpack.c.l.bf16 %v2361_v7 }
 0x29d   :  { %v305_v4 = vpop.f32.mrf.mxu3  ;;  %v329_v15 = vmul.f32 0.5, %v328_v11 }
 0x29e   :  { %v311_v5 = vmul.f32 0.125, %v305_v4  ;;  %v319_v18 = vmul.f32 0.5, %v318_v13  ;;  %v2360_v4 = vld [vmem:[%s3644_s7 + $0x18] sm:$0xff]  }
 0x29f   :  { %v330_v21 = vsub.f32 1.5, %v329_v15  ;;  %v2341_v6 = vunpack.c.h.bf16 %v2360_v4 }
 0x2a0   :  { %v2383_v9 = vpop.eup %2382  ;;  %v315_v10 = vadd.f32 1e-05, %v311_v5  ;;  %v320_v23 = vsub.f32 1.5, %v319_v18  ;;  %v2340_v5 = vunpack.c.l.bf16 %v2360_v4 }
 0x2a1   :  { %v337_v12 = vmul.f32 %v2383_v9, %v314_v0  ;;  %vm343_vm2 = vweird.f32 %v2383_v9  ;;  %v331_v26 = vmul.f32 %v2379_v1, %v330_v21  ;;  %v542_v0 = vld [vmem:[%s3643_s8 + $0x18] sm:$0xff] }
 0x2a2   :  { %2384 = vrsqrt.f32 %v315_v10  ;;  %vm344_vm7 = vmor %vm342_vm4, %vm343_vm2  ;;  %v321_v29 = vmul.f32 %v2381_v2, %v320_v23  ;;  %vm352_vm12 = vweird.f32 %v315_v10 }
 0x2a3   :  { %v338_v14 = vmul.f32 %v2383_v9, %v337_v12  ;;  %v335_v33 = vsel %vm334_vm10, %v2379_v1, %v331_v26  ;;  %v2359_v1 = vld [vmem:[%s3644_s7 + $0x10] sm:$0xff]  }
 0x2a4   :  { %v325_v36 = vsel %vm324_vm11, %v2381_v2, %v321_v29  ;;  %v357_v40 = vmul.f32 %v335_v33, %v2748_v42  ;;  %v2327_v42 = vld [vmem:[%s3644_s7] sm:$0xff]   ;;  %v2336_v2 = vunpack.c.l.bf16 %v2359_v1  ;;  %v2337_v3 = vunpack.c.h.bf16 %v2359_v1 }
 0x2a5   :  { %v339_v16 = vmul.f32 0.5, %v338_v14  ;;  %v356_v45 = vmul.f32 %v325_v36, %v2744_v38  ;;  %v2328_v52 = vunpack.c.l.bf16 %v2327_v42  ;;  %v539_v38 = vld [vmem:[%s3643_s8] sm:$0xff]  ;;  %v2329_v55 = vunpack.c.h.bf16 %v2327_v42  ;;  %v2843_v42 = vld [vmem:[%s3645_s11 + $0x18] sm:$0xff] }
 0x2a6   :  { %v364_v48 = vmul.f32 %v2374_v39, %v357_v40  ;;  %553 = vperm.xlu2 %2371, %v539_v38   ;;  %2364 = vmatpush.msrb.mxu2 %v2843_v42 }
 0x2a7   :  { %v340_v19 = vsub.f32 1.5, %v339_v16  ;;  %879 = vmatpush.msra.mxu1 %v2843_v42 }
 0x2a8   :  { %v2385_v20 = vpop.eup %2384  ;;  %v371_v51 = vadd.f32 %v2375_v43, %v364_v48 }
 0x2a9   :  { %v347_v22 = vmul.f32 %v2385_v20, %v315_v10  ;;  %v341_v24 = vmul.f32 %v2383_v9, %v340_v19  ;;  %vm353_vm8 = vweird.f32 %v2385_v20  ;;  %v2362_v10 = vld [vmem:[%s3644_s7 + $0x28] sm:$0xff]  }
 0x2aa   :  { %vm354_vm13 = vmor %vm352_vm12, %vm353_vm8  ;;  %v2348_v11 = vunpack.c.l.bf16 %v2362_v10  ;;  %v2349_v12 = vunpack.c.h.bf16 %v2362_v10 }
 0x2ab   :  { %v348_v25 = vmul.f32 %v2385_v20, %v347_v22  ;;  %v345_v31 = vsel %vm344_vm7, %v2383_v9, %v341_v24  ;;  %v2345_v9 = vunpack.c.h.bf16 %v2361_v7 }
 0x2ac   :  { %v358_v34 = vmul.f32 %v345_v31, %v2752_v46  ;;  %v548_v46 = vld [vmem:[%s3643_s8 + $0x48] sm:$0xff]  ;;  %v589_v31 = vpop.permute.xlu0 %588 }
 0x2ad   :  { %v349_v27 = vmul.f32 0.5, %v348_v25  ;;  %598 = vperm.xlu0 %2372, %v548_v46  }
 0x2ae   :  { %v365_v44 = vmul.f32 %v2374_v39, %v358_v34  ;;  %573 = vperm.xlu2 %2371, %v543_v56  }
 0x2af   :  { %v350_v30 = vsub.f32 1.5, %v349_v27 }
 0x2b0   :  { %v372_v49 = vadd.f32 %v2375_v43, %v365_v44 }
 0x2b1   :  { %v351_v32 = vmul.f32 %v2385_v20, %v350_v30 }
 0x2b3   :  { %v355_v35 = vsel %vm354_vm13, %v2385_v20, %v351_v32 }
 0x2b4   :  { %v359_v37 = vmul.f32 %v355_v35, %v2756_v50  ;;  %v363_v50 = vmul.f32 %v2374_v39, %v356_v45 }
 0x2b5   :  { %603 = vperm.xlu0 %2372, %v549_v54  }
 0x2b6   :  { %v366_v41 = vmul.f32 %v2374_v39, %v359_v37  ;;  %v370_v53 = vadd.f32 %v2375_v43, %v363_v50  ;;  %563 = vperm.xlu2 %2371, %v541_v61   ;;  %v594_v37 = vpop.permute.xlu0 %593 }
 0x2b8   :  { %v373_v47 = vadd.f32 %v2375_v43, %v366_v41 }
 0x2ba   :  { %459 = vmatpush.msrb.mxu0 %v373_v47 }
 0x2bc   :  { %460 = vmatpush.msrb.mxu0 %v372_v49 }
 0x2bd   :  { %608 = vperm.xlu0 %2372, %v550_v57  }
 0x2be   :  { %461 = vmatpush.msrb.mxu0 %v371_v51  ;;  %568 = vperm.xlu2 %2371, %v542_v0   ;;  %v2850_v51 = vld [vmem:[%s3645_s11 + $0x10] sm:$0xff] }
 0x2bf   :  { %2365 = vmatpush.msrb.mxu2 %v2850_v51  ;;  %880 = vmatpush.msra.mxu1 %v2850_v51 }
 0x2c0   :  { %462 = vmatpush.msrb.mxu0 %v370_v53  ;;  %v2864_v53 = vld [vmem:[%s3645_s11] sm:$0xff] }
 0x2c1   :  { %2174 = vmatmul.msk.f32.vlgmr.msrb.gmra.mxu0 %vm410_vm14, %v2328_v52  ;;  %v2857_v52 = vld [vmem:[%s3645_s11 + $0x8] sm:$0xff] }
 0x2c2   :  { %2366 = vmatpush.msrb.mxu2 %v2857_v52  ;;  %881 = vmatpush.msra.mxu1 %v2857_v52 }
 0x2c4   :  { %2367 = vmatpush.msrb.mxu2 %v2864_v53  ;;  %882 = vmatpush.msra.mxu1 %v2864_v53 }
 0x2c6   :  { %2218 = vmatpush.xpose.msk.msrb.mxu1 %vm1364_vm15, %v2843_v42 }
 0x2c9   :  { %2175 = vmatmul.msk.f32.gmra.mxu0 %vm410_vm14, %v2329_v55 }
 0x2ca   :  { %2219 = vmatpush.xpose.msk.msrb.mxu1 %vm1364_vm15, %v2850_v51 }
 0x2ce   :  { %2220 = vmatpush.xpose.msk.msrb.mxu1 %vm1364_vm15, %v2857_v52 }
 0x2d1   :  { %2176 = vmatmul.msk.f32.gmra.mxu0 %vm410_vm14, %v2332_v60 }
 0x2d2   :  { %2221 = vmatpush.xpose.msk.msrb.mxu1 %vm1364_vm15, %v2864_v53 }
 0x2d9   :  { %2177 = vmatmul.msk.f32.gmra.mxu0 %vm410_vm14, %v2333_v63 }
 0x2e1   :  { %2178 = vmatmul.msk.f32.gmra.mxu0 %vm410_vm14, %v2336_v2 }
 0x2e9   :  { %2179 = vmatmul.msk.f32.gmra.mxu0 %vm410_vm14, %v2337_v3 }
 0x2f1   :  { %2180 = vmatmul.msk.f32.gmra.mxu0 %vm410_vm14, %v2340_v5 }
 0x2f9   :  { %2181 = vmatmul.msk.f32.gmra.mxu0 %vm410_vm14, %v2341_v6 }
 0x300   :  { %v554_v13 = vpop.permute.xlu2 %553 }
 0x301   :  { %2182 = vmatmul.msk.f32.gmra.mxu0 %vm410_vm14, %v2344_v8 }
 0x303   :  { %v579_v28 = vpop.permute.xlu1 %578 }
 0x308   :  { %v574_v16 = vpop.permute.xlu2 %573 }
 0x309   :  { %2183 = vmatmul.msk.f32.gmra.mxu0 %vm410_vm14, %v2345_v9 }
 0x30b   :  { %v584_v32 = vpop.permute.xlu1 %583 }
 0x310   :  { %v564_v20 = vpop.permute.xlu2 %563 }
 0x311   :  { %2184 = vmatmul.msk.f32.gmra.mxu0 %vm410_vm14, %v2348_v11 }
 0x318   :  { %v569_v23 = vpop.permute.xlu2 %568 }
 0x319   :  { %2185 = vmatmul.msk.f32.gmra.mxu0 %vm410_vm14, %v2349_v12 }
 0x31f   :  { %v599_v41 = vpop.permute.xlu0 %598 }
 0x327   :  { %v604_v45 = vpop.permute.xlu0 %603 }
 0x32f   :  { %v609_v48 = vpop.permute.xlu0 %608 }
 0x33e   :  { %v464_v14 = vpop.f32.mrf.mxu0 }
 0x33f   :  { %v611_v15 = vadd.f32 %v554_v13, %v464_v14 }
 0x341   :  { %627 = vxpose.xlu1.b32.start [1/4] (short) %v611_v15, 128 }
 0x346   :  { %v467_v18 = vpop.f32.mrf.mxu0 }
 0x347   :  { %v612_v19 = vadd.f32 %v559_v17, %v467_v18 }
 0x349   :  { %628 = vxpose.xlu1.b32.cont [2/4] (short) %v612_v19, 128 }
 0x34e   :  { %v470_v21 = vpop.f32.mrf.mxu0 }
 0x34f   :  { %v613_v22 = vadd.f32 %v564_v20, %v470_v21 }
 0x351   :  { %629 = vxpose.xlu1.b32.cont [3/4] (short) %v613_v22, 128 }
 0x356   :  { %v473_v24 = vpop.f32.mrf.mxu0 }
 0x357   :  { %v614_v25 = vadd.f32 %v569_v23, %v473_v24 }
 0x359   :  { %630 = vxpose.xlu1.b32.end [4/4] (short) %v614_v25, 128 }
 0x35e   :  { %v476_v26 = vpop.f32.mrf.mxu0 }
 0x35f   :  { %v615_v27 = vadd.f32 %v574_v16, %v476_v26 }
 0x361   :  { %675 = vxpose.xlu2.b32.start [1/4] (short) %v615_v27, 128 }
 0x366   :  { %v479_v29 = vpop.f32.mrf.mxu0 }
 0x367   :  { %v616_v30 = vadd.f32 %v579_v28, %v479_v29  ;;  %v1671_v28 = vld [vmem:[%s3646_s10] sm:$0xff] }
 0x369   :  { %676 = vxpose.xlu2.b32.cont [2/4] (short) %v616_v30, 128 }
 0x36e   :  { %v482_v33 = vpop.f32.mrf.mxu0 }
 0x36f   :  { %v617_v34 = vadd.f32 %v584_v32, %v482_v33 }
 0x371   :  { %677 = vxpose.xlu2.b32.cont [3/4] (short) %v617_v34, 128  ;;  %v1673_v34 = vld [vmem:[%s3646_s10 + $0x10] sm:$0xff] }
 0x376   :  { %v485_v35 = vpop.f32.mrf.mxu0 }
 0x377   :  { %v618_v36 = vadd.f32 %v589_v31, %v485_v35 }
 0x379   :  { %678 = vxpose.xlu2.b32.end [4/4] (short) %v618_v36, 128 }
 0x37e   :  { %v488_v39 = vpop.f32.mrf.mxu0 }
 0x37f   :  { %v619_v40 = vadd.f32 %v594_v37, %v488_v39 }
 0x381   :  { %707 = vxpose.xlu0.b32.start [1/4] (short) %v619_v40, 128  ;;  %v1674_v40 = vld [vmem:[%s3646_s10 + $0x18] sm:$0xff] }
 0x386   :  { %v491_v43 = vpop.f32.mrf.mxu0 }
 0x387   :  { %v620_v44 = vadd.f32 %v599_v41, %v491_v43 }
 0x389   :  { %708 = vxpose.xlu0.b32.cont [2/4] (short) %v620_v44, 128 }
 0x38e   :  { %v494_v46 = vpop.f32.mrf.mxu0 }
 0x38f   :  { %v621_v47 = vadd.f32 %v604_v45, %v494_v46 }
 0x391   :  { %709 = vxpose.xlu0.b32.cont [3/4] (short) %v621_v47, 128 }
 0x396   :  { %v497_v49 = vpop.f32.mrf.mxu0 }
 0x397   :  { %v622_v50 = vadd.f32 %v609_v48, %v497_v49 }
 0x399   :  { %710 = vxpose.xlu0.b32.end [4/4] (short) %v622_v50, 128 }
 0x3e5   :  { %v643_v38 = vpop.trf.xlu1 }
 0x3e6   :  { %v659_v56 = vmul.f32 0.35355338, %v643_v38 }
 0x3ed   :  { %v644_v54 = vpop.trf.xlu1 }
 0x3ee   :  { %v660_v60 = vmul.f32 0.35355338, %v644_v54 }
 0x3f5   :  { %v645_v55 = vpop.trf.xlu1 }
 0x3f6   :  { %v661_v0 = vmul.f32 0.35355338, %v645_v55 }
 0x3fa   :  { %v2868_v57 = vpop.trf.xlu2 }
 0x3fb   :  { %v739_v58 = vmul.f32 %v2868_v57, %v659_v56 }
 0x3fd   :  { %v646_v59 = vpop.trf.xlu1  ;;  %2186 = vmatmul.msk.f32.vlgmr.msra.gmra.mxu1 %vm410_vm14, %v739_v58 }
 0x3fe   :  { %v662_v4 = vmul.f32 0.35355338, %v646_v59 }
 0x402   :  { %v2872_v61 = vpop.trf.xlu2 }
 0x403   :  { %v740_v62 = vmul.f32 %v2872_v61, %v660_v60 }
 0x405   :  { %v647_v63 = vpop.trf.xlu1  ;;  %2187 = vmatmul.msk.f32.gmra.mxu1 %vm410_vm14, %v740_v62 }
 0x406   :  { %v663_v8 = vmul.f32 0.35355338, %v647_v63 }
 0x40a   :  { %v2876_v1 = vpop.trf.xlu2 }
 0x40b   :  { %v741_v2 = vmul.f32 %v2876_v1, %v661_v0 }
 0x40d   :  { %v648_v3 = vpop.trf.xlu1  ;;  %2188 = vmatmul.msk.f32.gmra.mxu1 %vm410_vm14, %v741_v2 }
 0x40e   :  { %v664_v12 = vmul.f32 0.35355338, %v648_v3 }
 0x412   :  { %v2880_v5 = vpop.trf.xlu2 }
 0x413   :  { %v742_v6 = vmul.f32 %v2880_v5, %v662_v4 }
 0x415   :  { %v649_v7 = vpop.trf.xlu1  ;;  %2189 = vmatmul.msk.f32.vlgmr.msrb.gmra.mxu2 %vm410_vm14, %v742_v6 }
 0x416   :  { %v665_v15 = vmul.f32 0.35355338, %v649_v7 }
 0x41a   :  { %v2884_v9 = vpop.trf.xlu2 }
 0x41b   :  { %v743_v10 = vmul.f32 %v2884_v9, %v663_v8 }
 0x41d   :  { %2190 = vmatmul.msk.f32.gmra.mxu2 %vm410_vm14, %v743_v10  ;;  %v650_v11 = vpop.trf.xlu1 }
 0x41e   :  { %v666_v19 = vmul.f32 0.35355338, %v650_v11 }
 0x422   :  { %v2888_v13 = vpop.trf.xlu2 }
 0x423   :  { %v744_v14 = vmul.f32 %v2888_v13, %v664_v12 }
 0x425   :  { %2191 = vmatmul.msk.f32.gmra.mxu2 %vm410_vm14, %v744_v14  ;;  %v651_v16 = vpop.trf.xlu1 }
 0x426   :  { %v667_v23 = vmul.f32 0.35355338, %v651_v16 }
 0x428   :  { %v755_v10 = vmul.f32 %v2868_v57, %v667_v23 }
 0x42a   :  { %v2892_v17 = vpop.trf.xlu2 }
 0x42b   :  { %v745_v18 = vmul.f32 %v2892_v17, %v665_v15 }
 0x42d   :  { %2192 = vmatmul.msk.f32.gmra.mxu2 %vm410_vm14, %v745_v18  ;;  %v652_v20 = vpop.trf.xlu1 }
 0x42e   :  { %v668_v29 = vmul.f32 0.35355338, %v652_v20 }
 0x430   :  { %v756_v11 = vmul.f32 %v2872_v61, %v668_v29 }
 0x432   :  { %v2896_v21 = vpop.trf.xlu2 }
 0x433   :  { %v746_v22 = vmul.f32 %v2896_v21, %v666_v19 }
 0x435   :  { %2193 = vmatmul.msk.f32.gmra.mxu2 %vm410_vm14, %v746_v22  ;;  %v653_v27 = vpop.trf.xlu1 }
 0x436   :  { %v669_v35 = vmul.f32 0.35355338, %v653_v27 }
 0x43a   :  { %v699_v24 = vpop.trf.xlu2 }
 0x43b   :  { %v747_v25 = vmul.f32 %v699_v24, %v659_v56  ;;  %v2900_v26 = vmul.f32 %v699_v24, %v667_v23 }
 0x43d   :  { %2194 = vmatmul.msk.f32.gmra.mxu2 %vm410_vm14, %v747_v25  ;;  %v654_v33 = vpop.trf.xlu1 }
 0x43e   :  { %v670_v43 = vmul.f32 0.35355338, %v654_v33 }
 0x440   :  { %v758_v14 = vmul.f32 %v2880_v5, %v670_v43 }
 0x442   :  { %1677 = vperm.xlu2 %2371, %v1671_v28   ;;  %v700_v30 = vpop.trf.xlu2 }
 0x443   :  { %v748_v31 = vmul.f32 %v700_v30, %v660_v60  ;;  %v2906_v32 = vmul.f32 %v700_v30, %v668_v29  ;;  %v1672_v60 = vld [vmem:[%s3646_s10 + $0x8] sm:$0xff] }
 0x445   :  { %2195 = vmatmul.msk.f32.gmra.mxu2 %vm410_vm14, %v748_v31  ;;  %v655_v41 = vpop.trf.xlu1 }
 0x446   :  { %v671_v47 = vmul.f32 0.35355338, %v655_v41 }
 0x448   :  { %v759_v16 = vmul.f32 %v2884_v9, %v671_v47 }
 0x44a   :  { %1687 = vperm.xlu2 %2371, %v1673_v34   ;;  %v701_v36 = vpop.trf.xlu2 }
 0x44b   :  { %v749_v37 = vmul.f32 %v701_v36, %v661_v0  ;;  %v2912_v39 = vmul.f32 %v701_v36, %v669_v35 }
 0x44d   :  { %2196 = vmatmul.msk.f32.gmra.mxu2 %vm410_vm14, %v749_v37  ;;  %v656_v48 = vpop.trf.xlu1 }
 0x44e   :  { %v672_v54 = vmul.f32 0.35355338, %v656_v48 }
 0x450   :  { %v760_v61 = vmul.f32 %v2888_v13, %v672_v54 }
 0x452   :  { %1692 = vperm.xlu2 %2371, %v1674_v40   ;;  %v702_v44 = vpop.trf.xlu2 }
 0x453   :  { %v750_v45 = vmul.f32 %v702_v44, %v662_v4  ;;  %v2918_v46 = vmul.f32 %v702_v44, %v670_v43 }
 0x455   :  { %2197 = vmatmul.msk.f32.gmra.mxu2 %vm410_vm14, %v750_v45  ;;  %v657_v59 = vpop.trf.xlu1 }
 0x456   :  { %v673_v62 = vmul.f32 0.35355338, %v657_v59 }
 0x45a   :  { %v703_v49 = vpop.trf.xlu2 }
 0x45b   :  { %v751_v50 = vmul.f32 %v703_v49, %v663_v8  ;;  %v2921_v38 = vmul.f32 %v703_v49, %v671_v47 }
 0x45d   :  { %2198 = vmatmul.msk.f32.gmra.mxu2 %vm410_vm14, %v751_v50  ;;  %v658_v3 = vpop.trf.xlu1 }
 0x45e   :  { %v674_v4 = vmul.f32 0.35355338, %v658_v3 }
 0x462   :  { %v704_v55 = vpop.trf.xlu2 }
 0x463   :  { %v752_v56 = vmul.f32 %v704_v55, %v664_v12  ;;  %v2924_v58 = vmul.f32 %v704_v55, %v672_v54  ;;  %v757_v12 = vmul.f32 %v2876_v1, %v669_v35  ;;  %v761_v1 = vmul.f32 %v2892_v17, %v673_v62 }
 0x465   :  { %2199 = vmatmul.msk.f32.gmra.mxu2 %vm410_vm14, %v752_v56 }
 0x467   :  { %1682 = vperm.xlu0 %2372, %v1672_v60  }
 0x46a   :  { %v705_v63 = vpop.trf.xlu2 }
 0x46b   :  { %v753_v0 = vmul.f32 %v705_v63, %v665_v15  ;;  %v2930_v2 = vmul.f32 %v705_v63, %v673_v62 }
 0x46d   :  { %2200 = vmatmul.msk.f32.gmra.mxu2 %vm410_vm14, %v753_v0 }
 0x472   :  { %v706_v6 = vpop.trf.xlu2 }
 0x473   :  { %v754_v7 = vmul.f32 %v706_v6, %v666_v19  ;;  %v2933_v8 = vmul.f32 %v706_v6, %v674_v4  ;;  %v762_v19 = vmul.f32 %v2896_v21, %v674_v4 }
 0x475   :  { %2201 = vmatmul.msk.f32.gmra.mxu2 %vm410_vm14, %v754_v7 }
 0x47a   :  { %v884_v13 = vpop.f32.mrf.mxu1 }
 0x47d   :  { %2202 = vmatmul.msk.f32.gmra.mxu2 %vm410_vm14, %v755_v10 }
 0x482   :  { %v887_v51 = vpop.f32.mrf.mxu1 }
 0x485   :  { %2203 = vmatmul.msk.f32.gmra.mxu2 %vm410_vm14, %v756_v11 }
 0x48a   :  { %v890_v31 = vpop.f32.mrf.mxu1 }
 0x48d   :  { %2204 = vmatmul.msk.f32.gmra.mxu2 %vm410_vm14, %v757_v12 }
 0x495   :  { %2205 = vmatmul.msk.f32.gmra.mxu2 %vm410_vm14, %v758_v14 }
 0x498   :  { %v2944_v15 = vpop.f32.mrf.mxu2 }
 0x49d   :  { %2206 = vmatmul.msk.f32.gmra.mxu2 %vm410_vm14, %v759_v16 }
 0x4a0   :  { %v2948_v57 = vpop.f32.mrf.mxu2 }
 0x4a5   :  { %2207 = vmatmul.msk.f32.gmra.mxu2 %vm410_vm14, %v760_v61 }
 0x4a8   :  { %v2952_v18 = vpop.f32.mrf.mxu2 }
 0x4ad   :  { %2208 = vmatmul.msk.f32.gmra.mxu2 %vm410_vm14, %v761_v1 }
 0x4b0   :  { %v2956_v5 = vpop.f32.mrf.mxu2 }
 0x4b5   :  { %2209 = vmatmul.msk.f32.gmra.mxu2 %vm410_vm14, %v762_v19 }
 0x4b8   :  { %v2962_v9 = vpop.f32.mrf.mxu2 }
 0x4bd   :  { %2210 = vmatmul.msk.f32.gmra.mxu2 %vm410_vm14, %v2900_v26 }
 0x4c0   :  { %v908_v17 = vpop.f32.mrf.mxu2 }
 0x4c1   :  { %v980_v20 = vmax.f32 %v884_v13, %v908_v17 }
 0x4c3   :  { %v988_v21 = vsub.f32 %v884_v13, %v980_v20  ;;  %v1012_v22 = vsub.f32 %v908_v17, %v980_v20 }
 0x4c5   :  { %v996_v42 = vmul.f32 1.442695, %v988_v21  ;;  %v1020_v23 = vmul.f32 1.442695, %v1012_v22  ;;  %2211 = vmatmul.msk.f32.gmra.mxu2 %vm410_vm14, %v2906_v32 }
 0x4c7   :  { %2386 = vpow2.f32 %v996_v42 }
 0x4c8   :  { %2388 = vpow2.f32 %v1020_v23  ;;  %v911_v24 = vpop.f32.mrf.mxu2 }
 0x4c9   :  { %v981_v25 = vmax.f32 %v887_v51, %v911_v24 }
 0x4cb   :  { %v989_v26 = vsub.f32 %v887_v51, %v981_v25  ;;  %v1013_v27 = vsub.f32 %v911_v24, %v981_v25 }
 0x4cd   :  { %v2387_v52 = vpop.eup %2386  ;;  %v998_v28 = vmul.f32 1.442695, %v989_v26  ;;  %v1022_v29 = vmul.f32 1.442695, %v1013_v27  ;;  %2212 = vmatmul.msk.f32.gmra.mxu2 %vm410_vm14, %v2912_v39 }
 0x4ce   :  { %v2389_v53 = vpop.eup %2388 }
 0x4cf   :  { %v1036_v30 = vadd.f32 %v2389_v53, %v2387_v52  ;;  %2390 = vpow2.f32 %v998_v28 }
 0x4d0   :  { %2392 = vpow2.f32 %v1022_v29  ;;  %v914_v33 = vpop.f32.mrf.mxu2 }
 0x4d1   :  { %2394 = vrcp.f32 %v1036_v30  ;;  %v982_v32 = vmax.f32 %v890_v31, %v914_v33  ;;  %v1055_v54 = vand.u32 2147483648, %v1036_v30  ;;  %vm1049_vm3 = vweird.f32 %v1036_v30 }
 0x4d3   :  { %v990_v34 = vsub.f32 %v890_v31, %v982_v32  ;;  %v1014_v35 = vsub.f32 %v914_v33, %v982_v32  ;;  %v1056_v4 = vor.u32 1.1754944e-38, %v1055_v54 }
 0x4d5   :  { %v2976_v36 = vpop.eup %2390  ;;  %v1000_v37 = vmul.f32 1.442695, %v990_v34  ;;  %v1024_v40 = vmul.f32 1.442695, %v1014_v35  ;;  %2213 = vmatmul.msk.f32.gmra.mxu2 %vm410_vm14, %v2918_v46  ;;  %v1053_v46 = vand.u32 2147483647, %v1036_v30 }
 0x4d6   :  { %v2980_v41 = vpop.eup %2392 }
 0x4d7   :  { %v2395_v39 = vpop.eup %2394  ;;  %v1037_v43 = vadd.f32 %v2980_v41, %v2976_v36  ;;  %2396 = vpow2.f32 %v1000_v37  ;;  %vm1054_vm5 = vcmp.eq.f32.partialorder %v1053_v46, 8.507059e+37 }
 0x4d8   :  { %2398 = vpow2.f32 %v1024_v40  ;;  %v917_v44 = vpop.f32.mrf.mxu2  ;;  %v1045_v45 = vmul.f32 %v2395_v39, %v1036_v30  ;;  %vm1050_vm2 = vweird.f32 %v2395_v39 }
 0x4d9   :  { %2400 = vrcp.f32 %v1037_v43  ;;  %v983_v47 = vmax.f32 %v2944_v15, %v917_v44  ;;  %vm1051_vm4 = vmor %vm1049_vm3, %vm1050_vm2  ;;  %v1069_v61 = vand.u32 2147483648, %v1037_v43  ;;  %v1067_v13 = vand.u32 2147483647, %v1037_v43 }
 0x4da   :  { %v1046_v48 = vsub.f32 1.0, %v1045_v45  ;;  %vm1063_vm7 = vweird.f32 %v1037_v43 }
 0x4db   :  { %v991_v49 = vsub.f32 %v2944_v15, %v983_v47  ;;  %v1015_v50 = vsub.f32 %v917_v44, %v983_v47  ;;  %v1070_v51 = vor.u32 1.1754944e-38, %v1069_v61  ;;  %vm1068_vm9 = vcmp.eq.f32.partialorder %v1067_v13, 8.507059e+37 }
 0x4dc   :  { %v1047_v55 = vmul.f32 %v2395_v39, %v1046_v48 }
 0x4dd   :  { %v2986_v56 = vpop.eup %2396  ;;  %v1002_v59 = vmul.f32 1.442695, %v991_v49  ;;  %v1026_v60 = vmul.f32 1.442695, %v1015_v50  ;;  %2214 = vmatmul.msk.f32.gmra.mxu2 %vm410_vm14, %v2921_v38 }
 0x4de   :  { %v2990_v62 = vpop.eup %2398  ;;  %v1048_v63 = vadd.f32 %v2395_v39, %v1047_v55 }
 0x4df   :  { %v2401_v0 = vpop.eup %2400  ;;  %v2994_v3 = vadd.f32 %v2990_v62, %v2986_v56  ;;  %2402 = vpow2.f32 %v1002_v59 }
 0x4e0   :  { %2404 = vpow2.f32 %v1026_v60  ;;  %v920_v6 = vpop.f32.mrf.mxu2  ;;  %v1052_v7 = vsel %vm1051_vm4, %v2395_v39, %v1048_v63  ;;  %v1059_v10 = vmul.f32 %v2401_v0, %v1037_v43  ;;  %vm1064_vm6 = vweird.f32 %v2401_v0 }
 0x4e1   :  { %2406 = vrcp.f32 %v2994_v3  ;;  %v984_v38 = vmax.f32 %v2948_v57, %v920_v6  ;;  %v1057_v11 = vsel %vm1054_vm5, %v1056_v4, %v1052_v7  ;;  %vm1065_vm8 = vmor %vm1063_vm7, %vm1064_vm6  ;;  %v1083_v30 = vand.u32 2147483648, %v2994_v3 }
 0x4e2   :  { %v1156_v12 = vmul.f32 %v2387_v52, %v1057_v11  ;;  %v1060_v14 = vsub.f32 1.0, %v1059_v10  ;;  %v2999_v1 = vmul.f32 %v2389_v53, %v1057_v11  ;;  %v1081_v32 = vand.u32 2147483647, %v2994_v3 }
 0x4e3   :  { %v992_v15 = vsub.f32 %v2948_v57, %v984_v38  ;;  %v1016_v16 = vsub.f32 %v920_v6, %v984_v38  ;;  %vm1077_vm11 = vweird.f32 %v2994_v3  ;;  %v1084_v39 = vor.u32 1.1754944e-38, %v1083_v30 }
 0x4e4   :  { %2222 = vmatmul.msk.f32.vlgmr.msrb.gmra.mxu1 %vm1364_vm15, %v1156_v12  ;;  %v1061_v19 = vmul.f32 %v2401_v0, %v1060_v14  ;;  %vm1082_vm13 = vcmp.eq.f32.partialorder %v1081_v32, 8.507059e+37 }
 0x4e5   :  { %v3002_v17 = vpop.eup %2402  ;;  %v1004_v20 = vmul.f32 1.442695, %v992_v15  ;;  %v1028_v21 = vmul.f32 1.442695, %v1016_v16  ;;  %2215 = vmatmul.msk.f32.gmra.mxu2 %vm410_vm14, %v2924_v58 }
 0x4e6   :  { %v3006_v22 = vpop.eup %2404  ;;  %v1062_v42 = vadd.f32 %v2401_v0, %v1061_v19 }
 0x4e7   :  { %v2407_v57 = vpop.eup %2406  ;;  %v3010_v23 = vadd.f32 %v3006_v22, %v3002_v17  ;;  %2408 = vpow2.f32 %v1004_v20 }
 0x4e8   :  { %2410 = vpow2.f32 %v1028_v21  ;;  %v923_v24 = vpop.f32.mrf.mxu2  ;;  %v1066_v25 = vsel %vm1065_vm8, %v2401_v0, %v1062_v42  ;;  %v1073_v26 = vmul.f32 %v2407_v57, %v2994_v3  ;;  %vm1078_vm10 = vweird.f32 %v2407_v57 }
 0x4e9   :  { %2412 = vrcp.f32 %v3010_v23  ;;  %v985_v58 = vmax.f32 %v2952_v18, %v923_v24  ;;  %v1071_v27 = vsel %vm1068_vm9, %v1070_v51, %v1066_v25  ;;  %vm1079_vm12 = vmor %vm1077_vm11, %vm1078_vm10  ;;  %v1097_v55 = vand.u32 2147483648, %v3010_v23 }
 0x4ea   :  { %v1157_v52 = vmul.f32 %v2976_v36, %v1071_v27  ;;  %v1074_v28 = vsub.f32 1.0, %v1073_v26  ;;  %v3019_v31 = vmul.f32 %v2980_v41, %v1071_v27  ;;  %v1095_v60 = vand.u32 2147483647, %v3010_v23 }
 0x4eb   :  { %v993_v29 = vsub.f32 %v2952_v18, %v985_v58  ;;  %v1017_v53 = vsub.f32 %v923_v24, %v985_v58  ;;  %vm1091_vm3 = vweird.f32 %v3010_v23  ;;  %v1098_v6 = vor.u32 1.1754944e-38, %v1097_v55 }
 0x4ec   :  { %2223 = vmatmul.msk.f32.gmra.mxu1 %vm1364_vm15, %v1157_v52  ;;  %v1075_v33 = vmul.f32 %v2407_v57, %v1074_v28  ;;  %vm1096_vm5 = vcmp.eq.f32.partialorder %v1095_v60, 8.507059e+37 }
 0x4ed   :  { %v3023_v34 = vpop.eup %2408  ;;  %v1006_v35 = vmul.f32 1.442695, %v993_v29  ;;  %v1030_v37 = vmul.f32 1.442695, %v1017_v53  ;;  %2216 = vmatmul.msk.f32.gmra.mxu2 %vm410_vm14, %v2930_v2 }
 0x4ee   :  { %v3027_v18 = vpop.eup %2410  ;;  %v1076_v36 = vadd.f32 %v2407_v57, %v1075_v33 }
 0x4ef   :  { %v2413_v40 = vpop.eup %2412  ;;  %v3032_v41 = vadd.f32 %v3027_v18, %v3023_v34  ;;  %2414 = vpow2.f32 %v1006_v35 }
 0x4f0   :  { %2416 = vpow2.f32 %v1030_v37  ;;  %v926_v43 = vpop.f32.mrf.mxu2  ;;  %v1080_v44 = vsel %vm1079_vm12, %v2407_v57, %v1076_v36  ;;  %v1087_v45 = vmul.f32 %v2413_v40, %v3010_v23  ;;  %vm1092_vm2 = vweird.f32 %v2413_v40 }
 0x4f1   :  { %2418 = vrcp.f32 %v3032_v41  ;;  %v986_v2 = vmax.f32 %v2956_v5, %v926_v43  ;;  %v1085_v47 = vsel %vm1082_vm13, %v1084_v39, %v1080_v44  ;;  %vm1093_vm4 = vmor %vm1091_vm3, %vm1092_vm2  ;;  %v1111_v61 = vand.u32 2147483648, %v3032_v41 }
 0x4f2   :  { %v1158_v48 = vmul.f32 %v2986_v56, %v1085_v47  ;;  %v1088_v49 = vsub.f32 1.0, %v1087_v45  ;;  %v3041_v46 = vmul.f32 %v2990_v62, %v1085_v47  ;;  %v1109_v20 = vand.u32 2147483647, %v3032_v41 }
 0x4f3   :  { %v994_v50 = vsub.f32 %v2956_v5, %v986_v2  ;;  %v1018_v54 = vsub.f32 %v926_v43, %v986_v2  ;;  %vm1105_vm7 = vweird.f32 %v3032_v41  ;;  %v1112_v24 = vor.u32 1.1754944e-38, %v1111_v61 }
 0x4f4   :  { %2224 = vmatmul.msk.f32.gmra.mxu1 %vm1364_vm15, %v1158_v48  ;;  %v1089_v59 = vmul.f32 %v2413_v40, %v1088_v49  ;;  %vm1110_vm9 = vcmp.eq.f32.partialorder %v1109_v20, 8.507059e+37 }
 0x4f5   :  { %v3045_v63 = vpop.eup %2414  ;;  %v1008_v0 = vmul.f32 1.442695, %v994_v50  ;;  %v1032_v3 = vmul.f32 1.442695, %v1018_v54  ;;  %2217 = vmatmul.msk.f32.gmra.mxu2 %vm410_vm14, %v2933_v8 }
 0x4f6   :  { %v3049_v5 = vpop.eup %2416  ;;  %v1090_v56 = vadd.f32 %v2413_v40, %v1089_v59 }
 0x4f7   :  { %v2419_v62 = vpop.eup %2418  ;;  %v1041_v4 = vadd.f32 %v3049_v5, %v3045_v63  ;;  %2420 = vpow2.f32 %v1008_v0 }
 0x4f8   :  { %2422 = vpow2.f32 %v1032_v3  ;;  %v929_v7 = vpop.f32.mrf.mxu2  ;;  %v1094_v10 = vsel %vm1093_vm4, %v2413_v40, %v1090_v56  ;;  %v1101_v38 = vmul.f32 %v2419_v62, %v3032_v41  ;;  %vm1106_vm6 = vweird.f32 %v2419_v62 }
 0x4f9   :  { %2424 = vrcp.f32 %v1041_v4  ;;  %v987_v8 = vmax.f32 %v2962_v9, %v929_v7  ;;  %v1099_v11 = vsel %vm1096_vm5, %v1098_v6, %v1094_v10  ;;  %vm1107_vm8 = vmor %vm1105_vm7, %vm1106_vm6  ;;  %v1125_v29 = vand.u32 2147483648, %v1041_v4 }
 0x4fa   :  { %v1159_v12 = vmul.f32 %v3002_v17, %v1099_v11  ;;  %v1102_v14 = vsub.f32 1.0, %v1101_v38  ;;  %v3060_v19 = vmul.f32 %v3006_v22, %v1099_v11  ;;  %v1123_v30 = vand.u32 2147483647, %v1041_v4 }
 0x4fb   :  { %v995_v15 = vsub.f32 %v2962_v9, %v987_v8  ;;  %v1019_v16 = vsub.f32 %v929_v7, %v987_v8  ;;  %vm1119_vm11 = vweird.f32 %v1041_v4  ;;  %v1126_v40 = vor.u32 1.1754944e-38, %v1125_v29 }
 0x4fc   :  { %2225 = vmatmul.msk.f32.gmra.mxu1 %vm1364_vm15, %v1159_v12  ;;  %v1103_v13 = vmul.f32 %v2419_v62, %v1102_v14  ;;  %vm1124_vm13 = vcmp.eq.f32.partialorder %v1123_v30, 8.507059e+37 }
 0x4fd   :  { %v2421_v21 = vpop.eup %2420  ;;  %v1010_v42 = vmul.f32 1.442695, %v995_v15  ;;  %v1034_v57 = vmul.f32 1.442695, %v1019_v16 }
 0x4fe   :  { %v2423_v23 = vpop.eup %2422  ;;  %v1104_v17 = vadd.f32 %v2419_v62, %v1103_v13 }
 0x4ff   :  { %v2425_v9 = vpop.eup %2424  ;;  %v1042_v51 = vadd.f32 %v2423_v23, %v2421_v21  ;;  %2426 = vpow2.f32 %v1010_v42 }
 0x500   :  { %2428 = vpow2.f32 %v1034_v57  ;;  %v3065_v22 = vpop.f32.mrf.mxu2  ;;  %v1108_v25 = vsel %vm1107_vm8, %v2419_v62, %v1104_v17  ;;  %v1115_v26 = vmul.f32 %v2425_v9, %v1041_v4  ;;  %vm1120_vm10 = vweird.f32 %v2425_v9 }
 0x501   :  { %2430 = vrcp.f32 %v1042_v51  ;;  %v1113_v58 = vsel %vm1110_vm9, %v1112_v24, %v1108_v25  ;;  %vm1121_vm12 = vmor %vm1119_vm11, %vm1120_vm10  ;;  %v1139_v2 = vand.u32 2147483648, %v1042_v51  ;;  %v1137_v48 = vand.u32 2147483647, %v1042_v51 }
 0x502   :  { %v1160_v27 = vmul.f32 %v3023_v34, %v1113_v58  ;;  %v1116_v52 = vsub.f32 1.0, %v1115_v26  ;;  %v3069_v28 = vmul.f32 %v3027_v18, %v1113_v58  ;;  %vm1133_vm3 = vweird.f32 %v1042_v51 }
 0x503   :  { %v1140_v54 = vor.u32 1.1754944e-38, %v1139_v2  ;;  %vm1138_vm5 = vcmp.eq.f32.partialorder %v1137_v48, 8.507059e+37 }
 0x504   :  { %2226 = vmatmul.msk.f32.gmra.mxu1 %vm1364_vm15, %v1160_v27  ;;  %v1117_v53 = vmul.f32 %v2425_v9, %v1116_v52 }
 0x505   :  { %v2427_v33 = vpop.eup %2426 }
 0x506   :  { %v2429_v32 = vpop.eup %2428  ;;  %v1118_v35 = vadd.f32 %v2425_v9, %v1117_v53 }
 0x507   :  { %v2431_v37 = vpop.eup %2430  ;;  %v1043_v36 = vadd.f32 %v2429_v32, %v2427_v33 }
 0x508   :  { %v3072_v41 = vpop.f32.mrf.mxu2  ;;  %v1122_v34 = vsel %vm1121_vm12, %v2425_v9, %v1118_v35  ;;  %v1129_v18 = vmul.f32 %v2431_v37, %v1042_v51  ;;  %vm1134_vm2 = vweird.f32 %v2431_v37 }
 0x509   :  { %2432 = vrcp.f32 %v1043_v36  ;;  %v1127_v39 = vsel %vm1124_vm13, %v1126_v40, %v1122_v34  ;;  %vm1135_vm4 = vmor %vm1133_vm3, %vm1134_vm2  ;;  %v1151_v4 = vand.u32 2147483647, %v1043_v36  ;;  %vm1147_vm7 = vweird.f32 %v1043_v36 }
 0x50a   :  { %v1161_v43 = vmul.f32 %v3045_v63, %v1127_v39  ;;  %v1130_v44 = vsub.f32 1.0, %v1129_v18  ;;  %v1169_v45 = vmul.f32 %v3049_v5, %v1127_v39  ;;  %v1153_v5 = vand.u32 2147483648, %v1043_v36 }
 0x50b   :  { %vm1152_vm9 = vcmp.eq.f32.partialorder %v1151_v4, 8.507059e+37 }
 0x50c   :  { %2227 = vmatmul.msk.f32.gmra.mxu1 %vm1364_vm15, %v1161_v43  ;;  %v1131_v47 = vmul.f32 %v2431_v37, %v1130_v44  ;;  %v1154_v7 = vor.u32 1.1754944e-38, %v1153_v5 }
 0x50e   :  { %v1132_v49 = vadd.f32 %v2431_v37, %v1131_v47 }
 0x50f   :  { %v2433_v50 = vpop.eup %2432 }
 0x510   :  { %v938_v55 = vpop.f32.mrf.mxu2  ;;  %v1136_v59 = vsel %vm1135_vm4, %v2431_v37, %v1132_v49  ;;  %v1143_v60 = vmul.f32 %v2433_v50, %v1043_v36  ;;  %vm1148_vm6 = vweird.f32 %v2433_v50 }
 0x511   :  { %v1141_v0 = vsel %vm1138_vm5, %v1140_v54, %v1136_v59  ;;  %vm1149_vm8 = vmor %vm1147_vm7, %vm1148_vm6 }
 0x512   :  { %v1162_v63 = vmul.f32 %v2421_v21, %v1141_v0  ;;  %v1144_v3 = vsub.f32 1.0, %v1143_v60  ;;  %v1170_v56 = vmul.f32 %v2423_v23, %v1141_v0 }
 0x514   :  { %2228 = vmatmul.msk.f32.gmra.mxu1 %vm1364_vm15, %v1162_v63  ;;  %v1145_v62 = vmul.f32 %v2433_v50, %v1144_v3 }
 0x516   :  { %v1146_v6 = vadd.f32 %v2433_v50, %v1145_v62 }
 0x518   :  { %v3078_v10 = vpop.f32.mrf.mxu2  ;;  %v1150_v38 = vsel %vm1149_vm8, %v2433_v50, %v1146_v6 }
 0x519   :  { %v1155_v8 = vsel %vm1152_vm9, %v1154_v7, %v1150_v38 }
 0x51a   :  { %v1163_v11 = vmul.f32 %v2427_v33, %v1155_v8  ;;  %v1171_v12 = vmul.f32 %v2429_v32, %v1155_v8 }
 0x51c   :  { %2229 = vmatmul.msk.f32.gmra.mxu1 %vm1364_vm15, %v1163_v11 }
 0x520   :  { %v3081_v14 = vpop.f32.mrf.mxu2 }
 0x524   :  { %2230 = vmatmul.msk.f32.gmra.mxu1 %vm1364_vm15, %v2999_v1 }
 0x528   :  { %v3085_v15 = vpop.f32.mrf.mxu2 }
 0x52c   :  { %2231 = vmatmul.msk.f32.gmra.mxu1 %vm1364_vm15, %v3019_v31 }
 0x530   :  { %v3089_v16 = vpop.f32.mrf.mxu2 }
 0x534   :  { %2232 = vmatmul.msk.f32.gmra.mxu1 %vm1364_vm15, %v3041_v46  ;;  %v3101_v46 = vpop.trf.xlu0 }
 0x538   :  { %v3093_v61 = vpop.f32.mrf.mxu2 }
 0x53c   :  { %2233 = vmatmul.msk.f32.gmra.mxu1 %vm1364_vm15, %v3060_v19  ;;  %v3106_v27 = vpop.trf.xlu0 }
 0x540   :  { %v956_v13 = vpop.f32.mrf.mxu2 }
 0x541   :  { %v1172_v20 = vmax.f32 %v3065_v22, %v956_v13 }
 0x543   :  { %v1180_v1 = vsub.f32 %v3065_v22, %v1172_v20  ;;  %v1204_v21 = vsub.f32 %v956_v13, %v1172_v20 }
 0x544   :  { %2234 = vmatmul.msk.f32.gmra.mxu1 %vm1364_vm15, %v3069_v28  ;;  %v3120_v2 = vpop.trf.xlu0 }
 0x545   :  { %v1188_v31 = vmul.f32 1.442695, %v1180_v1  ;;  %v1212_v42 = vmul.f32 1.442695, %v1204_v21 }
 0x547   :  { %2434 = vpow2.f32 %v1188_v31 }
 0x548   :  { %2436 = vpow2.f32 %v1212_v42  ;;  %v959_v57 = vpop.f32.mrf.mxu2 }
 0x549   :  { %v1173_v23 = vmax.f32 %v3072_v41, %v959_v57 }
 0x54b   :  { %v1181_v19 = vsub.f32 %v3072_v41, %v1173_v23  ;;  %v1205_v17 = vsub.f32 %v959_v57, %v1173_v23 }
 0x54c   :  { %2235 = vmatmul.msk.f32.gmra.mxu1 %vm1364_vm15, %v1169_v45  ;;  %v3140_v42 = vpop.trf.xlu0 }
 0x54d   :  { %v2435_v9 = vpop.eup %2434  ;;  %v1190_v51 = vmul.f32 1.442695, %v1181_v19  ;;  %v1214_v24 = vmul.f32 1.442695, %v1205_v17 }
 0x54e   :  { %v2437_v22 = vpop.eup %2436 }
 0x54f   :  { %v1228_v25 = vadd.f32 %v2437_v22, %v2435_v9  ;;  %2438 = vpow2.f32 %v1190_v51 }
 0x550   :  { %2440 = vpow2.f32 %v1214_v24  ;;  %v962_v26 = vpop.f32.mrf.mxu2 }
 0x551   :  { %2442 = vrcp.f32 %v1228_v25  ;;  %v1174_v58 = vmax.f32 %v938_v55, %v962_v26  ;;  %v1247_v39 = vand.u32 2147483648, %v1228_v25  ;;  %v1245_v44 = vand.u32 2147483647, %v1228_v25 }
 0x552   :  { %vm1241_vm11 = vweird.f32 %v1228_v25 }
 0x553   :  { %v1182_v52 = vsub.f32 %v938_v55, %v1174_v58  ;;  %v1206_v28 = vsub.f32 %v962_v26, %v1174_v58  ;;  %v1248_v59 = vor.u32 1.1754944e-38, %v1247_v39  ;;  %vm1246_vm13 = vcmp.eq.f32.partialorder %v1245_v44, 8.507059e+37 }
 0x554   :  { %2236 = vmatmul.msk.f32.gmra.mxu1 %vm1364_vm15, %v1170_v56  ;;  %v3169_v39 = vpop.trf.xlu0 }
 0x555   :  { %v3109_v29 = vpop.eup %2438  ;;  %v1192_v53 = vmul.f32 1.442695, %v1182_v52  ;;  %v1216_v30 = vmul.f32 1.442695, %v1206_v28 }
 0x556   :  { %v3111_v33 = vpop.eup %2440 }
 0x557   :  { %v2443_v32 = vpop.eup %2442  ;;  %v1229_v35 = vadd.f32 %v3111_v33, %v3109_v29  ;;  %2444 = vpow2.f32 %v1192_v53 }
 0x558   :  { %2446 = vpow2.f32 %v1216_v30  ;;  %v965_v37 = vpop.f32.mrf.mxu2  ;;  %v1237_v36 = vmul.f32 %v2443_v32, %v1228_v25  ;;  %vm1242_vm10 = vweird.f32 %v2443_v32 }
 0x559   :  { %2448 = vrcp.f32 %v1229_v35  ;;  %v1175_v40 = vmax.f32 %v3078_v10, %v965_v37  ;;  %vm1243_vm12 = vmor %vm1241_vm11, %vm1242_vm10  ;;  %v1261_v38 = vand.u32 2147483648, %v1229_v35  ;;  %v1259_v11 = vand.u32 2147483647, %v1229_v35 }
 0x55a   :  { %v1238_v41 = vsub.f32 1.0, %v1237_v36  ;;  %vm1255_vm3 = vweird.f32 %v1229_v35 }
 0x55b   :  { %v1183_v34 = vsub.f32 %v3078_v10, %v1175_v40  ;;  %v1207_v18 = vsub.f32 %v965_v37, %v1175_v40  ;;  %v1262_v57 = vor.u32 1.1754944e-38, %v1261_v38  ;;  %vm1260_vm5 = vcmp.eq.f32.partialorder %v1259_v11, 8.507059e+37 }
 0x55c   :  { %2237 = vmatmul.msk.f32.gmra.mxu1 %vm1364_vm15, %v1171_v12  ;;  %v1239_v43 = vmul.f32 %v2443_v32, %v1238_v41 }
 0x55d   :  { %v3118_v45 = vpop.eup %2444  ;;  %v1194_v47 = vmul.f32 1.442695, %v1183_v34  ;;  %v1218_v48 = vmul.f32 1.442695, %v1207_v18 }
 0x55e   :  { %v3122_v49 = vpop.eup %2446  ;;  %v1240_v50 = vadd.f32 %v2443_v32, %v1239_v43 }
 0x55f   :  { %v2449_v54 = vpop.eup %2448  ;;  %v3126_v55 = vadd.f32 %v3122_v49, %v3118_v45  ;;  %2450 = vpow2.f32 %v1194_v47 }
 0x560   :  { %2452 = vpow2.f32 %v1218_v48  ;;  %v968_v60 = vpop.f32.mrf.mxu2  ;;  %v1244_v0 = vsel %vm1243_vm12, %v2443_v32, %v1240_v50  ;;  %v1251_v63 = vmul.f32 %v2449_v54, %v1229_v35  ;;  %vm1256_vm2 = vweird.f32 %v2449_v54 }
 0x561   :  { %2454 = vrcp.f32 %v3126_v55  ;;  %v1176_v3 = vmax.f32 %v3081_v14, %v968_v60  ;;  %v3130_v56 = vpop.f32.mrf.mxu1  ;;  %v1249_v5 = vsel %vm1246_vm13, %v1248_v59, %v1244_v0  ;;  %vm1257_vm4 = vmor %vm1255_vm3, %vm1256_vm2  ;;  %v1275_v28 = vand.u32 2147483648, %v3126_v55 }
 0x562   :  { %v1348_v62 = vmul.f32 %v2435_v9, %v1249_v5  ;;  %v3132_v4 = vmul.f32 %v2437_v22, %v1249_v5  ;;  %v1252_v6 = vsub.f32 1.0, %v1251_v63  ;;  %v1273_v30 = vand.u32 2147483647, %v3126_v55 }
 0x563   :  { %v1184_v7 = vsub.f32 %v3081_v14, %v1176_v3  ;;  %v1208_v10 = vsub.f32 %v968_v60, %v1176_v3  ;;  %vm1269_vm7 = vweird.f32 %v3126_v55  ;;  %v1276_v40 = vor.u32 1.1754944e-38, %v1275_v28 }
 0x564   :  { %2238 = vmatmul.msk.f32.gmra.mxu1 %vm1364_vm15, %v1348_v62  ;;  %v1253_v8 = vmul.f32 %v2449_v54, %v1252_v6  ;;  %vm1274_vm9 = vcmp.eq.f32.partialorder %v1273_v30, 8.507059e+37 }
 0x565   :  { %v3136_v12 = vpop.eup %2450  ;;  %v1196_v13 = vmul.f32 1.442695, %v1184_v7  ;;  %v1220_v20 = vmul.f32 1.442695, %v1208_v10 }
 0x566   :  { %v3138_v1 = vpop.eup %2452  ;;  %v1254_v21 = vadd.f32 %v2449_v54, %v1253_v8 }
 0x567   :  { %v2455_v31 = vpop.eup %2454  ;;  %v3144_v14 = vadd.f32 %v3138_v1, %v3136_v12  ;;  %2456 = vpow2.f32 %v1196_v13 }
 0x568   :  { %2458 = vpow2.f32 %v1220_v20  ;;  %v971_v23 = vpop.f32.mrf.mxu2  ;;  %v1258_v19 = vsel %vm1257_vm4, %v2449_v54, %v1254_v21  ;;  %v1265_v17 = vmul.f32 %v2455_v31, %v3126_v55  ;;  %vm1270_vm6 = vweird.f32 %v2455_v31 }
 0x569   :  { %2460 = vrcp.f32 %v3144_v14  ;;  %v1177_v9 = vmax.f32 %v3085_v15, %v971_v23  ;;  %v3149_v51 = vpop.f32.mrf.mxu1  ;;  %v1263_v24 = vsel %vm1260_vm5, %v1262_v57, %v1258_v19  ;;  %vm1271_vm8 = vmor %vm1269_vm7, %vm1270_vm6  ;;  %v1289_v60 = vand.u32 2147483648, %v3144_v14  ;;  %v3198_v57 = vpop.trf.xlu0 }
 0x56a   :  { %v1349_v22 = vmul.f32 %v3109_v29, %v1263_v24  ;;  %v3153_v25 = vmul.f32 %v3111_v33, %v1263_v24  ;;  %v1266_v26 = vsub.f32 1.0, %v1265_v17  ;;  %v1287_v63 = vand.u32 2147483647, %v3144_v14 }
 0x56b   :  { %v1185_v58 = vsub.f32 %v3085_v15, %v1177_v9  ;;  %v1209_v52 = vsub.f32 %v971_v23, %v1177_v9  ;;  %vm1283_vm11 = vweird.f32 %v3144_v14  ;;  %v1290_v7 = vor.u32 1.1754944e-38, %v1289_v60 }
 0x56c   :  { %2239 = vmatmul.msk.f32.gmra.mxu1 %vm1364_vm15, %v1349_v22  ;;  %v1267_v53 = vmul.f32 %v2455_v31, %v1266_v26  ;;  %vm1288_vm13 = vcmp.eq.f32.partialorder %v1287_v63, 8.507059e+37 }
 0x56d   :  { %v3159_v32 = vpop.eup %2456  ;;  %v1198_v35 = vmul.f32 1.442695, %v1185_v58  ;;  %v1222_v37 = vmul.f32 1.442695, %v1209_v52 }
 0x56e   :  { %v3161_v29 = vpop.eup %2458  ;;  %v1268_v33 = vadd.f32 %v2455_v31, %v1267_v53 }
 0x56f   :  { %v2461_v36 = vpop.eup %2460  ;;  %v3166_v15 = vadd.f32 %v3161_v29, %v3159_v32  ;;  %2462 = vpow2.f32 %v1198_v35 }
 0x570   :  { %2464 = vpow2.f32 %v1222_v37  ;;  %v974_v41 = vpop.f32.mrf.mxu2  ;;  %v1272_v34 = vsel %vm1271_vm8, %v2455_v31, %v1268_v33  ;;  %v1279_v18 = vmul.f32 %v2461_v36, %v3144_v14  ;;  %vm1284_vm10 = vweird.f32 %v2461_v36 }
 0x571   :  { %2466 = vrcp.f32 %v3166_v15  ;;  %v1178_v43 = vmax.f32 %v3089_v16, %v974_v41  ;;  %v3173_v44 = vpop.f32.mrf.mxu1  ;;  %v1277_v47 = vsel %vm1274_vm9, %v1276_v40, %v1272_v34  ;;  %vm1285_vm12 = vmor %vm1283_vm11, %vm1284_vm10  ;;  %v1303_v17 = vand.u32 2147483648, %v3166_v15 }
 0x572   :  { %v1350_v48 = vmul.f32 %v3118_v45, %v1277_v47  ;;  %v3177_v50 = vmul.f32 %v3122_v49, %v1277_v47  ;;  %v1280_v54 = vsub.f32 1.0, %v1279_v18  ;;  %v1301_v24 = vand.u32 2147483647, %v3166_v15 }
 0x573   :  { %v1186_v55 = vsub.f32 %v3089_v16, %v1178_v43  ;;  %v1210_v59 = vsub.f32 %v974_v41, %v1178_v43  ;;  %vm1297_vm3 = vweird.f32 %v3166_v15  ;;  %v3212_v43 = vpop.trf.xlu0 }
 0x574   :  { %2240 = vmatmul.msk.f32.gmra.mxu1 %vm1364_vm15, %v1350_v48  ;;  %v1281_v0 = vmul.f32 %v2461_v36, %v1280_v54  ;;  %vm1302_vm5 = vcmp.eq.f32.partialorder %v1301_v24, 8.507059e+37 }
 0x575   :  { %v3183_v3 = vpop.eup %2462  ;;  %v1200_v5 = vmul.f32 1.442695, %v1186_v55  ;;  %v1224_v62 = vmul.f32 1.442695, %v1210_v59 }
 0x576   :  { %v3185_v45 = vpop.eup %2464  ;;  %v1282_v49 = vadd.f32 %v2461_v36, %v1281_v0 }
 0x577   :  { %v2467_v6 = vpop.eup %2466  ;;  %v1233_v16 = vadd.f32 %v3185_v45, %v3183_v3  ;;  %2468 = vpow2.f32 %v1200_v5 }
 0x578   :  { %2470 = vpow2.f32 %v1224_v62  ;;  %v977_v10 = vpop.f32.mrf.mxu2  ;;  %v1286_v38 = vsel %vm1285_vm12, %v2461_v36, %v1282_v49  ;;  %v1293_v8 = vmul.f32 %v2467_v6, %v3166_v15  ;;  %vm1298_vm2 = vweird.f32 %v2467_v6 }
 0x579   :  { %2472 = vrcp.f32 %v1233_v16  ;;  %v1179_v11 = vmax.f32 %v3093_v61, %v977_v10  ;;  %v3192_v13 = vpop.f32.mrf.mxu1  ;;  %v1291_v20 = vsel %vm1288_vm13, %v1290_v7, %v1286_v38  ;;  %vm1299_vm4 = vmor %vm1297_vm3, %vm1298_vm2  ;;  %v1317_v15 = vand.u32 2147483648, %v1233_v16 }
 0x57a   :  { %v1351_v21 = vmul.f32 %v3136_v12, %v1291_v20  ;;  %v3196_v31 = vmul.f32 %v3138_v1, %v1291_v20  ;;  %v1294_v14 = vsub.f32 1.0, %v1293_v8  ;;  %v1315_v34 = vand.u32 2147483647, %v1233_v16 }
 0x57b   :  { %v1187_v23 = vsub.f32 %v3093_v61, %v1179_v11  ;;  %v1211_v19 = vsub.f32 %v977_v10, %v1179_v11  ;;  %v1304_v61 = vor.u32 1.1754944e-38, %v1303_v17  ;;  %vm1311_vm7 = vweird.f32 %v1233_v16  ;;  %v3219_v38 = vpop.trf.xlu0 }
 0x57c   :  { %2241 = vmatmul.msk.f32.gmra.mxu1 %vm1364_vm15, %v1351_v21  ;;  %v1295_v9 = vmul.f32 %v2467_v6, %v1294_v14  ;;  %vm1316_vm9 = vcmp.eq.f32.partialorder %v1315_v34, 8.507059e+37 }
 0x57d   :  { %v2469_v22 = vpop.eup %2468  ;;  %v1202_v26 = vmul.f32 1.442695, %v1187_v23  ;;  %v1226_v12 = vmul.f32 1.442695, %v1211_v19 }
 0x57e   :  { %v2471_v58 = vpop.eup %2470  ;;  %v1296_v1 = vadd.f32 %v2467_v6, %v1295_v9 }
 0x57f   :  { %v2473_v52 = vpop.eup %2472  ;;  %v1234_v28 = vadd.f32 %v2471_v58, %v2469_v22  ;;  %2474 = vpow2.f32 %v1202_v26 }
 0x580   :  { %2476 = vpow2.f32 %v1226_v12  ;;  %v1300_v53 = vsel %vm1299_vm4, %v2467_v6, %v1296_v1  ;;  %v1307_v30 = vmul.f32 %v2473_v52, %v1233_v16  ;;  %vm1312_vm6 = vweird.f32 %v2473_v52 }
 0x581   :  { %2478 = vrcp.f32 %v1234_v28  ;;  %v3205_v35 = vpop.f32.mrf.mxu1  ;;  %v1305_v37 = vsel %vm1302_vm5, %v1304_v61, %v1300_v53  ;;  %vm1313_vm8 = vmor %vm1311_vm7, %vm1312_vm6  ;;  %v1331_v62 = vand.u32 2147483648, %v1234_v28  ;;  %v1329_v16 = vand.u32 2147483647, %v1234_v28 }
 0x582   :  { %v1352_v33 = vmul.f32 %v3159_v32, %v1305_v37  ;;  %v3209_v36 = vmul.f32 %v3161_v29, %v1305_v37  ;;  %v1308_v40 = vsub.f32 1.0, %v1307_v30  ;;  %v1318_v32 = vor.u32 1.1754944e-38, %v1317_v15 }
 0x583   :  { %vm1325_vm11 = vweird.f32 %v1234_v28  ;;  %v1332_v8 = vor.u32 1.1754944e-38, %v1331_v62  ;;  %vm1330_vm13 = vcmp.eq.f32.partialorder %v1329_v16, 8.507059e+37  ;;  %v3224_v1 = vpop.trf.xlu0 }
 0x584   :  { %2242 = vmatmul.msk.f32.gmra.mxu1 %vm1364_vm15, %v1352_v33  ;;  %v1309_v41 = vmul.f32 %v2473_v52, %v1308_v40 }
 0x585   :  { %v2475_v18 = vpop.eup %2474 }
 0x586   :  { %v2477_v47 = vpop.eup %2476  ;;  %v1310_v48 = vadd.f32 %v2473_v52, %v1309_v41 }
 0x587   :  { %v2479_v54 = vpop.eup %2478  ;;  %v1235_v55 = vadd.f32 %v2477_v47, %v2475_v18 }
 0x588   :  { %v1314_v59 = vsel %vm1313_vm8, %v2473_v52, %v1310_v48  ;;  %v1321_v29 = vmul.f32 %v2479_v54, %v1234_v28  ;;  %vm1326_vm10 = vweird.f32 %v2479_v54 }
 0x589   :  { %2480 = vrcp.f32 %v1235_v55  ;;  %v3214_v60 = vpop.f32.mrf.mxu1  ;;  %v1319_v0 = vsel %vm1316_vm9, %v1318_v32, %v1314_v59  ;;  %vm1327_vm12 = vmor %vm1325_vm11, %vm1326_vm10  ;;  %v1345_v19 = vand.u32 2147483648, %v1235_v55  ;;  %v1343_v9 = vand.u32 2147483647, %v1235_v55 }
 0x58a   :  { %v1353_v63 = vmul.f32 %v3183_v3, %v1319_v0  ;;  %v1322_v5 = vsub.f32 1.0, %v1321_v29  ;;  %v1361_v49 = vmul.f32 %v3185_v45, %v1319_v0  ;;  %vm1339_vm3 = vweird.f32 %v1235_v55 }
 0x58b   :  { %v1346_v26 = vor.u32 1.1754944e-38, %v1345_v19  ;;  %vm1344_vm5 = vcmp.eq.f32.partialorder %v1343_v9, 8.507059e+37  ;;  %v3231_v53 = vpop.trf.xlu0 }
 0x58c   :  { %2243 = vmatmul.msk.f32.gmra.mxu1 %vm1364_vm15, %v1353_v63  ;;  %v1323_v6 = vmul.f32 %v2479_v54, %v1322_v5 }
 0x58e   :  { %v1324_v7 = vadd.f32 %v2479_v54, %v1323_v6 }
 0x58f   :  { %v2481_v10 = vpop.eup %2480 }
 0x590   :  { %v1328_v11 = vsel %vm1327_vm12, %v2479_v54, %v1324_v7  ;;  %v1335_v20 = vmul.f32 %v2481_v10, %v1235_v55  ;;  %vm1340_vm2 = vweird.f32 %v2481_v10 }
 0x591   :  { %v3221_v3 = vpop.f32.mrf.mxu1  ;;  %v1333_v21 = vsel %vm1330_vm13, %v1332_v8, %v1328_v11  ;;  %vm1341_vm4 = vmor %vm1339_vm3, %vm1340_vm2 }
 0x592   :  { %v1354_v14 = vmul.f32 %v2469_v22, %v1333_v21  ;;  %v1336_v45 = vsub.f32 1.0, %v1335_v20  ;;  %v1362_v23 = vmul.f32 %v2471_v58, %v1333_v21 }
 0x593   :  { %v3239_v37 = vpop.trf.xlu0 }
 0x594   :  { %2244 = vmatmul.msk.f32.gmra.mxu1 %vm1364_vm15, %v1354_v14  ;;  %v1337_v17 = vmul.f32 %v2481_v10, %v1336_v45 }
 0x596   :  { %v1338_v24 = vadd.f32 %v2481_v10, %v1337_v17 }
 0x598   :  { %v1342_v12 = vsel %vm1341_vm4, %v2481_v10, %v1338_v24 }
 0x599   :  { %v3226_v52 = vpop.f32.mrf.mxu1  ;;  %v1347_v28 = vsel %vm1344_vm5, %v1346_v26, %v1342_v12 }
 0x59a   :  { %v1355_v22 = vmul.f32 %v2475_v18, %v1347_v28  ;;  %v1363_v61 = vmul.f32 %v2477_v47, %v1347_v28 }
 0x59b   :  { %v3245_v40 = vpop.trf.xlu0 }
 0x59c   :  { %2245 = vmatmul.msk.f32.gmra.mxu1 %vm1364_vm15, %v1355_v22 }
 0x5a1   :  { %v3229_v58 = vpop.f32.mrf.mxu1 }
 0x5a4   :  { %2246 = vmatmul.msk.f32.gmra.mxu1 %vm1364_vm15, %v3132_v4  ;;  %v735_v4 = vpop.trf.xlu0 }
 0x5a9   :  { %v3235_v30 = vpop.f32.mrf.mxu1 }
 0x5ac   :  { %2247 = vmatmul.msk.f32.gmra.mxu1 %vm1364_vm15, %v3153_v25  ;;  %v736_v11 = vpop.trf.xlu0 }
 0x5b1   :  { %v3241_v33 = vpop.f32.mrf.mxu1 }
 0x5b4   :  { %2248 = vmatmul.msk.f32.gmra.mxu1 %vm1364_vm15, %v3177_v50  ;;  %v737_v21 = vpop.trf.xlu0 }
 0x5b9   :  { %v3247_v15 = vpop.f32.mrf.mxu1 }
 0x5bc   :  { %2249 = vmatmul.msk.f32.gmra.mxu1 %vm1364_vm15, %v3196_v31  ;;  %v738_v45 = vpop.trf.xlu0 }
 0x5c1   :  { %v1526_v41 = vpop.f32.mrf.mxu1 }
 0x5c2   :  { %v3251_v34 = vmul.f32 %v1526_v41, %v735_v4 }
 0x5c4   :  { %2250 = vmatmul.msk.f32.gmra.mxu1 %vm1364_vm15, %v3209_v36 }
 0x5c9   :  { %v3255_v25 = vpop.f32.mrf.mxu1 }
 0x5cc   :  { %2251 = vmatmul.msk.f32.gmra.mxu1 %vm1364_vm15, %v1361_v49 }
 0x5d1   :  { %v1532_v18 = vpop.f32.mrf.mxu1 }
 0x5d4   :  { %2252 = vmatmul.msk.f32.gmra.mxu1 %vm1364_vm15, %v1362_v23 }
 0x5d9   :  { %v1535_v50 = vpop.f32.mrf.mxu1 }
 0x5dc   :  { %2253 = vmatmul.msk.f32.gmra.mxu1 %vm1364_vm15, %v1363_v61 }
 0x5e1   :  { %v1538_v47 = vpop.f32.mrf.mxu1 }
 0x5e2   :  { %v1610_v36 = vmul.f32 %v1538_v47, %v3101_v46 }
 0x5e9   :  { %v1541_v48 = vpop.f32.mrf.mxu1 }
 0x5ea   :  { %v1611_v49 = vmul.f32 %v1541_v48, %v3106_v27 }
 0x5f1   :  { %v1544_v31 = vpop.f32.mrf.mxu1 }
 0x5f9   :  { %v1547_v54 = vpop.f32.mrf.mxu1 }
 0x601   :  { %v1550_v55 = vpop.f32.mrf.mxu1 }
 0x602   :  { %v1614_v47 = vmul.f32 %v1550_v55, %v3169_v39  ;;  %v1601_v55 = vmul.f32 %v1535_v50, %v738_v45 }
 0x609   :  { %v1553_v32 = vpop.f32.mrf.mxu1 }
 0x60a   :  { %v1615_v22 = vmul.f32 %v1553_v32, %v3198_v57  ;;  %v1612_v32 = vmul.f32 %v1544_v31, %v3120_v2  ;;  %v1599_v31 = vmul.f32 %v3255_v25, %v736_v11  ;;  %v3372_v25 = vld [vmem:[%s3640_s6 + $0x48] sm:$0xff] }
 0x611   :  { %v1556_v59 = vpop.f32.mrf.mxu1 }
 0x612   :  { %v1616_v26 = vmul.f32 %v1556_v59, %v3212_v43 }
 0x619   :  { %v1559_v29 = vpop.f32.mrf.mxu1 }
 0x61a   :  { %v1617_v19 = vmul.f32 %v1559_v29, %v3219_v38 }
 0x621   :  { %v1562_v0 = vpop.f32.mrf.mxu1 }
 0x622   :  { %v1618_v63 = vmul.f32 %v1562_v0, %v3224_v1  ;;  %v1613_v0 = vmul.f32 %v1547_v54, %v3140_v42  ;;  %v1600_v54 = vmul.f32 %v1532_v18, %v737_v21 }
 0x624   :  { %v1626_v5 = vadd.f32 %v1618_v63, %v1610_v36  ;;  %v1593_v63 = vmul.f32 %v3226_v52, %v3219_v38  ;;  %v1590_v38 = vmul.f32 %v3205_v35, %v3169_v39  ;;  %v1597_v52 = vmul.f32 %v3247_v15, %v3245_v40  ;;  %v2254_v39 = vld [vmem:[%s3647_s1 + $0x20] sm:$0xff]  ;;  %v3356_v15 = vld [vmem:[%s3640_s6 + $0x58] sm:$0xff] }
 0x625   :  { %v1588_v35 = vmul.f32 %v3173_v44, %v3120_v2  ;;  %1655 = vrot.lane.b32.xlu1 %v2254_v39, %s2490_s29  ;;  %v2255_v2 = vld [vmem:[%s3647_s1 + $0x28] sm:$0xff]  ;;  %v1586_v44 = vmul.f32 %v3130_v56, %v3101_v46 }
 0x626   :  { %v3338_v56 = vld [vmem:[%s3640_s6 + $0x68] sm:$0xff] }
 0x629   :  { %v1565_v62 = vpop.f32.mrf.mxu1 }
 0x62a   :  { %v1619_v6 = vmul.f32 %v1565_v62, %v3231_v53  ;;  %v1609_v62 = vadd.f32 %v1601_v55, %v1593_v63  ;;  %v1644_v55 = vld [vmem:[%s3647_s1 + $0x10] sm:$0xff] }
 0x62c   :  { %v1627_v16 = vadd.f32 %v1619_v6, %v1611_v49  ;;  %v1592_v49 = vmul.f32 %v3221_v3, %v3212_v43  ;;  %v1606_v43 = vadd.f32 %v3251_v34, %v1590_v38  ;;  %v1589_v3 = vmul.f32 %v3192_v13, %v3140_v42  ;;  %v3364_v34 = vld [vmem:[%s3640_s6 + $0x50] sm:$0xff] }
 0x62d   :  { %v1595_v42 = vmul.f32 %v3235_v30, %v3231_v53  ;;  %v2351_v53 = vld [vmem:[%s3648_s9] sm:$0xff]   ;;  %1657 = vrot.lane.b32.xlu1 %v2255_v2, %s2490_s29  ;;  %v2256_v30 = vld [vmem:[%s3647_s1 + $0x30] sm:$0xff] }
 0x62e   :  { %v1608_v6 = vadd.f32 %v1600_v54, %v1592_v49  ;;  %v2353_v18 = vunpack.c.h.bf16 %v2351_v53 }
 0x631   :  { %v1568_v7 = vpop.f32.mrf.mxu1 }
 0x632   :  { %v1620_v59 = vmul.f32 %v1568_v7, %v3239_v37  ;;  %v1591_v7 = vmul.f32 %v3214_v60, %v3198_v57  ;;  %v1596_v57 = vmul.f32 %v3241_v33, %v3239_v37  ;;  %v1605_v60 = vadd.f32 %v1597_v52, %v1589_v3 }
 0x633   :  { %v1594_v37 = vmul.f32 %v3229_v58, %v3224_v1  ;;  %v2352_v1 = vunpack.c.l.bf16 %v2351_v53  ;;  %v3345_v58 = vld [vmem:[%s3640_s6 + $0x60] sm:$0xff] }
 0x634   :  { %v1607_v50 = vadd.f32 %v1599_v31, %v1591_v7  ;;  %v1604_v13 = vadd.f32 %v1596_v57, %v1588_v35 }
 0x635   :  { %v1602_v46 = vadd.f32 %v1594_v37, %v1586_v44  ;;  %1659 = vrot.lane.b32.xlu1 %v2256_v30, %s2490_s29 }
 0x639   :  { %v1571_v10 = vpop.f32.mrf.mxu1 }
 0x63a   :  { %v1621_v48 = vmul.f32 %v1571_v10, %v3245_v40  ;;  %v1587_v40 = vmul.f32 %v3149_v51, %v3106_v27  ;;  %v3327_v27 = vld [vmem:[%s3640_s6 + $0x78] sm:$0xff]  ;;  %v3332_v51 = vld [vmem:[%s3640_s6 + $0x70] sm:$0xff] }
 0x63b   :  { %1806 = vmatpush.msra.mxu0 %v3327_v27  ;;  %v3389_v10 = vld [vmem:[%s3640_s6 + $0x38] sm:$0xff] }
 0x63c   :  { %v1629_v36 = vadd.f32 %v1621_v48, %v1613_v0  ;;  %v1603_v33 = vadd.f32 %v1595_v42, %v1587_v40  ;;  %v1643_v48 = vld [vmem:[%s3647_s1 + $0x8] sm:$0xff] }
 0x63d   :  { %1807 = vmatpush.msra.mxu0 %v3332_v51 }
 0x63f   :  { %1808 = vmatpush.msra.mxu0 %v3338_v56 }
 0x641   :  { %v1574_v8 = vpop.f32.mrf.mxu1  ;;  %1809 = vmatpush.msra.mxu0 %v3345_v58 }
 0x642   :  { %v1622_v61 = vmul.f32 %v1574_v8, %v735_v4  ;;  %v1628_v4 = vadd.f32 %v1620_v59, %v1612_v32  ;;  %v2363_v8 = vld [vmem:[%s3648_s9 + $0x8] sm:$0xff]  }
 0x643   :  { %1810 = vmatpush.msra.mxu0 %v3356_v15 }
 0x644   :  { %v1630_v29 = vadd.f32 %v1622_v61, %v1614_v47 }
 0x645   :  { %1811 = vmatpush.msra.mxu0 %v3364_v34 }
 0x647   :  { %1812 = vmatpush.msra.mxu0 %v3372_v25 }
 0x649   :  { %v1577_v20 = vpop.f32.mrf.mxu1 }
 0x64a   :  { %v1623_v12 = vmul.f32 %v1577_v20, %v736_v11  ;;  %v3400_v11 = vld [vmem:[%s3640_s6 + $0x30] sm:$0xff]  ;;  %v3408_v20 = vld [vmem:[%s3640_s6 + $0x28] sm:$0xff] }
 0x64c   :  { %v1631_v41 = vadd.f32 %v1623_v12, %v1615_v22  ;;  %v1678_v12 = vpop.permute.xlu2 %1677 }
 0x651   :  { %v1580_v14 = vpop.f32.mrf.mxu1 }
 0x652   :  { %v1624_v9 = vmul.f32 %v1580_v14, %v737_v21  ;;  %v2356_v21 = vunpack.c.l.bf16 %v2363_v8  ;;  %v3414_v14 = vld [vmem:[%s3640_s6 + $0x20] sm:$0xff] }
 0x654   :  { %v1632_v28 = vadd.f32 %v1624_v9, %v1616_v26  ;;  %v3461_v9 = vld [vmem:[%s3640_s6] sm:$0xff]  ;;  %v1688_v63 = vpop.permute.xlu2 %1687 }
 0x655   :  { %v1642_v26 = vld [vmem:[%s3647_s1] sm:$0xff] }
 0x659   :  { %v1583_v23 = vpop.f32.mrf.mxu1 }
 0x65a   :  { %v1625_v17 = vmul.f32 %v1583_v23, %v738_v45  ;;  %v3422_v45 = vld [vmem:[%s3640_s6 + $0x18] sm:$0xff]  ;;  %v2357_v23 = vunpack.c.h.bf16 %v2363_v8 }
 0x65c   :  { %v1633_v24 = vadd.f32 %v1625_v17, %v1617_v19  ;;  %v3447_v19 = vld [vmem:[%s3640_s6 + $0x10] sm:$0xff]  ;;  %v3455_v17 = vld [vmem:[%s3640_s6 + $0x8] sm:$0xff] }
 0x65e   :  { %2258 = vmatpush.xpose.msk.msra.mxu3 %vm410_vm14, %v1633_v24 }
 0x662   :  { %2259 = vmatpush.xpose.msk.msra.mxu3 %vm410_vm14, %v1632_v28 }
 0x666   :  { %2260 = vmatpush.xpose.msk.msra.mxu3 %vm410_vm14, %v1631_v41 }
 0x66a   :  { %2261 = vmatpush.xpose.msk.msra.mxu3 %vm410_vm14, %v1630_v29  ;;  %v1683_v29 = vpop.permute.xlu0 %1682 }
 0x66e   :  { %2262 = vmatpush.xpose.msk.msra.mxu3 %vm410_vm14, %v1629_v36 }
 0x672   :  { %2263 = vmatpush.xpose.msk.msra.mxu3 %vm410_vm14, %v1628_v4 }
 0x676   :  { %2264 = vmatpush.xpose.msk.msra.mxu3 %vm410_vm14, %v1627_v16  ;;  %v2257_v16 = vld [vmem:[%s3647_s1 + $0x38] sm:$0xff] }
 0x677   :  { %1661 = vrot.lane.b32.xlu1 %v2257_v16, %s2490_s29 }
 0x67a   :  { %2265 = vmatpush.xpose.msk.msra.mxu3 %vm410_vm14, %v1626_v5  ;;  %v3378_v5 = vld [vmem:[%s3640_s6 + $0x40] sm:$0xff] }
 0x67b   :  { %1813 = vmatpush.msra.mxu0 %v3378_v5 }
 0x67d   :  { %1814 = vmatpush.msra.mxu0 %v3389_v10 }
 0x67e   :  { %2266 = vmatpush.xpose.msk.msra.mxu3 %vm410_vm14, %v1609_v62 }
 0x67f   :  { %1815 = vmatpush.msra.mxu0 %v3400_v11 }
 0x681   :  { %1816 = vmatpush.msra.mxu0 %v3408_v20 }
 0x682   :  { %2267 = vmatpush.xpose.msk.msra.mxu3 %vm410_vm14, %v1608_v6  ;;  %v1645_v6 = vld [vmem:[%s3647_s1 + $0x18] sm:$0xff] }
 0x683   :  { %1817 = vmatpush.msra.mxu0 %v3414_v14 }
 0x685   :  { %1818 = vmatpush.msra.mxu0 %v3422_v45 }
 0x686   :  { %2268 = vmatpush.xpose.msk.msra.mxu3 %vm410_vm14, %v1607_v50  ;;  %v1693_v50 = vpop.permute.xlu2 %1692 }
 0x687   :  { %1819 = vmatpush.msra.mxu0 %v3447_v19 }
 0x689   :  { %1820 = vmatpush.msra.mxu0 %v3455_v17 }
 0x68a   :  { %2269 = vmatpush.xpose.msk.msra.mxu3 %vm410_vm14, %v1606_v43 }
 0x68b   :  { %1821 = vmatpush.msra.mxu0 %v3461_v9 }
 0x68d   :  { %1936 = vmatpush.msrb.mxu0 %v3327_v27 }
 0x68e   :  { %2270 = vmatpush.xpose.msk.msra.mxu3 %vm410_vm14, %v1605_v60 }
 0x68f   :  { %1937 = vmatpush.msrb.mxu0 %v3332_v51 }
 0x691   :  { %1938 = vmatpush.msrb.mxu0 %v3338_v56 }
 0x692   :  { %2271 = vmatpush.xpose.msk.msra.mxu3 %vm410_vm14, %v1604_v13 }
 0x693   :  { %1939 = vmatpush.msrb.mxu0 %v3345_v58 }
 0x695   :  { %1940 = vmatpush.msrb.mxu0 %v3356_v15 }
 0x696   :  { %2272 = vmatpush.xpose.msk.msra.mxu3 %vm410_vm14, %v1603_v33 }
 0x697   :  { %1941 = vmatpush.msrb.mxu0 %v3364_v34  ;;  %v1656_v24 = vpop.permute.xlu1 %1655 }
 0x698   :  { %v1667_v22 = vsel %vm84_vm1, %v1642_v26, %v1656_v24 }
 0x699   :  { %1942 = vmatpush.msrb.mxu0 %v3372_v25 }
 0x69a   :  { %2273 = vmatpush.xpose.msk.msra.mxu3 %vm410_vm14, %v1602_v46 }
 0x69b   :  { %1943 = vmatpush.msrb.mxu0 %v3378_v5 }
 0x69d   :  { %2274 = vmatmul.msk.f32.vlgmr.msra.gmra.mxu3 %vm410_vm14, %v2352_v1  ;;  %1944 = vmatpush.msrb.mxu0 %v3389_v10 }
 0x69e   :  { %2278 = vmatpush.xpose.msk.msrb.mxu3 %vm136_vm0, %v3327_v27 }
 0x69f   :  { %1945 = vmatpush.msrb.mxu0 %v3400_v11  ;;  %v1658_v41 = vpop.permute.xlu1 %1657 }
 0x6a0   :  { %v1668_v59 = vsel %vm84_vm1, %v1643_v48, %v1658_v41 }
 0x6a1   :  { %1946 = vmatpush.msrb.mxu0 %v3408_v20 }
 0x6a2   :  { %2279 = vmatpush.xpose.msk.msrb.mxu3 %vm136_vm0, %v3332_v51 }
 0x6a3   :  { %1947 = vmatpush.msrb.mxu0 %v3414_v14 }
 0x6a5   :  { %2275 = vmatmul.msk.f32.gmra.mxu3 %vm410_vm14, %v2353_v18  ;;  %1948 = vmatpush.msrb.mxu0 %v3422_v45 }
 0x6a6   :  { %2280 = vmatpush.xpose.msk.msrb.mxu3 %vm136_vm0, %v3338_v56 }
 0x6a7   :  { %1949 = vmatpush.msrb.mxu0 %v3447_v19  ;;  %v1660_v4 = vpop.permute.xlu1 %1659 }
 0x6a8   :  { %v1669_v62 = vsel %vm84_vm1, %v1644_v55, %v1660_v4 }
 0x6a9   :  { %1950 = vmatpush.msrb.mxu0 %v3455_v17 }
 0x6aa   :  { %2281 = vmatpush.xpose.msk.msrb.mxu3 %vm136_vm0, %v3345_v58 }
 0x6ab   :  { %1951 = vmatpush.msrb.mxu0 %v3461_v9 }
 0x6ad   :  { %2276 = vmatmul.msk.f32.gmra.mxu3 %vm410_vm14, %v2356_v21 }
 0x6ae   :  { %2282 = vmatpush.xpose.msk.msrb.mxu3 %vm136_vm0, %v3356_v15 }
 0x6b2   :  { %2283 = vmatpush.xpose.msk.msrb.mxu3 %vm136_vm0, %v3364_v34 }
 0x6b5   :  { %2277 = vmatmul.msk.f32.gmra.mxu3 %vm410_vm14, %v2357_v23 }
 0x6b6   :  { %2284 = vmatpush.xpose.msk.msrb.mxu3 %vm136_vm0, %v3372_v25 }
 0x6ba   :  { %2285 = vmatpush.xpose.msk.msrb.mxu3 %vm136_vm0, %v3378_v5 }
 0x6be   :  { %2286 = vmatpush.xpose.msk.msrb.mxu3 %vm136_vm0, %v3389_v10 }
 0x6c2   :  { %2287 = vmatpush.xpose.msk.msrb.mxu3 %vm136_vm0, %v3400_v11 }
 0x6c6   :  { %2288 = vmatpush.xpose.msk.msrb.mxu3 %vm136_vm0, %v3408_v20 }
 0x6ca   :  { %2289 = vmatpush.xpose.msk.msrb.mxu3 %vm136_vm0, %v3414_v14 }
 0x6ce   :  { %2290 = vmatpush.xpose.msk.msrb.mxu3 %vm136_vm0, %v3422_v45 }
 0x6d2   :  { %2291 = vmatpush.xpose.msk.msrb.mxu3 %vm136_vm0, %v3447_v19 }
 0x6d6   :  { %2292 = vmatpush.xpose.msk.msrb.mxu3 %vm136_vm0, %v3455_v17 }
 0x6da   :  { %2293 = vmatpush.xpose.msk.msrb.mxu3 %vm136_vm0, %v3461_v9 }
 0x6e9   :  { %v1662_v7 = vpop.permute.xlu1 %1661 }
 0x6ea   :  { %v1670_v52 = vsel %vm84_vm1, %v1645_v6, %v1662_v7 }
 0x720   :  { %v1772_v28 = vpop.f32.mrf.mxu3 }
 0x721   :  { %v1773_v61 = vadd.f32 %v1772_v28, %v1678_v12 }
 0x723   :  { %v3486_v47 = vadd.f32 %v1773_v61, %v1667_v22 }
 0x725   :  { %2072 = vst.msk [vmem:[%s3649_s12] sm:$0xff] %vm84_vm1, %v3486_v47  ;;  %2084 = vrot.lane.b32.xlu2 %v3486_v47, %s2490_s29  ;;  %1822 = vmatmul.f32.vlgmr.msra.gmra.mxu0 %v3486_v47 }
 0x726   :  { %2298 = vmatpush.xpose.msk.msra.mxu0 %vm136_vm0, %v3327_v27 }
 0x728   :  { %v1775_v0 = vpop.f32.mrf.mxu3 }
 0x729   :  { %v1776_v36 = vadd.f32 %v1775_v0, %v1683_v29  ;;  %v2376_v29 = vld [vmem:[%s3650_s4] ss:$0 sm:$0xff] }
 0x72a   :  { %2299 = vmatpush.xpose.msk.msra.mxu0 %vm136_vm0, %v3332_v51 }
 0x72b   :  { %v1785_v32 = vadd.f32 %v1776_v36, %v1668_v59 }
 0x72d   :  { %2073 = vst.msk [vmem:[%s3649_s12 + $0x8] sm:$0xff] %vm84_vm1, %v1785_v32  ;;  %2086 = vrot.lane.b32.xlu1 %v1785_v32, %s2490_s29  ;;  %1825 = vmatmul.f32.gmra.mxu0 %v1785_v32 }
 0x72e   :  { %2300 = vmatpush.xpose.msk.msra.mxu0 %vm136_vm0, %v3338_v56 }
 0x730   :  { %v1778_v54 = vpop.f32.mrf.mxu3 }
 0x731   :  { %v1779_v49 = vadd.f32 %v1778_v54, %v1688_v63 }
 0x732   :  { %2301 = vmatpush.xpose.msk.msra.mxu0 %vm136_vm0, %v3345_v58 }
 0x733   :  { %v1786_v31 = vadd.f32 %v1779_v49, %v1669_v62 }
 0x735   :  { %2074 = vst.msk [vmem:[%s3649_s12 + $0x10] sm:$0xff] %vm84_vm1, %v1786_v31  ;;  %2088 = vrot.lane.b32.xlu2 %v1786_v31, %s2490_s29  ;;  %1828 = vmatmul.f32.gmra.mxu0 %v1786_v31 }
 0x736   :  { %2302 = vmatpush.xpose.msk.msra.mxu0 %vm136_vm0, %v3356_v15 }
 0x738   :  { %v1781_v38 = vpop.f32.mrf.mxu3 }
 0x739   :  { %v1782_v43 = vadd.f32 %v1781_v38, %v1693_v50 }
 0x73a   :  { %2303 = vmatpush.xpose.msk.msra.mxu0 %vm136_vm0, %v3364_v34 }
 0x73b   :  { %v1787_v3 = vadd.f32 %v1782_v43, %v1670_v52 }
 0x73d   :  { %2075 = vst.msk [vmem:[%s3649_s12 + $0x18] sm:$0xff] %vm84_vm1, %v1787_v3  ;;  %2090 = vrot.lane.b32.xlu1 %v1787_v3, %s2490_s29  ;;  %1831 = vmatmul.f32.gmra.mxu0 %v1787_v3 }
 0x73e   :  { %2304 = vmatpush.xpose.msk.msra.mxu0 %vm136_vm0, %v3372_v25 }
 0x742   :  { %2305 = vmatpush.xpose.msk.msra.mxu0 %vm136_vm0, %v3378_v5 }
 0x746   :  { %2306 = vmatpush.xpose.msk.msra.mxu0 %vm136_vm0, %v3389_v10 }
 0x74a   :  { %2307 = vmatpush.xpose.msk.msra.mxu0 %vm136_vm0, %v3400_v11 }
 0x74e   :  { %2308 = vmatpush.xpose.msk.msra.mxu0 %vm136_vm0, %v3408_v20 }
 0x752   :  { %2309 = vmatpush.xpose.msk.msra.mxu0 %vm136_vm0, %v3414_v14 }
 0x756   :  { %2310 = vmatpush.xpose.msk.msra.mxu0 %vm136_vm0, %v3422_v45 }
 0x75a   :  { %2311 = vmatpush.xpose.msk.msra.mxu0 %vm136_vm0, %v3447_v19 }
 0x75e   :  { %2312 = vmatpush.xpose.msk.msra.mxu0 %vm136_vm0, %v3455_v17 }
 0x762   :  { %2313 = vmatpush.xpose.msk.msra.mxu0 %vm136_vm0, %v3461_v9 }
 0x77f   :  { %v2085_v57 = vpop.permute.xlu2 %2084 }
 0x780   :  { %2318 = vst.msk [vmem:[%s3649_s12 + $0x20] sm:$0xff] %vm84_vm1, %v2085_v57 }
 0x78f   :  { %v2089_v60 = vpop.permute.xlu2 %2088 }
 0x790   :  { %2320 = vst.msk [vmem:[%s3649_s12 + $0x30] sm:$0xff] %vm84_vm1, %v2089_v60 }
 0x79f   :  { %v2087_v39 = vpop.permute.xlu1 %2086 }
 0x7a0   :  { %2319 = vst.msk [vmem:[%s3649_s12 + $0x28] sm:$0xff] %vm84_vm1, %v2087_v39 }
 0x7a2   :  { %v1823_v35 = vpop.f32.mrf.mxu0 }
 0x7a3   :  { %2294 = vmatmul.msk.f32.vlgmr.msrb.gmra.mxu3 %vm136_vm0, %v1823_v35 }
 0x7aa   :  { %v1826_v42 = vpop.f32.mrf.mxu0 }
 0x7ab   :  { %2295 = vmatmul.msk.f32.gmra.mxu3 %vm136_vm0, %v1826_v42 }
 0x7af   :  { %v2091_v13 = vpop.permute.xlu1 %2090 }
 0x7b0   :  { %2321 = vst.msk [vmem:[%s3649_s12 + $0x38] sm:$0xff] %vm84_vm1, %v2091_v13 }
 0x7b2   :  { %v1829_v40 = vpop.f32.mrf.mxu0 }
 0x7b3   :  { %2296 = vmatmul.msk.f32.gmra.mxu3 %vm136_vm0, %v1829_v40 }
 0x7ba   :  { %v1832_v37 = vpop.f32.mrf.mxu0 }
 0x7bb   :  { %2297 = vmatmul.msk.f32.gmra.mxu3 %vm136_vm0, %v1832_v37 }
 0x826   :  { %v1912_v33 = vpop.f32.mrf.mxu3 }
 0x827   :  { %v1924_v2 = vmul.f32 0.125, %v1912_v33 }
 0x829   :  { %v1928_v44 = vsub.f32 %v3486_v47, %v1924_v2 }
 0x82b   :  { %v1932_v53 = vmul.f32 %v1928_v44, %v1928_v44 }
 0x82d   :  { %1952 = vmatmul.f32.vlgmr.msrb.gmra.mxu0 %v1932_v53 }
 0x82e   :  { %v1915_v27 = vpop.f32.mrf.mxu3 }
 0x82f   :  { %v1925_v51 = vmul.f32 0.125, %v1915_v27 }
 0x831   :  { %v3578_v46 = vsub.f32 %v1785_v32, %v1925_v51  ;;  %v2377_v32 = vld [vmem:[%s3651_s5] ss:$0 sm:$0xff] }
 0x833   :  { %v1933_v56 = vmul.f32 %v3578_v46, %v3578_v46 }
 0x835   :  { %1955 = vmatmul.f32.gmra.mxu0 %v1933_v56 }
 0x836   :  { %v1918_v1 = vpop.f32.mrf.mxu3 }
 0x837   :  { %v1926_v58 = vmul.f32 0.125, %v1918_v1 }
 0x839   :  { %v3582_v30 = vsub.f32 %v1786_v31, %v1926_v58 }
 0x83b   :  { %v1934_v15 = vmul.f32 %v3582_v30, %v3582_v30 }
 0x83d   :  { %1958 = vmatmul.f32.gmra.mxu0 %v1934_v15 }
 0x83e   :  { %v1921_v34 = vpop.f32.mrf.mxu3 }
 0x83f   :  { %v1927_v25 = vmul.f32 0.125, %v1921_v34 }
 0x841   :  { %v3586_v18 = vsub.f32 %v1787_v3, %v1927_v25 }
 0x843   :  { %v1935_v5 = vmul.f32 %v3586_v18, %v3586_v18 }
 0x845   :  { %1961 = vmatmul.f32.gmra.mxu0 %v1935_v5 }
 0x8aa   :  { %v1953_v16 = vpop.f32.mrf.mxu0 }
 0x8ab   :  { %2314 = vmatmul.msk.f32.vlgmr.msra.gmra.mxu0 %vm136_vm0, %v1953_v16 }
 0x8b2   :  { %v1956_v10 = vpop.f32.mrf.mxu0 }
 0x8b3   :  { %2315 = vmatmul.msk.f32.gmra.mxu0 %vm136_vm0, %v1956_v10 }
 0x8ba   :  { %v1959_v8 = vpop.f32.mrf.mxu0 }
 0x8bb   :  { %2316 = vmatmul.msk.f32.gmra.mxu0 %vm136_vm0, %v1959_v8 }
 0x8c2   :  { %v1962_v11 = vpop.f32.mrf.mxu0 }
 0x8c3   :  { %2317 = vmatmul.msk.f32.gmra.mxu0 %vm136_vm0, %v1962_v11 }
 0x928   :  { %v1994_v20 = vpop.f32.mrf.mxu0 }
 0x929   :  { %v2006_v21 = vmul.f32 0.125, %v1994_v20 }
 0x92b   :  { %v2010_v14 = vadd.f32 1e-05, %v2006_v21 }
 0x92d   :  { %2482 = vrsqrt.f32 %v2010_v14  ;;  %vm2020_vm0 = vweird.f32 %v2010_v14 }
 0x930   :  { %v1997_v45 = vpop.f32.mrf.mxu0 }
 0x931   :  { %v2007_v23 = vmul.f32 0.125, %v1997_v45 }
 0x933   :  { %v2483_v19 = vpop.eup %2482  ;;  %v2011_v17 = vadd.f32 1e-05, %v2007_v23 }
 0x934   :  { %v2015_v9 = vmul.f32 %v2483_v19, %v2010_v14  ;;  %vm2021_vm14 = vweird.f32 %v2483_v19 }
 0x935   :  { %2484 = vrsqrt.f32 %v2011_v17  ;;  %vm2022_vm15 = vmor %vm2020_vm0, %vm2021_vm14  ;;  %vm2030_vm7 = vweird.f32 %v2011_v17 }
 0x936   :  { %v2016_v24 = vmul.f32 %v2483_v19, %v2015_v9 }
 0x938   :  { %v2017_v26 = vmul.f32 0.5, %v2016_v24  ;;  %v2000_v12 = vpop.f32.mrf.mxu0 }
 0x939   :  { %v2008_v28 = vmul.f32 0.125, %v2000_v12 }
 0x93a   :  { %v2018_v22 = vsub.f32 1.5, %v2017_v26 }
 0x93b   :  { %v2485_v61 = vpop.eup %2484  ;;  %v2012_v41 = vadd.f32 1e-05, %v2008_v28 }
 0x93c   :  { %v2019_v47 = vmul.f32 %v2483_v19, %v2018_v22  ;;  %v2025_v48 = vmul.f32 %v2485_v61, %v2011_v17  ;;  %vm2031_vm6 = vweird.f32 %v2485_v61 }
 0x93d   :  { %2486 = vrsqrt.f32 %v2012_v41  ;;  %vm2032_vm8 = vmor %vm2030_vm7, %vm2031_vm6  ;;  %vm2040_vm10 = vweird.f32 %v2012_v41 }
 0x93e   :  { %v2023_v0 = vsel %vm2022_vm15, %v2483_v19, %v2019_v47  ;;  %v2026_v59 = vmul.f32 %v2485_v61, %v2025_v48 }
 0x93f   :  { %v2054_v36 = vmul.f32 %v2023_v0, %v1928_v44 }
 0x940   :  { %v2027_v4 = vmul.f32 0.5, %v2026_v59  ;;  %v2003_v55 = vpop.f32.mrf.mxu0 }
 0x941   :  { %v2009_v63 = vmul.f32 0.125, %v2003_v55  ;;  %v2061_v54 = vmul.f32 %v2376_v29, %v2054_v36 }
 0x942   :  { %v2028_v62 = vsub.f32 1.5, %v2027_v4 }
 0x943   :  { %v2487_v49 = vpop.eup %2486  ;;  %v2013_v31 = vadd.f32 1e-05, %v2009_v63  ;;  %v2068_v6 = vadd.f32 %v2377_v32, %v2061_v54 }
 0x944   :  { %v2029_v7 = vmul.f32 %v2485_v61, %v2028_v62  ;;  %v2035_v50 = vmul.f32 %v2487_v49, %v2012_v41  ;;  %vm2041_vm9 = vweird.f32 %v2487_v49 }
 0x945   :  { %2488 = vrsqrt.f32 %v2013_v31  ;;  %2105 = vrot.lane.b32.xlu2 %v2068_v6, %s2490_s29  ;;  %2076 = vst.msk [vmem:[%s3652_s13] sm:$0xff] %vm84_vm1, %v2068_v6  ;;  %vm2042_vm11 = vmor %vm2040_vm10, %vm2041_vm9  ;;  %vm2050_vm13 = vweird.f32 %v2013_v31 }
 0x946   :  { %v2033_v38 = vsel %vm2032_vm8, %v2485_v61, %v2029_v7  ;;  %v2036_v52 = vmul.f32 %v2487_v49, %v2035_v50 }
 0x947   :  { %v2055_v43 = vmul.f32 %v2033_v38, %v3578_v46 }
 0x948   :  { %v2037_v3 = vmul.f32 0.5, %v2036_v52 }
 0x949   :  { %v2062_v57 = vmul.f32 %v2376_v29, %v2055_v43 }
 0x94a   :  { %v2038_v60 = vsub.f32 1.5, %v2037_v3 }
 0x94b   :  { %v2489_v39 = vpop.eup %2488  ;;  %v2069_v35 = vadd.f32 %v2377_v32, %v2062_v57 }
 0x94c   :  { %v2039_v42 = vmul.f32 %v2487_v49, %v2038_v60  ;;  %v2045_v13 = vmul.f32 %v2489_v39, %v2013_v31  ;;  %vm2051_vm12 = vweird.f32 %v2489_v39 }
 0x94d   :  { %2107 = vrot.lane.b32.xlu1 %v2069_v35, %s2490_s29  ;;  %2077 = vst.msk [vmem:[%s3652_s13 + $0x8] sm:$0xff] %vm84_vm1, %v2069_v35  ;;  %vm2052_vm2 = vmor %vm2050_vm13, %vm2051_vm12 }
 0x94e   :  { %v2043_v40 = vsel %vm2042_vm11, %v2487_v49, %v2039_v42  ;;  %v2046_v37 = vmul.f32 %v2489_v39, %v2045_v13 }
 0x94f   :  { %v2056_v33 = vmul.f32 %v2043_v40, %v3582_v30 }
 0x950   :  { %v2047_v2 = vmul.f32 0.5, %v2046_v37 }
 0x951   :  { %v2063_v44 = vmul.f32 %v2376_v29, %v2056_v33 }
 0x952   :  { %v2048_v53 = vsub.f32 1.5, %v2047_v2 }
 0x953   :  { %v2070_v27 = vadd.f32 %v2377_v32, %v2063_v44 }
 0x954   :  { %v2049_v51 = vmul.f32 %v2489_v39, %v2048_v53 }
 0x955   :  { %2109 = vrot.lane.b32.xlu2 %v2070_v27, %s2490_s29  ;;  %2078 = vst.msk [vmem:[%s3652_s13 + $0x10] sm:$0xff] %vm84_vm1, %v2070_v27 }
 0x956   :  { %v2053_v46 = vsel %vm2052_vm2, %v2489_v39, %v2049_v51 }
 0x957   :  { %v2057_v56 = vmul.f32 %v2053_v46, %v3586_v18 }
 0x959   :  { %v2064_v1 = vmul.f32 %v2376_v29, %v2057_v56 }
 0x95b   :  { %v2071_v58 = vadd.f32 %v2377_v32, %v2064_v1 }
 0x95d   :  { %2111 = vrot.lane.b32.xlu0 %v2071_v58, %s2490_s29  ;;  %2079 = vst.msk [vmem:[%s3652_s13 + $0x18] sm:$0xff] %vm84_vm1, %v2071_v58 }
 0x99f   :  { %v2106_v30 = vpop.permute.xlu2 %2105 }
 0x9a0   :  { %2322 = vst.msk [vmem:[%s3652_s13 + $0x20] sm:$0xff] %vm84_vm1, %v2106_v30 }
 0x9af   :  { %v2110_v15 = vpop.permute.xlu2 %2109 }
 0x9b0   :  { %2324 = vst.msk [vmem:[%s3652_s13 + $0x30] sm:$0xff] %vm84_vm1, %v2110_v15 }
 0x9bf   :  { %v2108_v34 = vpop.permute.xlu1 %2107 }
 0x9c0   :  { %2323 = vst.msk [vmem:[%s3652_s13 + $0x28] sm:$0xff] %vm84_vm1, %v2108_v34 }
 0x9cf   :  { %v2112_v25 = vpop.permute.xlu0 %2111 }
 0x9d0   :  { %2325 = vst.msk [vmem:[%s3652_s13 + $0x38] sm:$0xff] %vm84_vm1, %v2112_v25 }

</bundles_post_ra>
